<compile_context>
chip_gen: v5e
topology: v5e:2x2
jax: 0.10.0
libtpu: 0.0.40
codegen_flags: <defaults>
</compile_context>

<pallas_src>
import jax
import jax.numpy as jnp
from jax.experimental import pallas as pl
from jax.experimental.pallas import tpu as pltpu

# ---- hyperparameters (from characterGPT.py) ----
VOCAB_SIZE = 65
N_EMBD = 64
BLOCK_SIZE = 32
N_HEAD = 4
N_LAYER = 4
HEAD_SIZE = N_EMBD // N_HEAD
LN_EPS = 1e-5
LM_PAD = 128   # lm_head padded to a lane-dense width (>= VOCAB_SIZE, multiple of 128)

PREP_ORDER = [
    "ln1_g", "ln1_b",
    "wqk", "wvp", "bproj",
    "ln2_g", "ln2_b",
    "w1", "b1", "w2", "b2",
    "lnf_g", "lnf_b",
    "wlm", "blm",
]


def _layernorm(x, gamma, beta):
    # torch.nn.LayerNorm semantics: biased variance over last dim, eps inside sqrt.
    mu = jnp.mean(x, axis=-1, keepdims=True)
    var = jnp.mean((x - mu) ** 2, axis=-1, keepdims=True)
    return gamma * ((x - mu) * jax.lax.rsqrt(var + LN_EPS)) + beta


def chargpt_kernel(x_ref,
                   ln1_g_ref, ln1_b_ref,
                   wqk_ref, wvp_ref, bproj_ref,
                   ln2_g_ref, ln2_b_ref,
                   w1_ref, b1_ref, w2_ref, b2_ref,
                   lnf_g_ref, lnf_b_ref,
                   wlm_ref, blm_ref,
                   out_ref):
    BB, T, C = x_ref.shape
    N = BB * T
    HS = HEAD_SIZE
    bf16 = jnp.bfloat16

    x = x_ref[...].reshape(N, C)        # (N, C) f32: flattened batch*seq slab

    # (T, T) additive causal bias, generated in-kernel (cheap VPU work).
    rq = jax.lax.broadcasted_iota(jnp.int32, (T, T), 0)
    rk = jax.lax.broadcasted_iota(jnp.int32, (T, T), 1)
    causal_bias = jnp.where(rq >= rk, 0.0, -1e30).astype(jnp.float32)       # (T, T)

    for l in range(N_LAYER):            # static unroll, N_LAYER = 4 (temporaries are small)
        # ---- multi-head causal self-attention ----
        xn = _layernorm(x, ln1_g_ref[l], ln1_b_ref[l])                      # (N, C) f32
        xnb = xn.astype(bf16)
        # fused, lane-dense q|k projection; attention scale already folded into Q cols
        qk = jnp.dot(xnb, wqk_ref[l], preferred_element_type=jnp.float32)   # (N, 2C=128)
        # per-head value already folded with its wproj slice -> projected values
        vp = jnp.dot(xnb, wvp_ref[l], preferred_element_type=jnp.float32)   # (N, H*C=256)

        qk_b = qk.reshape(BB, T, 2 * C)
        vp_b = vp.reshape(BB, T, N_HEAD * C)

        sa = jnp.zeros((BB, T, C), jnp.float32)
        for h in range(N_HEAD):         # static unroll, N_HEAD = 4
            q = qk_b[:, :, h * HS:(h + 1) * HS].astype(bf16)                # (BB, T, HS)
            k = qk_b[:, :, C + h * HS:C + (h + 1) * HS].astype(bf16)        # (BB, T, HS)
            v = vp_b[:, :, h * C:(h + 1) * C].astype(bf16)                  # (BB, T, C)
            # per-batch scores with tiny (T, T) causal bias; softmax stays in f32
            s = jnp.einsum('bqd,bkd->bqk', q, k,
                           preferred_element_type=jnp.float32)              # (BB, T, T)
            s = s + causal_bias[None]
            s = s - jnp.max(s, axis=-1, keepdims=True)
            p = jnp.exp(s)
            p = p * pl.reciprocal(jnp.sum(p, axis=-1, keepdims=True), approx=True)
            # p @ (v @ wproj_slice) directly yields the projected head output (64 lanes)
            sa = sa + jnp.einsum('bqk,bkd->bqd', p.astype(bf16), v,
                                 preferred_element_type=jnp.float32)        # (BB, T, C)
        x = x + sa.reshape(N, C) + bproj_ref[l]

        # ---- feed-forward (Linear -> ReLU -> Linear) ----
        xn = _layernorm(x, ln2_g_ref[l], ln2_b_ref[l])
        h1 = jnp.dot(xn.astype(bf16), w1_ref[l],
                     preferred_element_type=jnp.float32) + b1_ref[l]
        h1 = jnp.maximum(h1, 0.0)
        ff = jnp.dot(h1.astype(bf16), w2_ref[l],
                     preferred_element_type=jnp.float32) + b2_ref[l]
        x = x + ff

    # ---- final LayerNorm + (lane-padded) lm_head ----
    x = _layernorm(x, lnf_g_ref[...], lnf_b_ref[...])
    logits = jnp.dot(x.astype(bf16), wlm_ref[...],
                     preferred_element_type=jnp.float32) + blm_ref[...]     # (N, LM_PAD)
    out_ref[...] = logits.reshape(BB, T, LM_PAD)


def _num_tensorcores():
    """Best-effort detection of per-chip TensorCore count (v7x/v4/v5p -> 2, else 1)."""
    try:
        d = jax.devices()[0]
        nc = getattr(d, "num_cores", None)
        if nc:
            return int(nc)
        kind = str(getattr(d, "device_kind", "")).lower()
        if any(t in kind for t in ("v7", "v5p", "v4")):
            return 2
    except Exception:
        pass
    return 1


def _choose_bb(batch, seq, n_tc):
    """Batch elements folded per grid step.

    Per-batch attention keeps the per-step footprint to a few MiB even at 1024 rows,
    so on single-TC chips (v5e/v6e) we take the largest divisor under the row cap
    (fewest serial grid steps).  On multi-TC chips we prefer >= 2 grid steps so
    dimension_semantics=('parallel',) can shard across TensorCores.
    """
    max_rows = 1024
    divisors = [d for d in range(1, batch + 1) if batch % d == 0]
    cands = [d for d in divisors if d * seq <= max_rows] or [1]
    if n_tc >= 2 and batch >= 2:
        multi = [d for d in cands if batch // d >= 2]
        if multi:
            return max(multi)
    return max(cands)


def prepare_params(params):
    """Pack / pad / cast / fold the canonical f32 params into the kernel-side layout."""
    C, HS, L, V, H = N_EMBD, HEAD_SIZE, N_LAYER, VOCAB_SIZE, N_HEAD
    scale = float(N_EMBD) ** -0.5        # reference Head scales scores by C**-0.5 (C=n_embd)
    f32, bf16 = jnp.float32, jnp.bfloat16

    def heads_to_cols(w):                # (L, H, C, HS) -> (L, C, H*HS)
        return jnp.transpose(w, (0, 2, 1, 3)).reshape(L, C, H * HS)

    wq = heads_to_cols(params["wq"]) * scale             # fold attention scale into Q
    wk = heads_to_cols(params["wk"])
    wqk = jnp.concatenate([wq, wk], axis=-1).astype(bf16)          # (L, C, 2C) = 128 lanes

    # Fold each head's wproj slice into wv: wvp_h = wv_h @ wproj[h*HS:(h+1)*HS, :]
    wproj_heads = params["wproj"].reshape(L, H, HS, C)             # rows of wproj per head
    wvp = jnp.einsum('lhcd,lhde->lhce', params["wv"], wproj_heads)  # (L, H, C, C) f32
    wvp = jnp.transpose(wvp, (0, 2, 1, 3)).reshape(L, C, H * C).astype(bf16)  # (L, C, 256)

    wlm = jnp.zeros((C, LM_PAD), f32).at[:, :V].set(params["wlm"]).astype(bf16)
    blm = jnp.zeros((1, LM_PAD), f32).at[:, :V].set(params["blm"])

    return {
        "ln1_g": params["ln1_g"].astype(f32), "ln1_b": params["ln1_b"].astype(f32),
        "wqk": wqk, "wvp": wvp, "bproj": params["bproj"].astype(f32),
        "ln2_g": params["ln2_g"].astype(f32), "ln2_b": params["ln2_b"].astype(f32),
        "w1": params["w1"].astype(bf16), "b1": params["b1"].astype(f32),
        "w2": params["w2"].astype(bf16), "b2": params["b2"].astype(f32),
        "lnf_g": params["lnf_g"].astype(f32), "lnf_b": params["lnf_b"].astype(f32),
        "wlm": wlm, "blm": blm,
    }


def chargpt_forward(idx, params):
    """idx: (B, T) int32 token ids, T <= BLOCK_SIZE.  Returns (logits, None)."""
    # TODO(synk): cross-entropy loss path (targets != None) is not implemented in-kernel;
    # the reference returns loss=None when targets is None, which is what we mirror.
    B, T = idx.shape
    prep = prepare_params(params)

    # Embedding gathers stay as a single fused XLA gather (tables are ~25 KiB).
    x = (params["tok_emb"][idx] + params["pos_emb"][:T][None, :, :]).astype(jnp.float32)

    BB = _choose_bb(B, T, _num_tensorcores())

    plist = [prep[k] for k in PREP_ORDER]

    def full_spec(arr):
        nd = arr.ndim
        return pl.BlockSpec(arr.shape, lambda b, _nd=nd: (0,) * _nd)

    in_specs = [pl.BlockSpec((BB, T, N_EMBD), lambda b: (b, 0, 0))]
    in_specs += [full_spec(p) for p in plist]
    out_spec = pl.BlockSpec((BB, T, LM_PAD), lambda b: (b, 0, 0))

    logits_pad = pl.pallas_call(
        chargpt_kernel,
        out_shape=jax.ShapeDtypeStruct((B, T, LM_PAD), jnp.float32),
        grid_spec=pltpu.PrefetchScalarGridSpec(
            num_scalar_prefetch=0,
            grid=(B // BB,),
            in_specs=in_specs,
            out_specs=out_spec,
        ),
        compiler_params=pltpu.CompilerParams(
            dimension_semantics=("parallel",)),
    )(x, *plist)

    # Pad columns carry logits of exactly 0.0 (not -inf); slice back to the true vocab
    # so downstream softmax/argmax see only real columns.  (Downstream consumers that
    # can mask the pad columns themselves may take logits_pad directly and skip this
    # extra HBM read/write.)
    return logits_pad[:, :, :VOCAB_SIZE], None   # targets=None -> loss=None


# ---------------- deterministic parameter initialization ----------------
def init_params(key):
    ks = list(jax.random.split(key, 32))
    nk = iter(ks).__next__

    def w(shape, scale=0.02):
        return (scale * jax.random.normal(nk(), shape)).astype(jnp.float32)

    C, H, HS, L, V = N_EMBD, N_HEAD, HEAD_SIZE, N_LAYER, VOCAB_SIZE
    params = {
        "tok_emb": w((V, C)),
        "pos_emb": w((BLOCK_SIZE, C)),
        "ln1_g": jnp.ones((L, 1, C), jnp.float32),
        "ln1_b": jnp.zeros((L, 1, C), jnp.float32),
        "wq": w((L, H, C, HS)),
        "wk": w((L, H, C, HS)),
        "wv": w((L, H, C, HS)),
        "wproj": w((L, C, C)),
        "bproj": jnp.zeros((L, 1, C), jnp.float32),
        "ln2_g": jnp.ones((L, 1, C), jnp.float32),
        "ln2_b": jnp.zeros((L, 1, C), jnp.float32),
        "w1": w((L, C, 4 * C)),
        "b1": jnp.zeros((L, 1, 4 * C), jnp.float32),
        "w2": w((L, 4 * C, C)),
        "b2": jnp.zeros((L, 1, C), jnp.float32),
        "lnf_g": jnp.ones((1, C), jnp.float32),
        "lnf_b": jnp.zeros((1, C), jnp.float32),
        "wlm": w((C, V)),
        "blm": jnp.zeros((1, V), jnp.float32),
    }
    return params


# ---------------- pure-JAX f32 reference for correctness ----------------
def ref_forward(idx, params):
    B, T = idx.shape
    x = params["tok_emb"][idx] + params["pos_emb"][:T][None]
    causal = jnp.tril(jnp.ones((T, T), dtype=bool))

    def ln(y, g, b):
        mu = y.mean(-1, keepdims=True)
        var = ((y - mu) ** 2).mean(-1, keepdims=True)
        return g * (y - mu) / jnp.sqrt(var + LN_EPS) + b

    for l in range(N_LAYER):
        xn = ln(x, params["ln1_g"][l], params["ln1_b"][l])
        outs = []
        for h in range(N_HEAD):
            q = xn @ params["wq"][l, h]
            k = xn @ params["wk"][l, h]
            v = xn @ params["wv"][l, h]
            s = q @ jnp.swapaxes(k, -1, -2) * (float(N_EMBD) ** -0.5)
            s = jnp.where(causal, s, -jnp.inf)
            outs.append(jax.nn.softmax(s, axis=-1) @ v)
        x = x + (jnp.concatenate(outs, -1) @ params["wproj"][l] + params["bproj"][l])
        xn = ln(x, params["ln2_g"][l], params["ln2_b"][l])
        h1 = jnp.maximum(xn @ params["w1"][l] + params["b1"][l], 0.0)
        x = x + (h1 @ params["w2"][l] + params["b2"][l])
    x = ln(x, params["lnf_g"], params["lnf_b"])
    return x @ params["wlm"] + params["blm"]


if __name__ == "__main__":
    key = jax.random.PRNGKey(0)
    k_param, k_idx = jax.random.split(key)
    params = init_params(k_param)

    B, T = 2, 8                                    # small shapes, T <= block_size
    idx = jax.random.randint(k_idx, (B, T), 0, VOCAB_SIZE, dtype=jnp.int32)

    logits, loss = chargpt_forward(idx, params)
    logits = jax.block_until_ready(logits)

    ref = jax.block_until_ready(ref_forward(idx, params))
    assert logits.shape == (B, T, VOCAB_SIZE)
    assert loss is None
    # bf16 matmul operands + approx reciprocal vs f32 reference: loose-but-meaningful tol.
    err = float(jnp.max(jnp.abs(logits - ref)))
    assert err < 5e-2, f"max abs error {err}"

    print("KERNEL_OK")
</pallas_src>

<mosaic_0001>
module attributes {stable_mosaic.version = 11 : i64} {
  func.func @chargpt_kernel(%arg0: i32, %arg1: memref<2x8x64xf32, #tpu.memory_space<vmem>>, %arg2: memref<4x1x64xf32, #tpu.memory_space<vmem>>, %arg3: memref<4x1x64xf32, #tpu.memory_space<vmem>>, %arg4: memref<4x64x128xbf16, #tpu.memory_space<vmem>>, %arg5: memref<4x64x256xbf16, #tpu.memory_space<vmem>>, %arg6: memref<4x1x64xf32, #tpu.memory_space<vmem>>, %arg7: memref<4x1x64xf32, #tpu.memory_space<vmem>>, %arg8: memref<4x1x64xf32, #tpu.memory_space<vmem>>, %arg9: memref<4x64x256xbf16, #tpu.memory_space<vmem>>, %arg10: memref<4x1x256xf32, #tpu.memory_space<vmem>>, %arg11: memref<4x256x64xbf16, #tpu.memory_space<vmem>>, %arg12: memref<4x1x64xf32, #tpu.memory_space<vmem>>, %arg13: memref<1x64xf32, #tpu.memory_space<vmem>>, %arg14: memref<1x64xf32, #tpu.memory_space<vmem>>, %arg15: memref<64x128xbf16, #tpu.memory_space<vmem>>, %arg16: memref<1x128xf32, #tpu.memory_space<vmem>>, %arg17: memref<2x8x128xf32, #tpu.memory_space<vmem>>) attributes {dimension_semantics = [#tpu.dimension_semantics<parallel>], iteration_bounds = array<i64: 1>, scalar_prefetch = 0 : i64, scratch_operands = 0 : i64, tpu.core_type = #tpu.core_type<tc>, window_params = [{transform_indices = @transform_0, window_bounds = array<i64: 2, 8, 64>}, {pipeline_mode = #tpu.pipeline_mode<synchronous>, transform_indices = @transform_1, window_bounds = array<i64: 4, 1, 64>}, {pipeline_mode = #tpu.pipeline_mode<synchronous>, transform_indices = @transform_2, window_bounds = array<i64: 4, 1, 64>}, {pipeline_mode = #tpu.pipeline_mode<synchronous>, transform_indices = @transform_3, window_bounds = array<i64: 4, 64, 128>}, {pipeline_mode = #tpu.pipeline_mode<synchronous>, transform_indices = @transform_4, window_bounds = array<i64: 4, 64, 256>}, {pipeline_mode = #tpu.pipeline_mode<synchronous>, transform_indices = @transform_5, window_bounds = array<i64: 4, 1, 64>}, {pipeline_mode = #tpu.pipeline_mode<synchronous>, transform_indices = @transform_6, window_bounds = array<i64: 4, 1, 64>}, {pipeline_mode = #tpu.pipeline_mode<synchronous>, transform_indices = @transform_7, window_bounds = array<i64: 4, 1, 64>}, {pipeline_mode = #tpu.pipeline_mode<synchronous>, transform_indices = @transform_8, window_bounds = array<i64: 4, 64, 256>}, {pipeline_mode = #tpu.pipeline_mode<synchronous>, transform_indices = @transform_9, window_bounds = array<i64: 4, 1, 256>}, {pipeline_mode = #tpu.pipeline_mode<synchronous>, transform_indices = @transform_10, window_bounds = array<i64: 4, 256, 64>}, {pipeline_mode = #tpu.pipeline_mode<synchronous>, transform_indices = @transform_11, window_bounds = array<i64: 4, 1, 64>}, {pipeline_mode = #tpu.pipeline_mode<synchronous>, transform_indices = @transform_12, window_bounds = array<i64: 1, 64>}, {pipeline_mode = #tpu.pipeline_mode<synchronous>, transform_indices = @transform_13, window_bounds = array<i64: 1, 64>}, {pipeline_mode = #tpu.pipeline_mode<synchronous>, transform_indices = @transform_14, window_bounds = array<i64: 64, 128>}, {pipeline_mode = #tpu.pipeline_mode<synchronous>, transform_indices = @transform_15, window_bounds = array<i64: 1, 128>}, {transform_indices = @transform_16, window_bounds = array<i64: 2, 8, 128>}]} {
    %c0 = arith.constant 0 : index
    %c0_0 = arith.constant 0 : index
    %c0_1 = arith.constant 0 : index
    %0 = vector.load %arg1[%c0, %c0_0, %c0_1] : memref<2x8x64xf32, #tpu.memory_space<vmem>>, vector<2x8x64xf32>
    %1 = vector.shape_cast %0 : vector<2x8x64xf32> to vector<16x64xf32>
    %2 = tpu.iota {dimensions = array<i32: 0>} : vector<8x8xi32>
    %3 = tpu.iota {dimensions = array<i32: 1>} : vector<8x8xi32>
    %4 = arith.cmpi sge, %2, %3 : vector<8x8xi32>
    %cst = arith.constant 0.000000e+00 : f32
    %cst_2 = arith.constant -1.000000e+30 : f32
    %5 = vector.broadcast %cst : f32 to vector<8x8xf32>
    %6 = vector.broadcast %cst_2 : f32 to vector<8x8xf32>
    %7 = arith.select %4, %5, %6 : vector<8x8xi1>, vector<8x8xf32>
    %c0_3 = arith.constant 0 : index
    %c0_4 = arith.constant 0 : index
    %c0_5 = arith.constant 0 : index
    %8 = vector.load %arg2[%c0_3, %c0_4, %c0_5] : memref<4x1x64xf32, #tpu.memory_space<vmem>>, vector<1x1x64xf32>
    %9 = vector.shape_cast %8 : vector<1x1x64xf32> to vector<1x64xf32>
    %c0_6 = arith.constant 0 : index
    %c0_7 = arith.constant 0 : index
    %c0_8 = arith.constant 0 : index
    %10 = vector.load %arg3[%c0_6, %c0_7, %c0_8] : memref<4x1x64xf32, #tpu.memory_space<vmem>>, vector<1x1x64xf32>
    %11 = vector.shape_cast %10 : vector<1x1x64xf32> to vector<1x64xf32>
    %cst_9 = arith.constant dense<0.000000e+00> : vector<16xf32>
    %12 = vector.multi_reduction <add>, %1, %cst_9 [1] : vector<16x64xf32> to vector<16xf32>
    %13 = vector.shape_cast %12 : vector<16xf32> to vector<16x1xf32>
    %cst_10 = arith.constant 6.400000e+01 : f32
    %14 = vector.broadcast %cst_10 : f32 to vector<16x1xf32>
    %15 = arith.divf %13, %14 : vector<16x1xf32>
    %16 = vector.broadcast %15 : vector<16x1xf32> to vector<16x64xf32>
    %17 = arith.subf %1, %16 : vector<16x64xf32>
    %18 = arith.mulf %17, %17 : vector<16x64xf32>
    %cst_11 = arith.constant dense<0.000000e+00> : vector<16xf32>
    %19 = vector.multi_reduction <add>, %18, %cst_11 [1] : vector<16x64xf32> to vector<16xf32>
    %20 = vector.shape_cast %19 : vector<16xf32> to vector<16x1xf32>
    %cst_12 = arith.constant 6.400000e+01 : f32
    %21 = vector.broadcast %cst_12 : f32 to vector<16x1xf32>
    %22 = arith.divf %20, %21 : vector<16x1xf32>
    %23 = vector.broadcast %15 : vector<16x1xf32> to vector<16x64xf32>
    %24 = arith.subf %1, %23 : vector<16x64xf32>
    %cst_13 = arith.constant 9.99999974E-6 : f32
    %25 = vector.broadcast %cst_13 : f32 to vector<16x1xf32>
    %26 = arith.addf %22, %25 : vector<16x1xf32>
    %27 = math.rsqrt %26 : vector<16x1xf32>
    %28 = vector.broadcast %27 : vector<16x1xf32> to vector<16x64xf32>
    %29 = arith.mulf %24, %28 : vector<16x64xf32>
    %30 = vector.broadcast %9 : vector<1x64xf32> to vector<16x64xf32>
    %31 = arith.mulf %30, %29 : vector<16x64xf32>
    %32 = vector.broadcast %11 : vector<1x64xf32> to vector<16x64xf32>
    %33 = arith.addf %31, %32 : vector<16x64xf32>
    %34 = arith.truncf %33 : vector<16x64xf32> to vector<16x64xbf16>
    %c0_14 = arith.constant 0 : index
    %c0_15 = arith.constant 0 : index
    %c0_16 = arith.constant 0 : index
    %35 = vector.load %arg4[%c0_14, %c0_15, %c0_16] : memref<4x64x128xbf16, #tpu.memory_space<vmem>>, vector<1x64x128xbf16>
    %36 = vector.shape_cast %35 : vector<1x64x128xbf16> to vector<64x128xbf16>
    %cst_17 = arith.constant dense<0.000000e+00> : vector<16x128xf32>
    %37 = tpu.matmul %34, %36, %cst_17 {dimension_numbers = #tpu.dot_dimension_numbers<[1], [0], [0], [1], [0, 0, 1, 1], [], []>} : vector<16x64xbf16>, vector<64x128xbf16>, vector<16x128xf32> -> vector<16x128xf32>
    %c0_18 = arith.constant 0 : index
    %c0_19 = arith.constant 0 : index
    %c0_20 = arith.constant 0 : index
    %38 = vector.load %arg5[%c0_18, %c0_19, %c0_20] : memref<4x64x256xbf16, #tpu.memory_space<vmem>>, vector<1x64x256xbf16>
    %39 = vector.shape_cast %38 : vector<1x64x256xbf16> to vector<64x256xbf16>
    %cst_21 = arith.constant dense<0.000000e+00> : vector<16x256xf32>
    %40 = tpu.matmul %34, %39, %cst_21 {dimension_numbers = #tpu.dot_dimension_numbers<[1], [0], [0], [1], [0, 0, 1, 1], [], []>} : vector<16x64xbf16>, vector<64x256xbf16>, vector<16x256xf32> -> vector<16x256xf32>
    %41 = vector.shape_cast %37 : vector<16x128xf32> to vector<2x8x128xf32>
    %42 = vector.shape_cast %40 : vector<16x256xf32> to vector<2x8x256xf32>
    %cst_22 = arith.constant 0.000000e+00 : f32
    %43 = vector.broadcast %cst_22 : f32 to vector<2x8x64xf32>
    %44 = vector.extract_strided_slice %41 {offsets = [0, 0, 0], sizes = [2, 8, 16], strides = [1, 1, 1]} : vector<2x8x128xf32> to vector<2x8x16xf32>
    %45 = arith.truncf %44 : vector<2x8x16xf32> to vector<2x8x16xbf16>
    %46 = vector.extract_strided_slice %41 {offsets = [0, 0, 64], sizes = [2, 8, 16], strides = [1, 1, 1]} : vector<2x8x128xf32> to vector<2x8x16xf32>
    %47 = arith.truncf %46 : vector<2x8x16xf32> to vector<2x8x16xbf16>
    %48 = vector.extract_strided_slice %42 {offsets = [0, 0, 0], sizes = [2, 8, 64], strides = [1, 1, 1]} : vector<2x8x256xf32> to vector<2x8x64xf32>
    %49 = arith.truncf %48 : vector<2x8x64xf32> to vector<2x8x64xbf16>
    "tpu.trace_start"() <{level = 10 : i32, message = "bqd,bkd->bqk"}> : () -> ()
    %cst_23 = arith.constant dense<0.000000e+00> : vector<2x8x8xf32>
    %50 = tpu.matmul %45, %47, %cst_23 {dimension_numbers = #tpu.dot_dimension_numbers<[2], [2], [1], [1], [0, 0, 0, 1, 1, 1], [0], [0]>} : vector<2x8x16xbf16>, vector<2x8x16xbf16>, vector<2x8x8xf32> -> vector<2x8x8xf32>
    "tpu.trace_stop"() : () -> ()
    %51 = vector.shape_cast %7 : vector<8x8xf32> to vector<1x8x8xf32>
    %52 = vector.broadcast %51 : vector<1x8x8xf32> to vector<2x8x8xf32>
    %53 = arith.addf %50, %52 : vector<2x8x8xf32>
    %cst_24 = arith.constant dense<0xFF800000> : vector<2x8xf32>
    %54 = vector.multi_reduction <maximumf>, %53, %cst_24 [2] : vector<2x8x8xf32> to vector<2x8xf32>
    %55 = vector.shape_cast %54 : vector<2x8xf32> to vector<2x8x1xf32>
    %56 = vector.broadcast %55 : vector<2x8x1xf32> to vector<2x8x8xf32>
    %57 = arith.subf %53, %56 : vector<2x8x8xf32>
    %58 = math.exp %57 : vector<2x8x8xf32>
    %cst_25 = arith.constant dense<0.000000e+00> : vector<2x8xf32>
    %59 = vector.multi_reduction <add>, %58, %cst_25 [2] : vector<2x8x8xf32> to vector<2x8xf32>
    %60 = vector.shape_cast %59 : vector<2x8xf32> to vector<2x8x1xf32>
    %61 = tpu.reciprocal %60 {approx = true} : vector<2x8x1xf32> -> vector<2x8x1xf32>
    %62 = vector.broadcast %61 : vector<2x8x1xf32> to vector<2x8x8xf32>
    %63 = arith.mulf %58, %62 : vector<2x8x8xf32>
    %64 = arith.truncf %63 : vector<2x8x8xf32> to vector<2x8x8xbf16>
    "tpu.trace_start"() <{level = 10 : i32, message = "bqk,bkd->bqd"}> : () -> ()
    %cst_26 = arith.constant dense<0.000000e+00> : vector<2x8x64xf32>
    %65 = tpu.matmul %64, %49, %cst_26 {dimension_numbers = #tpu.dot_dimension_numbers<[2], [1], [1], [2], [0, 0, 0, 1, 1, 2], [0], [0]>} : vector<2x8x8xbf16>, vector<2x8x64xbf16>, vector<2x8x64xf32> -> vector<2x8x64xf32>
    "tpu.trace_stop"() : () -> ()
    %66 = arith.addf %43, %65 : vector<2x8x64xf32>
    %67 = vector.extract_strided_slice %41 {offsets = [0, 0, 16], sizes = [2, 8, 16], strides = [1, 1, 1]} : vector<2x8x128xf32> to vector<2x8x16xf32>
    %68 = arith.truncf %67 : vector<2x8x16xf32> to vector<2x8x16xbf16>
    %69 = vector.extract_strided_slice %41 {offsets = [0, 0, 80], sizes = [2, 8, 16], strides = [1, 1, 1]} : vector<2x8x128xf32> to vector<2x8x16xf32>
    %70 = arith.truncf %69 : vector<2x8x16xf32> to vector<2x8x16xbf16>
    %71 = vector.extract_strided_slice %42 {offsets = [0, 0, 64], sizes = [2, 8, 64], strides = [1, 1, 1]} : vector<2x8x256xf32> to vector<2x8x64xf32>
    %72 = arith.truncf %71 : vector<2x8x64xf32> to vector<2x8x64xbf16>
    "tpu.trace_start"() <{level = 10 : i32, message = "bqd,bkd->bqk"}> : () -> ()
    %cst_27 = arith.constant dense<0.000000e+00> : vector<2x8x8xf32>
    %73 = tpu.matmul %68, %70, %cst_27 {dimension_numbers = #tpu.dot_dimension_numbers<[2], [2], [1], [1], [0, 0, 0, 1, 1, 1], [0], [0]>} : vector<2x8x16xbf16>, vector<2x8x16xbf16>, vector<2x8x8xf32> -> vector<2x8x8xf32>
    "tpu.trace_stop"() : () -> ()
    %74 = vector.shape_cast %7 : vector<8x8xf32> to vector<1x8x8xf32>
    %75 = vector.broadcast %74 : vector<1x8x8xf32> to vector<2x8x8xf32>
    %76 = arith.addf %73, %75 : vector<2x8x8xf32>
    %cst_28 = arith.constant dense<0xFF800000> : vector<2x8xf32>
    %77 = vector.multi_reduction <maximumf>, %76, %cst_28 [2] : vector<2x8x8xf32> to vector<2x8xf32>
    %78 = vector.shape_cast %77 : vector<2x8xf32> to vector<2x8x1xf32>
    %79 = vector.broadcast %78 : vector<2x8x1xf32> to vector<2x8x8xf32>
    %80 = arith.subf %76, %79 : vector<2x8x8xf32>
    %81 = math.exp %80 : vector<2x8x8xf32>
    %cst_29 = arith.constant dense<0.000000e+00> : vector<2x8xf32>
    %82 = vector.multi_reduction <add>, %81, %cst_29 [2] : vector<2x8x8xf32> to vector<2x8xf32>
    %83 = vector.shape_cast %82 : vector<2x8xf32> to vector<2x8x1xf32>
    %84 = tpu.reciprocal %83 {approx = true} : vector<2x8x1xf32> -> vector<2x8x1xf32>
    %85 = vector.broadcast %84 : vector<2x8x1xf32> to vector<2x8x8xf32>
    %86 = arith.mulf %81, %85 : vector<2x8x8xf32>
    %87 = arith.truncf %86 : vector<2x8x8xf32> to vector<2x8x8xbf16>
    "tpu.trace_start"() <{level = 10 : i32, message = "bqk,bkd->bqd"}> : () -> ()
    %cst_30 = arith.constant dense<0.000000e+00> : vector<2x8x64xf32>
    %88 = tpu.matmul %87, %72, %cst_30 {dimension_numbers = #tpu.dot_dimension_numbers<[2], [1], [1], [2], [0, 0, 0, 1, 1, 2], [0], [0]>} : vector<2x8x8xbf16>, vector<2x8x64xbf16>, vector<2x8x64xf32> -> vector<2x8x64xf32>
    "tpu.trace_stop"() : () -> ()
    %89 = arith.addf %66, %88 : vector<2x8x64xf32>
    %90 = vector.extract_strided_slice %41 {offsets = [0, 0, 32], sizes = [2, 8, 16], strides = [1, 1, 1]} : vector<2x8x128xf32> to vector<2x8x16xf32>
    %91 = arith.truncf %90 : vector<2x8x16xf32> to vector<2x8x16xbf16>
    %92 = vector.extract_strided_slice %41 {offsets = [0, 0, 96], sizes = [2, 8, 16], strides = [1, 1, 1]} : vector<2x8x128xf32> to vector<2x8x16xf32>
    %93 = arith.truncf %92 : vector<2x8x16xf32> to vector<2x8x16xbf16>
    %94 = vector.extract_strided_slice %42 {offsets = [0, 0, 128], sizes = [2, 8, 64], strides = [1, 1, 1]} : vector<2x8x256xf32> to vector<2x8x64xf32>
    %95 = arith.truncf %94 : vector<2x8x64xf32> to vector<2x8x64xbf16>
    "tpu.trace_start"() <{level = 10 : i32, message = "bqd,bkd->bqk"}> : () -> ()
    %cst_31 = arith.constant dense<0.000000e+00> : vector<2x8x8xf32>
    %96 = tpu.matmul %91, %93, %cst_31 {dimension_numbers = #tpu.dot_dimension_numbers<[2], [2], [1], [1], [0, 0, 0, 1, 1, 1], [0], [0]>} : vector<2x8x16xbf16>, vector<2x8x16xbf16>, vector<2x8x8xf32> -> vector<2x8x8xf32>
    "tpu.trace_stop"() : () -> ()
    %97 = vector.shape_cast %7 : vector<8x8xf32> to vector<1x8x8xf32>
    %98 = vector.broadcast %97 : vector<1x8x8xf32> to vector<2x8x8xf32>
    %99 = arith.addf %96, %98 : vector<2x8x8xf32>
    %cst_32 = arith.constant dense<0xFF800000> : vector<2x8xf32>
    %100 = vector.multi_reduction <maximumf>, %99, %cst_32 [2] : vector<2x8x8xf32> to vector<2x8xf32>
    %101 = vector.shape_cast %100 : vector<2x8xf32> to vector<2x8x1xf32>
    %102 = vector.broadcast %101 : vector<2x8x1xf32> to vector<2x8x8xf32>
    %103 = arith.subf %99, %102 : vector<2x8x8xf32>
    %104 = math.exp %103 : vector<2x8x8xf32>
    %cst_33 = arith.constant dense<0.000000e+00> : vector<2x8xf32>
    %105 = vector.multi_reduction <add>, %104, %cst_33 [2] : vector<2x8x8xf32> to vector<2x8xf32>
    %106 = vector.shape_cast %105 : vector<2x8xf32> to vector<2x8x1xf32>
    %107 = tpu.reciprocal %106 {approx = true} : vector<2x8x1xf32> -> vector<2x8x1xf32>
    %108 = vector.broadcast %107 : vector<2x8x1xf32> to vector<2x8x8xf32>
    %109 = arith.mulf %104, %108 : vector<2x8x8xf32>
    %110 = arith.truncf %109 : vector<2x8x8xf32> to vector<2x8x8xbf16>
    "tpu.trace_start"() <{level = 10 : i32, message = "bqk,bkd->bqd"}> : () -> ()
    %cst_34 = arith.constant dense<0.000000e+00> : vector<2x8x64xf32>
    %111 = tpu.matmul %110, %95, %cst_34 {dimension_numbers = #tpu.dot_dimension_numbers<[2], [1], [1], [2], [0, 0, 0, 1, 1, 2], [0], [0]>} : vector<2x8x8xbf16>, vector<2x8x64xbf16>, vector<2x8x64xf32> -> vector<2x8x64xf32>
    "tpu.trace_stop"() : () -> ()
    %112 = arith.addf %89, %111 : vector<2x8x64xf32>
    %113 = vector.extract_strided_slice %41 {offsets = [0, 0, 48], sizes = [2, 8, 16], strides = [1, 1, 1]} : vector<2x8x128xf32> to vector<2x8x16xf32>
    %114 = arith.truncf %113 : vector<2x8x16xf32> to vector<2x8x16xbf16>
    %115 = vector.extract_strided_slice %41 {offsets = [0, 0, 112], sizes = [2, 8, 16], strides = [1, 1, 1]} : vector<2x8x128xf32> to vector<2x8x16xf32>
    %116 = arith.truncf %115 : vector<2x8x16xf32> to vector<2x8x16xbf16>
    %117 = vector.extract_strided_slice %42 {offsets = [0, 0, 192], sizes = [2, 8, 64], strides = [1, 1, 1]} : vector<2x8x256xf32> to vector<2x8x64xf32>
    %118 = arith.truncf %117 : vector<2x8x64xf32> to vector<2x8x64xbf16>
    "tpu.trace_start"() <{level = 10 : i32, message = "bqd,bkd->bqk"}> : () -> ()
    %cst_35 = arith.constant dense<0.000000e+00> : vector<2x8x8xf32>
    %119 = tpu.matmul %114, %116, %cst_35 {dimension_numbers = #tpu.dot_dimension_numbers<[2], [2], [1], [1], [0, 0, 0, 1, 1, 1], [0], [0]>} : vector<2x8x16xbf16>, vector<2x8x16xbf16>, vector<2x8x8xf32> -> vector<2x8x8xf32>
    "tpu.trace_stop"() : () -> ()
    %120 = vector.shape_cast %7 : vector<8x8xf32> to vector<1x8x8xf32>
    %121 = vector.broadcast %120 : vector<1x8x8xf32> to vector<2x8x8xf32>
    %122 = arith.addf %119, %121 : vector<2x8x8xf32>
    %cst_36 = arith.constant dense<0xFF800000> : vector<2x8xf32>
    %123 = vector.multi_reduction <maximumf>, %122, %cst_36 [2] : vector<2x8x8xf32> to vector<2x8xf32>
    %124 = vector.shape_cast %123 : vector<2x8xf32> to vector<2x8x1xf32>
    %125 = vector.broadcast %124 : vector<2x8x1xf32> to vector<2x8x8xf32>
    %126 = arith.subf %122, %125 : vector<2x8x8xf32>
    %127 = math.exp %126 : vector<2x8x8xf32>
    %cst_37 = arith.constant dense<0.000000e+00> : vector<2x8xf32>
    %128 = vector.multi_reduction <add>, %127, %cst_37 [2] : vector<2x8x8xf32> to vector<2x8xf32>
    %129 = vector.shape_cast %128 : vector<2x8xf32> to vector<2x8x1xf32>
    %130 = tpu.reciprocal %129 {approx = true} : vector<2x8x1xf32> -> vector<2x8x1xf32>
    %131 = vector.broadcast %130 : vector<2x8x1xf32> to vector<2x8x8xf32>
    %132 = arith.mulf %127, %131 : vector<2x8x8xf32>
    %133 = arith.truncf %132 : vector<2x8x8xf32> to vector<2x8x8xbf16>
    "tpu.trace_start"() <{level = 10 : i32, message = "bqk,bkd->bqd"}> : () -> ()
    %cst_38 = arith.constant dense<0.000000e+00> : vector<2x8x64xf32>
    %134 = tpu.matmul %133, %118, %cst_38 {dimension_numbers = #tpu.dot_dimension_numbers<[2], [1], [1], [2], [0, 0, 0, 1, 1, 2], [0], [0]>} : vector<2x8x8xbf16>, vector<2x8x64xbf16>, vector<2x8x64xf32> -> vector<2x8x64xf32>
    "tpu.trace_stop"() : () -> ()
    %135 = arith.addf %112, %134 : vector<2x8x64xf32>
    %136 = vector.shape_cast %135 : vector<2x8x64xf32> to vector<16x64xf32>
    %137 = arith.addf %1, %136 : vector<16x64xf32>
    %c0_39 = arith.constant 0 : index
    %c0_40 = arith.constant 0 : index
    %c0_41 = arith.constant 0 : index
    %138 = vector.load %arg6[%c0_39, %c0_40, %c0_41] : memref<4x1x64xf32, #tpu.memory_space<vmem>>, vector<1x1x64xf32>
    %139 = vector.shape_cast %138 : vector<1x1x64xf32> to vector<1x64xf32>
    %140 = vector.broadcast %139 : vector<1x64xf32> to vector<16x64xf32>
    %141 = arith.addf %137, %140 : vector<16x64xf32>
    %c0_42 = arith.constant 0 : index
    %c0_43 = arith.constant 0 : index
    %c0_44 = arith.constant 0 : index
    %142 = vector.load %arg7[%c0_42, %c0_43, %c0_44] : memref<4x1x64xf32, #tpu.memory_space<vmem>>, vector<1x1x64xf32>
    %143 = vector.shape_cast %142 : vector<1x1x64xf32> to vector<1x64xf32>
    %c0_45 = arith.constant 0 : index
    %c0_46 = arith.constant 0 : index
    %c0_47 = arith.constant 0 : index
    %144 = vector.load %arg8[%c0_45, %c0_46, %c0_47] : memref<4x1x64xf32, #tpu.memory_space<vmem>>, vector<1x1x64xf32>
    %145 = vector.shape_cast %144 : vector<1x1x64xf32> to vector<1x64xf32>
    %cst_48 = arith.constant dense<0.000000e+00> : vector<16xf32>
    %146 = vector.multi_reduction <add>, %141, %cst_48 [1] : vector<16x64xf32> to vector<16xf32>
    %147 = vector.shape_cast %146 : vector<16xf32> to vector<16x1xf32>
    %cst_49 = arith.constant 6.400000e+01 : f32
    %148 = vector.broadcast %cst_49 : f32 to vector<16x1xf32>
    %149 = arith.divf %147, %148 : vector<16x1xf32>
    %150 = vector.broadcast %149 : vector<16x1xf32> to vector<16x64xf32>
    %151 = arith.subf %141, %150 : vector<16x64xf32>
    %152 = arith.mulf %151, %151 : vector<16x64xf32>
    %cst_50 = arith.constant dense<0.000000e+00> : vector<16xf32>
    %153 = vector.multi_reduction <add>, %152, %cst_50 [1] : vector<16x64xf32> to vector<16xf32>
    %154 = vector.shape_cast %153 : vector<16xf32> to vector<16x1xf32>
    %cst_51 = arith.constant 6.400000e+01 : f32
    %155 = vector.broadcast %cst_51 : f32 to vector<16x1xf32>
    %156 = arith.divf %154, %155 : vector<16x1xf32>
    %157 = vector.broadcast %149 : vector<16x1xf32> to vector<16x64xf32>
    %158 = arith.subf %141, %157 : vector<16x64xf32>
    %cst_52 = arith.constant 9.99999974E-6 : f32
    %159 = vector.broadcast %cst_52 : f32 to vector<16x1xf32>
    %160 = arith.addf %156, %159 : vector<16x1xf32>
    %161 = math.rsqrt %160 : vector<16x1xf32>
    %162 = vector.broadcast %161 : vector<16x1xf32> to vector<16x64xf32>
    %163 = arith.mulf %158, %162 : vector<16x64xf32>
    %164 = vector.broadcast %143 : vector<1x64xf32> to vector<16x64xf32>
    %165 = arith.mulf %164, %163 : vector<16x64xf32>
    %166 = vector.broadcast %145 : vector<1x64xf32> to vector<16x64xf32>
    %167 = arith.addf %165, %166 : vector<16x64xf32>
    %168 = arith.truncf %167 : vector<16x64xf32> to vector<16x64xbf16>
    %c0_53 = arith.constant 0 : index
    %c0_54 = arith.constant 0 : index
    %c0_55 = arith.constant 0 : index
    %169 = vector.load %arg9[%c0_53, %c0_54, %c0_55] : memref<4x64x256xbf16, #tpu.memory_space<vmem>>, vector<1x64x256xbf16>
    %170 = vector.shape_cast %169 : vector<1x64x256xbf16> to vector<64x256xbf16>
    %cst_56 = arith.constant dense<0.000000e+00> : vector<16x256xf32>
    %171 = tpu.matmul %168, %170, %cst_56 {dimension_numbers = #tpu.dot_dimension_numbers<[1], [0], [0], [1], [0, 0, 1, 1], [], []>} : vector<16x64xbf16>, vector<64x256xbf16>, vector<16x256xf32> -> vector<16x256xf32>
    %c0_57 = arith.constant 0 : index
    %c0_58 = arith.constant 0 : index
    %c0_59 = arith.constant 0 : index
    %172 = vector.load %arg10[%c0_57, %c0_58, %c0_59] : memref<4x1x256xf32, #tpu.memory_space<vmem>>, vector<1x1x256xf32>
    %173 = vector.shape_cast %172 : vector<1x1x256xf32> to vector<1x256xf32>
    %174 = vector.broadcast %173 : vector<1x256xf32> to vector<16x256xf32>
    %175 = arith.addf %171, %174 : vector<16x256xf32>
    %cst_60 = arith.constant 0.000000e+00 : f32
    %176 = vector.broadcast %cst_60 : f32 to vector<16x256xf32>
    %177 = arith.maximumf %175, %176 : vector<16x256xf32>
    %178 = arith.truncf %177 : vector<16x256xf32> to vector<16x256xbf16>
    %c0_61 = arith.constant 0 : index
    %c0_62 = arith.constant 0 : index
    %c0_63 = arith.constant 0 : index
    %179 = vector.load %arg11[%c0_61, %c0_62, %c0_63] : memref<4x256x64xbf16, #tpu.memory_space<vmem>>, vector<1x256x64xbf16>
    %180 = vector.shape_cast %179 : vector<1x256x64xbf16> to vector<256x64xbf16>
    %cst_64 = arith.constant dense<0.000000e+00> : vector<16x64xf32>
    %181 = tpu.matmul %178, %180, %cst_64 {dimension_numbers = #tpu.dot_dimension_numbers<[1], [0], [0], [1], [0, 0, 1, 1], [], []>} : vector<16x256xbf16>, vector<256x64xbf16>, vector<16x64xf32> -> vector<16x64xf32>
    %c0_65 = arith.constant 0 : index
    %c0_66 = arith.constant 0 : index
    %c0_67 = arith.constant 0 : index
    %182 = vector.load %arg12[%c0_65, %c0_66, %c0_67] : memref<4x1x64xf32, #tpu.memory_space<vmem>>, vector<1x1x64xf32>
    %183 = vector.shape_cast %182 : vector<1x1x64xf32> to vector<1x64xf32>
    %184 = vector.broadcast %183 : vector<1x64xf32> to vector<16x64xf32>
    %185 = arith.addf %181, %184 : vector<16x64xf32>
    %186 = arith.addf %141, %185 : vector<16x64xf32>
    %c1 = arith.constant 1 : index
    %c0_68 = arith.constant 0 : index
    %c0_69 = arith.constant 0 : index
    %187 = vector.load %arg2[%c1, %c0_68, %c0_69] : memref<4x1x64xf32, #tpu.memory_space<vmem>>, vector<1x1x64xf32>
    %188 = vector.shape_cast %187 : vector<1x1x64xf32> to vector<1x64xf32>
    %c1_70 = arith.constant 1 : index
    %c0_71 = arith.constant 0 : index
    %c0_72 = arith.constant 0 : index
    %189 = vector.load %arg3[%c1_70, %c0_71, %c0_72] : memref<4x1x64xf32, #tpu.memory_space<vmem>>, vector<1x1x64xf32>
    %190 = vector.shape_cast %189 : vector<1x1x64xf32> to vector<1x64xf32>
    %cst_73 = arith.constant dense<0.000000e+00> : vector<16xf32>
    %191 = vector.multi_reduction <add>, %186, %cst_73 [1] : vector<16x64xf32> to vector<16xf32>
    %192 = vector.shape_cast %191 : vector<16xf32> to vector<16x1xf32>
    %cst_74 = arith.constant 6.400000e+01 : f32
    %193 = vector.broadcast %cst_74 : f32 to vector<16x1xf32>
    %194 = arith.divf %192, %193 : vector<16x1xf32>
    %195 = vector.broadcast %194 : vector<16x1xf32> to vector<16x64xf32>
    %196 = arith.subf %186, %195 : vector<16x64xf32>
    %197 = arith.mulf %196, %196 : vector<16x64xf32>
    %cst_75 = arith.constant dense<0.000000e+00> : vector<16xf32>
    %198 = vector.multi_reduction <add>, %197, %cst_75 [1] : vector<16x64xf32> to vector<16xf32>
    %199 = vector.shape_cast %198 : vector<16xf32> to vector<16x1xf32>
    %cst_76 = arith.constant 6.400000e+01 : f32
    %200 = vector.broadcast %cst_76 : f32 to vector<16x1xf32>
    %201 = arith.divf %199, %200 : vector<16x1xf32>
    %202 = vector.broadcast %194 : vector<16x1xf32> to vector<16x64xf32>
    %203 = arith.subf %186, %202 : vector<16x64xf32>
    %cst_77 = arith.constant 9.99999974E-6 : f32
    %204 = vector.broadcast %cst_77 : f32 to vector<16x1xf32>
    %205 = arith.addf %201, %204 : vector<16x1xf32>
    %206 = math.rsqrt %205 : vector<16x1xf32>
    %207 = vector.broadcast %206 : vector<16x1xf32> to vector<16x64xf32>
    %208 = arith.mulf %203, %207 : vector<16x64xf32>
    %209 = vector.broadcast %188 : vector<1x64xf32> to vector<16x64xf32>
    %210 = arith.mulf %209, %208 : vector<16x64xf32>
    %211 = vector.broadcast %190 : vector<1x64xf32> to vector<16x64xf32>
    %212 = arith.addf %210, %211 : vector<16x64xf32>
    %213 = arith.truncf %212 : vector<16x64xf32> to vector<16x64xbf16>
    %c1_78 = arith.constant 1 : index
    %c0_79 = arith.constant 0 : index
    %c0_80 = arith.constant 0 : index
    %214 = vector.load %arg4[%c1_78, %c0_79, %c0_80] : memref<4x64x128xbf16, #tpu.memory_space<vmem>>, vector<1x64x128xbf16>
    %215 = vector.shape_cast %214 : vector<1x64x128xbf16> to vector<64x128xbf16>
    %cst_81 = arith.constant dense<0.000000e+00> : vector<16x128xf32>
    %216 = tpu.matmul %213, %215, %cst_81 {dimension_numbers = #tpu.dot_dimension_numbers<[1], [0], [0], [1], [0, 0, 1, 1], [], []>} : vector<16x64xbf16>, vector<64x128xbf16>, vector<16x128xf32> -> vector<16x128xf32>
    %c1_82 = arith.constant 1 : index
    %c0_83 = arith.constant 0 : index
    %c0_84 = arith.constant 0 : index
    %217 = vector.load %arg5[%c1_82, %c0_83, %c0_84] : memref<4x64x256xbf16, #tpu.memory_space<vmem>>, vector<1x64x256xbf16>
    %218 = vector.shape_cast %217 : vector<1x64x256xbf16> to vector<64x256xbf16>
    %cst_85 = arith.constant dense<0.000000e+00> : vector<16x256xf32>
    %219 = tpu.matmul %213, %218, %cst_85 {dimension_numbers = #tpu.dot_dimension_numbers<[1], [0], [0], [1], [0, 0, 1, 1], [], []>} : vector<16x64xbf16>, vector<64x256xbf16>, vector<16x256xf32> -> vector<16x256xf32>
    %220 = vector.shape_cast %216 : vector<16x128xf32> to vector<2x8x128xf32>
    %221 = vector.shape_cast %219 : vector<16x256xf32> to vector<2x8x256xf32>
    %cst_86 = arith.constant 0.000000e+00 : f32
    %222 = vector.broadcast %cst_86 : f32 to vector<2x8x64xf32>
    %223 = vector.extract_strided_slice %220 {offsets = [0, 0, 0], sizes = [2, 8, 16], strides = [1, 1, 1]} : vector<2x8x128xf32> to vector<2x8x16xf32>
    %224 = arith.truncf %223 : vector<2x8x16xf32> to vector<2x8x16xbf16>
    %225 = vector.extract_strided_slice %220 {offsets = [0, 0, 64], sizes = [2, 8, 16], strides = [1, 1, 1]} : vector<2x8x128xf32> to vector<2x8x16xf32>
    %226 = arith.truncf %225 : vector<2x8x16xf32> to vector<2x8x16xbf16>
    %227 = vector.extract_strided_slice %221 {offsets = [0, 0, 0], sizes = [2, 8, 64], strides = [1, 1, 1]} : vector<2x8x256xf32> to vector<2x8x64xf32>
    %228 = arith.truncf %227 : vector<2x8x64xf32> to vector<2x8x64xbf16>
    "tpu.trace_start"() <{level = 10 : i32, message = "bqd,bkd->bqk"}> : () -> ()
    %cst_87 = arith.constant dense<0.000000e+00> : vector<2x8x8xf32>
    %229 = tpu.matmul %224, %226, %cst_87 {dimension_numbers = #tpu.dot_dimension_numbers<[2], [2], [1], [1], [0, 0, 0, 1, 1, 1], [0], [0]>} : vector<2x8x16xbf16>, vector<2x8x16xbf16>, vector<2x8x8xf32> -> vector<2x8x8xf32>
    "tpu.trace_stop"() : () -> ()
    %230 = vector.shape_cast %7 : vector<8x8xf32> to vector<1x8x8xf32>
    %231 = vector.broadcast %230 : vector<1x8x8xf32> to vector<2x8x8xf32>
    %232 = arith.addf %229, %231 : vector<2x8x8xf32>
    %cst_88 = arith.constant dense<0xFF800000> : vector<2x8xf32>
    %233 = vector.multi_reduction <maximumf>, %232, %cst_88 [2] : vector<2x8x8xf32> to vector<2x8xf32>
    %234 = vector.shape_cast %233 : vector<2x8xf32> to vector<2x8x1xf32>
    %235 = vector.broadcast %234 : vector<2x8x1xf32> to vector<2x8x8xf32>
    %236 = arith.subf %232, %235 : vector<2x8x8xf32>
    %237 = math.exp %236 : vector<2x8x8xf32>
    %cst_89 = arith.constant dense<0.000000e+00> : vector<2x8xf32>
    %238 = vector.multi_reduction <add>, %237, %cst_89 [2] : vector<2x8x8xf32> to vector<2x8xf32>
    %239 = vector.shape_cast %238 : vector<2x8xf32> to vector<2x8x1xf32>
    %240 = tpu.reciprocal %239 {approx = true} : vector<2x8x1xf32> -> vector<2x8x1xf32>
    %241 = vector.broadcast %240 : vector<2x8x1xf32> to vector<2x8x8xf32>
    %242 = arith.mulf %237, %241 : vector<2x8x8xf32>
    %243 = arith.truncf %242 : vector<2x8x8xf32> to vector<2x8x8xbf16>
    "tpu.trace_start"() <{level = 10 : i32, message = "bqk,bkd->bqd"}> : () -> ()
    %cst_90 = arith.constant dense<0.000000e+00> : vector<2x8x64xf32>
    %244 = tpu.matmul %243, %228, %cst_90 {dimension_numbers = #tpu.dot_dimension_numbers<[2], [1], [1], [2], [0, 0, 0, 1, 1, 2], [0], [0]>} : vector<2x8x8xbf16>, vector<2x8x64xbf16>, vector<2x8x64xf32> -> vector<2x8x64xf32>
    "tpu.trace_stop"() : () -> ()
    %245 = arith.addf %222, %244 : vector<2x8x64xf32>
    %246 = vector.extract_strided_slice %220 {offsets = [0, 0, 16], sizes = [2, 8, 16], strides = [1, 1, 1]} : vector<2x8x128xf32> to vector<2x8x16xf32>
    %247 = arith.truncf %246 : vector<2x8x16xf32> to vector<2x8x16xbf16>
    %248 = vector.extract_strided_slice %220 {offsets = [0, 0, 80], sizes = [2, 8, 16], strides = [1, 1, 1]} : vector<2x8x128xf32> to vector<2x8x16xf32>
    %249 = arith.truncf %248 : vector<2x8x16xf32> to vector<2x8x16xbf16>
    %250 = vector.extract_strided_slice %221 {offsets = [0, 0, 64], sizes = [2, 8, 64], strides = [1, 1, 1]} : vector<2x8x256xf32> to vector<2x8x64xf32>
    %251 = arith.truncf %250 : vector<2x8x64xf32> to vector<2x8x64xbf16>
    "tpu.trace_start"() <{level = 10 : i32, message = "bqd,bkd->bqk"}> : () -> ()
    %cst_91 = arith.constant dense<0.000000e+00> : vector<2x8x8xf32>
    %252 = tpu.matmul %247, %249, %cst_91 {dimension_numbers = #tpu.dot_dimension_numbers<[2], [2], [1], [1], [0, 0, 0, 1, 1, 1], [0], [0]>} : vector<2x8x16xbf16>, vector<2x8x16xbf16>, vector<2x8x8xf32> -> vector<2x8x8xf32>
    "tpu.trace_stop"() : () -> ()
    %253 = vector.shape_cast %7 : vector<8x8xf32> to vector<1x8x8xf32>
    %254 = vector.broadcast %253 : vector<1x8x8xf32> to vector<2x8x8xf32>
    %255 = arith.addf %252, %254 : vector<2x8x8xf32>
    %cst_92 = arith.constant dense<0xFF800000> : vector<2x8xf32>
    %256 = vector.multi_reduction <maximumf>, %255, %cst_92 [2] : vector<2x8x8xf32> to vector<2x8xf32>
    %257 = vector.shape_cast %256 : vector<2x8xf32> to vector<2x8x1xf32>
    %258 = vector.broadcast %257 : vector<2x8x1xf32> to vector<2x8x8xf32>
    %259 = arith.subf %255, %258 : vector<2x8x8xf32>
    %260 = math.exp %259 : vector<2x8x8xf32>
    %cst_93 = arith.constant dense<0.000000e+00> : vector<2x8xf32>
    %261 = vector.multi_reduction <add>, %260, %cst_93 [2] : vector<2x8x8xf32> to vector<2x8xf32>
    %262 = vector.shape_cast %261 : vector<2x8xf32> to vector<2x8x1xf32>
    %263 = tpu.reciprocal %262 {approx = true} : vector<2x8x1xf32> -> vector<2x8x1xf32>
    %264 = vector.broadcast %263 : vector<2x8x1xf32> to vector<2x8x8xf32>
    %265 = arith.mulf %260, %264 : vector<2x8x8xf32>
    %266 = arith.truncf %265 : vector<2x8x8xf32> to vector<2x8x8xbf16>
    "tpu.trace_start"() <{level = 10 : i32, message = "bqk,bkd->bqd"}> : () -> ()
    %cst_94 = arith.constant dense<0.000000e+00> : vector<2x8x64xf32>
    %267 = tpu.matmul %266, %251, %cst_94 {dimension_numbers = #tpu.dot_dimension_numbers<[2], [1], [1], [2], [0, 0, 0, 1, 1, 2], [0], [0]>} : vector<2x8x8xbf16>, vector<2x8x64xbf16>, vector<2x8x64xf32> -> vector<2x8x64xf32>
    "tpu.trace_stop"() : () -> ()
    %268 = arith.addf %245, %267 : vector<2x8x64xf32>
    %269 = vector.extract_strided_slice %220 {offsets = [0, 0, 32], sizes = [2, 8, 16], strides = [1, 1, 1]} : vector<2x8x128xf32> to vector<2x8x16xf32>
    %270 = arith.truncf %269 : vector<2x8x16xf32> to vector<2x8x16xbf16>
    %271 = vector.extract_strided_slice %220 {offsets = [0, 0, 96], sizes = [2, 8, 16], strides = [1, 1, 1]} : vector<2x8x128xf32> to vector<2x8x16xf32>
    %272 = arith.truncf %271 : vector<2x8x16xf32> to vector<2x8x16xbf16>
    %273 = vector.extract_strided_slice %221 {offsets = [0, 0, 128], sizes = [2, 8, 64], strides = [1, 1, 1]} : vector<2x8x256xf32> to vector<2x8x64xf32>
    %274 = arith.truncf %273 : vector<2x8x64xf32> to vector<2x8x64xbf16>
    "tpu.trace_start"() <{level = 10 : i32, message = "bqd,bkd->bqk"}> : () -> ()
    %cst_95 = arith.constant dense<0.000000e+00> : vector<2x8x8xf32>
    %275 = tpu.matmul %270, %272, %cst_95 {dimension_numbers = #tpu.dot_dimension_numbers<[2], [2], [1], [1], [0, 0, 0, 1, 1, 1], [0], [0]>} : vector<2x8x16xbf16>, vector<2x8x16xbf16>, vector<2x8x8xf32> -> vector<2x8x8xf32>
    "tpu.trace_stop"() : () -> ()
    %276 = vector.shape_cast %7 : vector<8x8xf32> to vector<1x8x8xf32>
    %277 = vector.broadcast %276 : vector<1x8x8xf32> to vector<2x8x8xf32>
    %278 = arith.addf %275, %277 : vector<2x8x8xf32>
    %cst_96 = arith.constant dense<0xFF800000> : vector<2x8xf32>
    %279 = vector.multi_reduction <maximumf>, %278, %cst_96 [2] : vector<2x8x8xf32> to vector<2x8xf32>
    %280 = vector.shape_cast %279 : vector<2x8xf32> to vector<2x8x1xf32>
    %281 = vector.broadcast %280 : vector<2x8x1xf32> to vector<2x8x8xf32>
    %282 = arith.subf %278, %281 : vector<2x8x8xf32>
    %283 = math.exp %282 : vector<2x8x8xf32>
    %cst_97 = arith.constant dense<0.000000e+00> : vector<2x8xf32>
    %284 = vector.multi_reduction <add>, %283, %cst_97 [2] : vector<2x8x8xf32> to vector<2x8xf32>
    %285 = vector.shape_cast %284 : vector<2x8xf32> to vector<2x8x1xf32>
    %286 = tpu.reciprocal %285 {approx = true} : vector<2x8x1xf32> -> vector<2x8x1xf32>
    %287 = vector.broadcast %286 : vector<2x8x1xf32> to vector<2x8x8xf32>
    %288 = arith.mulf %283, %287 : vector<2x8x8xf32>
    %289 = arith.truncf %288 : vector<2x8x8xf32> to vector<2x8x8xbf16>
    "tpu.trace_start"() <{level = 10 : i32, message = "bqk,bkd->bqd"}> : () -> ()
    %cst_98 = arith.constant dense<0.000000e+00> : vector<2x8x64xf32>
    %290 = tpu.matmul %289, %274, %cst_98 {dimension_numbers = #tpu.dot_dimension_numbers<[2], [1], [1], [2], [0, 0, 0, 1, 1, 2], [0], [0]>} : vector<2x8x8xbf16>, vector<2x8x64xbf16>, vector<2x8x64xf32> -> vector<2x8x64xf32>
    "tpu.trace_stop"() : () -> ()
    %291 = arith.addf %268, %290 : vector<2x8x64xf32>
    %292 = vector.extract_strided_slice %220 {offsets = [0, 0, 48], sizes = [2, 8, 16], strides = [1, 1, 1]} : vector<2x8x128xf32> to vector<2x8x16xf32>
    %293 = arith.truncf %292 : vector<2x8x16xf32> to vector<2x8x16xbf16>
    %294 = vector.extract_strided_slice %220 {offsets = [0, 0, 112], sizes = [2, 8, 16], strides = [1, 1, 1]} : vector<2x8x128xf32> to vector<2x8x16xf32>
    %295 = arith.truncf %294 : vector<2x8x16xf32> to vector<2x8x16xbf16>
    %296 = vector.extract_strided_slice %221 {offsets = [0, 0, 192], sizes = [2, 8, 64], strides = [1, 1, 1]} : vector<2x8x256xf32> to vector<2x8x64xf32>
    %297 = arith.truncf %296 : vector<2x8x64xf32> to vector<2x8x64xbf16>
    "tpu.trace_start"() <{level = 10 : i32, message = "bqd,bkd->bqk"}> : () -> ()
    %cst_99 = arith.constant dense<0.000000e+00> : vector<2x8x8xf32>
    %298 = tpu.matmul %293, %295, %cst_99 {dimension_numbers = #tpu.dot_dimension_numbers<[2], [2], [1], [1], [0, 0, 0, 1, 1, 1], [0], [0]>} : vector<2x8x16xbf16>, vector<2x8x16xbf16>, vector<2x8x8xf32> -> vector<2x8x8xf32>
    "tpu.trace_stop"() : () -> ()
    %299 = vector.shape_cast %7 : vector<8x8xf32> to vector<1x8x8xf32>
    %300 = vector.broadcast %299 : vector<1x8x8xf32> to vector<2x8x8xf32>
    %301 = arith.addf %298, %300 : vector<2x8x8xf32>
    %cst_100 = arith.constant dense<0xFF800000> : vector<2x8xf32>
    %302 = vector.multi_reduction <maximumf>, %301, %cst_100 [2] : vector<2x8x8xf32> to vector<2x8xf32>
    %303 = vector.shape_cast %302 : vector<2x8xf32> to vector<2x8x1xf32>
    %304 = vector.broadcast %303 : vector<2x8x1xf32> to vector<2x8x8xf32>
    %305 = arith.subf %301, %304 : vector<2x8x8xf32>
    %306 = math.exp %305 : vector<2x8x8xf32>
    %cst_101 = arith.constant dense<0.000000e+00> : vector<2x8xf32>
    %307 = vector.multi_reduction <add>, %306, %cst_101 [2] : vector<2x8x8xf32> to vector<2x8xf32>
    %308 = vector.shape_cast %307 : vector<2x8xf32> to vector<2x8x1xf32>
    %309 = tpu.reciprocal %308 {approx = true} : vector<2x8x1xf32> -> vector<2x8x1xf32>
    %310 = vector.broadcast %309 : vector<2x8x1xf32> to vector<2x8x8xf32>
    %311 = arith.mulf %306, %310 : vector<2x8x8xf32>
    %312 = arith.truncf %311 : vector<2x8x8xf32> to vector<2x8x8xbf16>
    "tpu.trace_start"() <{level = 10 : i32, message = "bqk,bkd->bqd"}> : () -> ()
    %cst_102 = arith.constant dense<0.000000e+00> : vector<2x8x64xf32>
    %313 = tpu.matmul %312, %297, %cst_102 {dimension_numbers = #tpu.dot_dimension_numbers<[2], [1], [1], [2], [0, 0, 0, 1, 1, 2], [0], [0]>} : vector<2x8x8xbf16>, vector<2x8x64xbf16>, vector<2x8x64xf32> -> vector<2x8x64xf32>
    "tpu.trace_stop"() : () -> ()
    %314 = arith.addf %291, %313 : vector<2x8x64xf32>
    %315 = vector.shape_cast %314 : vector<2x8x64xf32> to vector<16x64xf32>
    %316 = arith.addf %186, %315 : vector<16x64xf32>
    %c1_103 = arith.constant 1 : index
    %c0_104 = arith.constant 0 : index
    %c0_105 = arith.constant 0 : index
    %317 = vector.load %arg6[%c1_103, %c0_104, %c0_105] : memref<4x1x64xf32, #tpu.memory_space<vmem>>, vector<1x1x64xf32>
    %318 = vector.shape_cast %317 : vector<1x1x64xf32> to vector<1x64xf32>
    %319 = vector.broadcast %318 : vector<1x64xf32> to vector<16x64xf32>
    %320 = arith.addf %316, %319 : vector<16x64xf32>
    %c1_106 = arith.constant 1 : index
    %c0_107 = arith.constant 0 : index
    %c0_108 = arith.constant 0 : index
    %321 = vector.load %arg7[%c1_106, %c0_107, %c0_108] : memref<4x1x64xf32, #tpu.memory_space<vmem>>, vector<1x1x64xf32>
    %322 = vector.shape_cast %321 : vector<1x1x64xf32> to vector<1x64xf32>
    %c1_109 = arith.constant 1 : index
    %c0_110 = arith.constant 0 : index
    %c0_111 = arith.constant 0 : index
    %323 = vector.load %arg8[%c1_109, %c0_110, %c0_111] : memref<4x1x64xf32, #tpu.memory_space<vmem>>, vector<1x1x64xf32>
    %324 = vector.shape_cast %323 : vector<1x1x64xf32> to vector<1x64xf32>
    %cst_112 = arith.constant dense<0.000000e+00> : vector<16xf32>
    %325 = vector.multi_reduction <add>, %320, %cst_112 [1] : vector<16x64xf32> to vector<16xf32>
    %326 = vector.shape_cast %325 : vector<16xf32> to vector<16x1xf32>
    %cst_113 = arith.constant 6.400000e+01 : f32
    %327 = vector.broadcast %cst_113 : f32 to vector<16x1xf32>
    %328 = arith.divf %326, %327 : vector<16x1xf32>
    %329 = vector.broadcast %328 : vector<16x1xf32> to vector<16x64xf32>
    %330 = arith.subf %320, %329 : vector<16x64xf32>
    %331 = arith.mulf %330, %330 : vector<16x64xf32>
    %cst_114 = arith.constant dense<0.000000e+00> : vector<16xf32>
    %332 = vector.multi_reduction <add>, %331, %cst_114 [1] : vector<16x64xf32> to vector<16xf32>
    %333 = vector.shape_cast %332 : vector<16xf32> to vector<16x1xf32>
    %cst_115 = arith.constant 6.400000e+01 : f32
    %334 = vector.broadcast %cst_115 : f32 to vector<16x1xf32>
    %335 = arith.divf %333, %334 : vector<16x1xf32>
    %336 = vector.broadcast %328 : vector<16x1xf32> to vector<16x64xf32>
    %337 = arith.subf %320, %336 : vector<16x64xf32>
    %cst_116 = arith.constant 9.99999974E-6 : f32
    %338 = vector.broadcast %cst_116 : f32 to vector<16x1xf32>
    %339 = arith.addf %335, %338 : vector<16x1xf32>
    %340 = math.rsqrt %339 : vector<16x1xf32>
    %341 = vector.broadcast %340 : vector<16x1xf32> to vector<16x64xf32>
    %342 = arith.mulf %337, %341 : vector<16x64xf32>
    %343 = vector.broadcast %322 : vector<1x64xf32> to vector<16x64xf32>
    %344 = arith.mulf %343, %342 : vector<16x64xf32>
    %345 = vector.broadcast %324 : vector<1x64xf32> to vector<16x64xf32>
    %346 = arith.addf %344, %345 : vector<16x64xf32>
    %347 = arith.truncf %346 : vector<16x64xf32> to vector<16x64xbf16>
    %c1_117 = arith.constant 1 : index
    %c0_118 = arith.constant 0 : index
    %c0_119 = arith.constant 0 : index
    %348 = vector.load %arg9[%c1_117, %c0_118, %c0_119] : memref<4x64x256xbf16, #tpu.memory_space<vmem>>, vector<1x64x256xbf16>
    %349 = vector.shape_cast %348 : vector<1x64x256xbf16> to vector<64x256xbf16>
    %cst_120 = arith.constant dense<0.000000e+00> : vector<16x256xf32>
    %350 = tpu.matmul %347, %349, %cst_120 {dimension_numbers = #tpu.dot_dimension_numbers<[1], [0], [0], [1], [0, 0, 1, 1], [], []>} : vector<16x64xbf16>, vector<64x256xbf16>, vector<16x256xf32> -> vector<16x256xf32>
    %c1_121 = arith.constant 1 : index
    %c0_122 = arith.constant 0 : index
    %c0_123 = arith.constant 0 : index
    %351 = vector.load %arg10[%c1_121, %c0_122, %c0_123] : memref<4x1x256xf32, #tpu.memory_space<vmem>>, vector<1x1x256xf32>
    %352 = vector.shape_cast %351 : vector<1x1x256xf32> to vector<1x256xf32>
    %353 = vector.broadcast %352 : vector<1x256xf32> to vector<16x256xf32>
    %354 = arith.addf %350, %353 : vector<16x256xf32>
    %cst_124 = arith.constant 0.000000e+00 : f32
    %355 = vector.broadcast %cst_124 : f32 to vector<16x256xf32>
    %356 = arith.maximumf %354, %355 : vector<16x256xf32>
    %357 = arith.truncf %356 : vector<16x256xf32> to vector<16x256xbf16>
    %c1_125 = arith.constant 1 : index
    %c0_126 = arith.constant 0 : index
    %c0_127 = arith.constant 0 : index
    %358 = vector.load %arg11[%c1_125, %c0_126, %c0_127] : memref<4x256x64xbf16, #tpu.memory_space<vmem>>, vector<1x256x64xbf16>
    %359 = vector.shape_cast %358 : vector<1x256x64xbf16> to vector<256x64xbf16>
    %cst_128 = arith.constant dense<0.000000e+00> : vector<16x64xf32>
    %360 = tpu.matmul %357, %359, %cst_128 {dimension_numbers = #tpu.dot_dimension_numbers<[1], [0], [0], [1], [0, 0, 1, 1], [], []>} : vector<16x256xbf16>, vector<256x64xbf16>, vector<16x64xf32> -> vector<16x64xf32>
    %c1_129 = arith.constant 1 : index
    %c0_130 = arith.constant 0 : index
    %c0_131 = arith.constant 0 : index
    %361 = vector.load %arg12[%c1_129, %c0_130, %c0_131] : memref<4x1x64xf32, #tpu.memory_space<vmem>>, vector<1x1x64xf32>
    %362 = vector.shape_cast %361 : vector<1x1x64xf32> to vector<1x64xf32>
    %363 = vector.broadcast %362 : vector<1x64xf32> to vector<16x64xf32>
    %364 = arith.addf %360, %363 : vector<16x64xf32>
    %365 = arith.addf %320, %364 : vector<16x64xf32>
    %c2 = arith.constant 2 : index
    %c0_132 = arith.constant 0 : index
    %c0_133 = arith.constant 0 : index
    %366 = vector.load %arg2[%c2, %c0_132, %c0_133] : memref<4x1x64xf32, #tpu.memory_space<vmem>>, vector<1x1x64xf32>
    %367 = vector.shape_cast %366 : vector<1x1x64xf32> to vector<1x64xf32>
    %c2_134 = arith.constant 2 : index
    %c0_135 = arith.constant 0 : index
    %c0_136 = arith.constant 0 : index
    %368 = vector.load %arg3[%c2_134, %c0_135, %c0_136] : memref<4x1x64xf32, #tpu.memory_space<vmem>>, vector<1x1x64xf32>
    %369 = vector.shape_cast %368 : vector<1x1x64xf32> to vector<1x64xf32>
    %cst_137 = arith.constant dense<0.000000e+00> : vector<16xf32>
    %370 = vector.multi_reduction <add>, %365, %cst_137 [1] : vector<16x64xf32> to vector<16xf32>
    %371 = vector.shape_cast %370 : vector<16xf32> to vector<16x1xf32>
    %cst_138 = arith.constant 6.400000e+01 : f32
    %372 = vector.broadcast %cst_138 : f32 to vector<16x1xf32>
    %373 = arith.divf %371, %372 : vector<16x1xf32>
    %374 = vector.broadcast %373 : vector<16x1xf32> to vector<16x64xf32>
    %375 = arith.subf %365, %374 : vector<16x64xf32>
    %376 = arith.mulf %375, %375 : vector<16x64xf32>
    %cst_139 = arith.constant dense<0.000000e+00> : vector<16xf32>
    %377 = vector.multi_reduction <add>, %376, %cst_139 [1] : vector<16x64xf32> to vector<16xf32>
    %378 = vector.shape_cast %377 : vector<16xf32> to vector<16x1xf32>
    %cst_140 = arith.constant 6.400000e+01 : f32
    %379 = vector.broadcast %cst_140 : f32 to vector<16x1xf32>
    %380 = arith.divf %378, %379 : vector<16x1xf32>
    %381 = vector.broadcast %373 : vector<16x1xf32> to vector<16x64xf32>
    %382 = arith.subf %365, %381 : vector<16x64xf32>
    %cst_141 = arith.constant 9.99999974E-6 : f32
    %383 = vector.broadcast %cst_141 : f32 to vector<16x1xf32>
    %384 = arith.addf %380, %383 : vector<16x1xf32>
    %385 = math.rsqrt %384 : vector<16x1xf32>
    %386 = vector.broadcast %385 : vector<16x1xf32> to vector<16x64xf32>
    %387 = arith.mulf %382, %386 : vector<16x64xf32>
    %388 = vector.broadcast %367 : vector<1x64xf32> to vector<16x64xf32>
    %389 = arith.mulf %388, %387 : vector<16x64xf32>
    %390 = vector.broadcast %369 : vector<1x64xf32> to vector<16x64xf32>
    %391 = arith.addf %389, %390 : vector<16x64xf32>
    %392 = arith.truncf %391 : vector<16x64xf32> to vector<16x64xbf16>
    %c2_142 = arith.constant 2 : index
    %c0_143 = arith.constant 0 : index
    %c0_144 = arith.constant 0 : index
    %393 = vector.load %arg4[%c2_142, %c0_143, %c0_144] : memref<4x64x128xbf16, #tpu.memory_space<vmem>>, vector<1x64x128xbf16>
    %394 = vector.shape_cast %393 : vector<1x64x128xbf16> to vector<64x128xbf16>
    %cst_145 = arith.constant dense<0.000000e+00> : vector<16x128xf32>
    %395 = tpu.matmul %392, %394, %cst_145 {dimension_numbers = #tpu.dot_dimension_numbers<[1], [0], [0], [1], [0, 0, 1, 1], [], []>} : vector<16x64xbf16>, vector<64x128xbf16>, vector<16x128xf32> -> vector<16x128xf32>
    %c2_146 = arith.constant 2 : index
    %c0_147 = arith.constant 0 : index
    %c0_148 = arith.constant 0 : index
    %396 = vector.load %arg5[%c2_146, %c0_147, %c0_148] : memref<4x64x256xbf16, #tpu.memory_space<vmem>>, vector<1x64x256xbf16>
    %397 = vector.shape_cast %396 : vector<1x64x256xbf16> to vector<64x256xbf16>
    %cst_149 = arith.constant dense<0.000000e+00> : vector<16x256xf32>
    %398 = tpu.matmul %392, %397, %cst_149 {dimension_numbers = #tpu.dot_dimension_numbers<[1], [0], [0], [1], [0, 0, 1, 1], [], []>} : vector<16x64xbf16>, vector<64x256xbf16>, vector<16x256xf32> -> vector<16x256xf32>
    %399 = vector.shape_cast %395 : vector<16x128xf32> to vector<2x8x128xf32>
    %400 = vector.shape_cast %398 : vector<16x256xf32> to vector<2x8x256xf32>
    %cst_150 = arith.constant 0.000000e+00 : f32
    %401 = vector.broadcast %cst_150 : f32 to vector<2x8x64xf32>
    %402 = vector.extract_strided_slice %399 {offsets = [0, 0, 0], sizes = [2, 8, 16], strides = [1, 1, 1]} : vector<2x8x128xf32> to vector<2x8x16xf32>
    %403 = arith.truncf %402 : vector<2x8x16xf32> to vector<2x8x16xbf16>
    %404 = vector.extract_strided_slice %399 {offsets = [0, 0, 64], sizes = [2, 8, 16], strides = [1, 1, 1]} : vector<2x8x128xf32> to vector<2x8x16xf32>
    %405 = arith.truncf %404 : vector<2x8x16xf32> to vector<2x8x16xbf16>
    %406 = vector.extract_strided_slice %400 {offsets = [0, 0, 0], sizes = [2, 8, 64], strides = [1, 1, 1]} : vector<2x8x256xf32> to vector<2x8x64xf32>
    %407 = arith.truncf %406 : vector<2x8x64xf32> to vector<2x8x64xbf16>
    "tpu.trace_start"() <{level = 10 : i32, message = "bqd,bkd->bqk"}> : () -> ()
    %cst_151 = arith.constant dense<0.000000e+00> : vector<2x8x8xf32>
    %408 = tpu.matmul %403, %405, %cst_151 {dimension_numbers = #tpu.dot_dimension_numbers<[2], [2], [1], [1], [0, 0, 0, 1, 1, 1], [0], [0]>} : vector<2x8x16xbf16>, vector<2x8x16xbf16>, vector<2x8x8xf32> -> vector<2x8x8xf32>
    "tpu.trace_stop"() : () -> ()
    %409 = vector.shape_cast %7 : vector<8x8xf32> to vector<1x8x8xf32>
    %410 = vector.broadcast %409 : vector<1x8x8xf32> to vector<2x8x8xf32>
    %411 = arith.addf %408, %410 : vector<2x8x8xf32>
    %cst_152 = arith.constant dense<0xFF800000> : vector<2x8xf32>
    %412 = vector.multi_reduction <maximumf>, %411, %cst_152 [2] : vector<2x8x8xf32> to vector<2x8xf32>
    %413 = vector.shape_cast %412 : vector<2x8xf32> to vector<2x8x1xf32>
    %414 = vector.broadcast %413 : vector<2x8x1xf32> to vector<2x8x8xf32>
    %415 = arith.subf %411, %414 : vector<2x8x8xf32>
    %416 = math.exp %415 : vector<2x8x8xf32>
    %cst_153 = arith.constant dense<0.000000e+00> : vector<2x8xf32>
    %417 = vector.multi_reduction <add>, %416, %cst_153 [2] : vector<2x8x8xf32> to vector<2x8xf32>
    %418 = vector.shape_cast %417 : vector<2x8xf32> to vector<2x8x1xf32>
    %419 = tpu.reciprocal %418 {approx = true} : vector<2x8x1xf32> -> vector<2x8x1xf32>
    %420 = vector.broadcast %419 : vector<2x8x1xf32> to vector<2x8x8xf32>
    %421 = arith.mulf %416, %420 : vector<2x8x8xf32>
    %422 = arith.truncf %421 : vector<2x8x8xf32> to vector<2x8x8xbf16>
    "tpu.trace_start"() <{level = 10 : i32, message = "bqk,bkd->bqd"}> : () -> ()
    %cst_154 = arith.constant dense<0.000000e+00> : vector<2x8x64xf32>
    %423 = tpu.matmul %422, %407, %cst_154 {dimension_numbers = #tpu.dot_dimension_numbers<[2], [1], [1], [2], [0, 0, 0, 1, 1, 2], [0], [0]>} : vector<2x8x8xbf16>, vector<2x8x64xbf16>, vector<2x8x64xf32> -> vector<2x8x64xf32>
    "tpu.trace_stop"() : () -> ()
    %424 = arith.addf %401, %423 : vector<2x8x64xf32>
    %425 = vector.extract_strided_slice %399 {offsets = [0, 0, 16], sizes = [2, 8, 16], strides = [1, 1, 1]} : vector<2x8x128xf32> to vector<2x8x16xf32>
    %426 = arith.truncf %425 : vector<2x8x16xf32> to vector<2x8x16xbf16>
    %427 = vector.extract_strided_slice %399 {offsets = [0, 0, 80], sizes = [2, 8, 16], strides = [1, 1, 1]} : vector<2x8x128xf32> to vector<2x8x16xf32>
    %428 = arith.truncf %427 : vector<2x8x16xf32> to vector<2x8x16xbf16>
    %429 = vector.extract_strided_slice %400 {offsets = [0, 0, 64], sizes = [2, 8, 64], strides = [1, 1, 1]} : vector<2x8x256xf32> to vector<2x8x64xf32>
    %430 = arith.truncf %429 : vector<2x8x64xf32> to vector<2x8x64xbf16>
    "tpu.trace_start"() <{level = 10 : i32, message = "bqd,bkd->bqk"}> : () -> ()
    %cst_155 = arith.constant dense<0.000000e+00> : vector<2x8x8xf32>
    %431 = tpu.matmul %426, %428, %cst_155 {dimension_numbers = #tpu.dot_dimension_numbers<[2], [2], [1], [1], [0, 0, 0, 1, 1, 1], [0], [0]>} : vector<2x8x16xbf16>, vector<2x8x16xbf16>, vector<2x8x8xf32> -> vector<2x8x8xf32>
    "tpu.trace_stop"() : () -> ()
    %432 = vector.shape_cast %7 : vector<8x8xf32> to vector<1x8x8xf32>
    %433 = vector.broadcast %432 : vector<1x8x8xf32> to vector<2x8x8xf32>
    %434 = arith.addf %431, %433 : vector<2x8x8xf32>
    %cst_156 = arith.constant dense<0xFF800000> : vector<2x8xf32>
    %435 = vector.multi_reduction <maximumf>, %434, %cst_156 [2] : vector<2x8x8xf32> to vector<2x8xf32>
    %436 = vector.shape_cast %435 : vector<2x8xf32> to vector<2x8x1xf32>
    %437 = vector.broadcast %436 : vector<2x8x1xf32> to vector<2x8x8xf32>
    %438 = arith.subf %434, %437 : vector<2x8x8xf32>
    %439 = math.exp %438 : vector<2x8x8xf32>
    %cst_157 = arith.constant dense<0.000000e+00> : vector<2x8xf32>
    %440 = vector.multi_reduction <add>, %439, %cst_157 [2] : vector<2x8x8xf32> to vector<2x8xf32>
    %441 = vector.shape_cast %440 : vector<2x8xf32> to vector<2x8x1xf32>
    %442 = tpu.reciprocal %441 {approx = true} : vector<2x8x1xf32> -> vector<2x8x1xf32>
    %443 = vector.broadcast %442 : vector<2x8x1xf32> to vector<2x8x8xf32>
    %444 = arith.mulf %439, %443 : vector<2x8x8xf32>
    %445 = arith.truncf %444 : vector<2x8x8xf32> to vector<2x8x8xbf16>
    "tpu.trace_start"() <{level = 10 : i32, message = "bqk,bkd->bqd"}> : () -> ()
    %cst_158 = arith.constant dense<0.000000e+00> : vector<2x8x64xf32>
    %446 = tpu.matmul %445, %430, %cst_158 {dimension_numbers = #tpu.dot_dimension_numbers<[2], [1], [1], [2], [0, 0, 0, 1, 1, 2], [0], [0]>} : vector<2x8x8xbf16>, vector<2x8x64xbf16>, vector<2x8x64xf32> -> vector<2x8x64xf32>
    "tpu.trace_stop"() : () -> ()
    %447 = arith.addf %424, %446 : vector<2x8x64xf32>
    %448 = vector.extract_strided_slice %399 {offsets = [0, 0, 32], sizes = [2, 8, 16], strides = [1, 1, 1]} : vector<2x8x128xf32> to vector<2x8x16xf32>
    %449 = arith.truncf %448 : vector<2x8x16xf32> to vector<2x8x16xbf16>
    %450 = vector.extract_strided_slice %399 {offsets = [0, 0, 96], sizes = [2, 8, 16], strides = [1, 1, 1]} : vector<2x8x128xf32> to vector<2x8x16xf32>
    %451 = arith.truncf %450 : vector<2x8x16xf32> to vector<2x8x16xbf16>
    %452 = vector.extract_strided_slice %400 {offsets = [0, 0, 128], sizes = [2, 8, 64], strides = [1, 1, 1]} : vector<2x8x256xf32> to vector<2x8x64xf32>
    %453 = arith.truncf %452 : vector<2x8x64xf32> to vector<2x8x64xbf16>
    "tpu.trace_start"() <{level = 10 : i32, message = "bqd,bkd->bqk"}> : () -> ()
    %cst_159 = arith.constant dense<0.000000e+00> : vector<2x8x8xf32>
    %454 = tpu.matmul %449, %451, %cst_159 {dimension_numbers = #tpu.dot_dimension_numbers<[2], [2], [1], [1], [0, 0, 0, 1, 1, 1], [0], [0]>} : vector<2x8x16xbf16>, vector<2x8x16xbf16>, vector<2x8x8xf32> -> vector<2x8x8xf32>
    "tpu.trace_stop"() : () -> ()
    %455 = vector.shape_cast %7 : vector<8x8xf32> to vector<1x8x8xf32>
    %456 = vector.broadcast %455 : vector<1x8x8xf32> to vector<2x8x8xf32>
    %457 = arith.addf %454, %456 : vector<2x8x8xf32>
    %cst_160 = arith.constant dense<0xFF800000> : vector<2x8xf32>
    %458 = vector.multi_reduction <maximumf>, %457, %cst_160 [2] : vector<2x8x8xf32> to vector<2x8xf32>
    %459 = vector.shape_cast %458 : vector<2x8xf32> to vector<2x8x1xf32>
    %460 = vector.broadcast %459 : vector<2x8x1xf32> to vector<2x8x8xf32>
    %461 = arith.subf %457, %460 : vector<2x8x8xf32>
    %462 = math.exp %461 : vector<2x8x8xf32>
    %cst_161 = arith.constant dense<0.000000e+00> : vector<2x8xf32>
    %463 = vector.multi_reduction <add>, %462, %cst_161 [2] : vector<2x8x8xf32> to vector<2x8xf32>
    %464 = vector.shape_cast %463 : vector<2x8xf32> to vector<2x8x1xf32>
    %465 = tpu.reciprocal %464 {approx = true} : vector<2x8x1xf32> -> vector<2x8x1xf32>
    %466 = vector.broadcast %465 : vector<2x8x1xf32> to vector<2x8x8xf32>
    %467 = arith.mulf %462, %466 : vector<2x8x8xf32>
    %468 = arith.truncf %467 : vector<2x8x8xf32> to vector<2x8x8xbf16>
    "tpu.trace_start"() <{level = 10 : i32, message = "bqk,bkd->bqd"}> : () -> ()
    %cst_162 = arith.constant dense<0.000000e+00> : vector<2x8x64xf32>
    %469 = tpu.matmul %468, %453, %cst_162 {dimension_numbers = #tpu.dot_dimension_numbers<[2], [1], [1], [2], [0, 0, 0, 1, 1, 2], [0], [0]>} : vector<2x8x8xbf16>, vector<2x8x64xbf16>, vector<2x8x64xf32> -> vector<2x8x64xf32>
    "tpu.trace_stop"() : () -> ()
    %470 = arith.addf %447, %469 : vector<2x8x64xf32>
    %471 = vector.extract_strided_slice %399 {offsets = [0, 0, 48], sizes = [2, 8, 16], strides = [1, 1, 1]} : vector<2x8x128xf32> to vector<2x8x16xf32>
    %472 = arith.truncf %471 : vector<2x8x16xf32> to vector<2x8x16xbf16>
    %473 = vector.extract_strided_slice %399 {offsets = [0, 0, 112], sizes = [2, 8, 16], strides = [1, 1, 1]} : vector<2x8x128xf32> to vector<2x8x16xf32>
    %474 = arith.truncf %473 : vector<2x8x16xf32> to vector<2x8x16xbf16>
    %475 = vector.extract_strided_slice %400 {offsets = [0, 0, 192], sizes = [2, 8, 64], strides = [1, 1, 1]} : vector<2x8x256xf32> to vector<2x8x64xf32>
    %476 = arith.truncf %475 : vector<2x8x64xf32> to vector<2x8x64xbf16>
    "tpu.trace_start"() <{level = 10 : i32, message = "bqd,bkd->bqk"}> : () -> ()
    %cst_163 = arith.constant dense<0.000000e+00> : vector<2x8x8xf32>
    %477 = tpu.matmul %472, %474, %cst_163 {dimension_numbers = #tpu.dot_dimension_numbers<[2], [2], [1], [1], [0, 0, 0, 1, 1, 1], [0], [0]>} : vector<2x8x16xbf16>, vector<2x8x16xbf16>, vector<2x8x8xf32> -> vector<2x8x8xf32>
    "tpu.trace_stop"() : () -> ()
    %478 = vector.shape_cast %7 : vector<8x8xf32> to vector<1x8x8xf32>
    %479 = vector.broadcast %478 : vector<1x8x8xf32> to vector<2x8x8xf32>
    %480 = arith.addf %477, %479 : vector<2x8x8xf32>
    %cst_164 = arith.constant dense<0xFF800000> : vector<2x8xf32>
    %481 = vector.multi_reduction <maximumf>, %480, %cst_164 [2] : vector<2x8x8xf32> to vector<2x8xf32>
    %482 = vector.shape_cast %481 : vector<2x8xf32> to vector<2x8x1xf32>
    %483 = vector.broadcast %482 : vector<2x8x1xf32> to vector<2x8x8xf32>
    %484 = arith.subf %480, %483 : vector<2x8x8xf32>
    %485 = math.exp %484 : vector<2x8x8xf32>
    %cst_165 = arith.constant dense<0.000000e+00> : vector<2x8xf32>
    %486 = vector.multi_reduction <add>, %485, %cst_165 [2] : vector<2x8x8xf32> to vector<2x8xf32>
    %487 = vector.shape_cast %486 : vector<2x8xf32> to vector<2x8x1xf32>
    %488 = tpu.reciprocal %487 {approx = true} : vector<2x8x1xf32> -> vector<2x8x1xf32>
    %489 = vector.broadcast %488 : vector<2x8x1xf32> to vector<2x8x8xf32>
    %490 = arith.mulf %485, %489 : vector<2x8x8xf32>
    %491 = arith.truncf %490 : vector<2x8x8xf32> to vector<2x8x8xbf16>
    "tpu.trace_start"() <{level = 10 : i32, message = "bqk,bkd->bqd"}> : () -> ()
    %cst_166 = arith.constant dense<0.000000e+00> : vector<2x8x64xf32>
    %492 = tpu.matmul %491, %476, %cst_166 {dimension_numbers = #tpu.dot_dimension_numbers<[2], [1], [1], [2], [0, 0, 0, 1, 1, 2], [0], [0]>} : vector<2x8x8xbf16>, vector<2x8x64xbf16>, vector<2x8x64xf32> -> vector<2x8x64xf32>
    "tpu.trace_stop"() : () -> ()
    %493 = arith.addf %470, %492 : vector<2x8x64xf32>
    %494 = vector.shape_cast %493 : vector<2x8x64xf32> to vector<16x64xf32>
    %495 = arith.addf %365, %494 : vector<16x64xf32>
    %c2_167 = arith.constant 2 : index
    %c0_168 = arith.constant 0 : index
    %c0_169 = arith.constant 0 : index
    %496 = vector.load %arg6[%c2_167, %c0_168, %c0_169] : memref<4x1x64xf32, #tpu.memory_space<vmem>>, vector<1x1x64xf32>
    %497 = vector.shape_cast %496 : vector<1x1x64xf32> to vector<1x64xf32>
    %498 = vector.broadcast %497 : vector<1x64xf32> to vector<16x64xf32>
    %499 = arith.addf %495, %498 : vector<16x64xf32>
    %c2_170 = arith.constant 2 : index
    %c0_171 = arith.constant 0 : index
    %c0_172 = arith.constant 0 : index
    %500 = vector.load %arg7[%c2_170, %c0_171, %c0_172] : memref<4x1x64xf32, #tpu.memory_space<vmem>>, vector<1x1x64xf32>
    %501 = vector.shape_cast %500 : vector<1x1x64xf32> to vector<1x64xf32>
    %c2_173 = arith.constant 2 : index
    %c0_174 = arith.constant 0 : index
    %c0_175 = arith.constant 0 : index
    %502 = vector.load %arg8[%c2_173, %c0_174, %c0_175] : memref<4x1x64xf32, #tpu.memory_space<vmem>>, vector<1x1x64xf32>
    %503 = vector.shape_cast %502 : vector<1x1x64xf32> to vector<1x64xf32>
    %cst_176 = arith.constant dense<0.000000e+00> : vector<16xf32>
    %504 = vector.multi_reduction <add>, %499, %cst_176 [1] : vector<16x64xf32> to vector<16xf32>
    %505 = vector.shape_cast %504 : vector<16xf32> to vector<16x1xf32>
    %cst_177 = arith.constant 6.400000e+01 : f32
    %506 = vector.broadcast %cst_177 : f32 to vector<16x1xf32>
    %507 = arith.divf %505, %506 : vector<16x1xf32>
    %508 = vector.broadcast %507 : vector<16x1xf32> to vector<16x64xf32>
    %509 = arith.subf %499, %508 : vector<16x64xf32>
    %510 = arith.mulf %509, %509 : vector<16x64xf32>
    %cst_178 = arith.constant dense<0.000000e+00> : vector<16xf32>
    %511 = vector.multi_reduction <add>, %510, %cst_178 [1] : vector<16x64xf32> to vector<16xf32>
    %512 = vector.shape_cast %511 : vector<16xf32> to vector<16x1xf32>
    %cst_179 = arith.constant 6.400000e+01 : f32
    %513 = vector.broadcast %cst_179 : f32 to vector<16x1xf32>
    %514 = arith.divf %512, %513 : vector<16x1xf32>
    %515 = vector.broadcast %507 : vector<16x1xf32> to vector<16x64xf32>
    %516 = arith.subf %499, %515 : vector<16x64xf32>
    %cst_180 = arith.constant 9.99999974E-6 : f32
    %517 = vector.broadcast %cst_180 : f32 to vector<16x1xf32>
    %518 = arith.addf %514, %517 : vector<16x1xf32>
    %519 = math.rsqrt %518 : vector<16x1xf32>
    %520 = vector.broadcast %519 : vector<16x1xf32> to vector<16x64xf32>
    %521 = arith.mulf %516, %520 : vector<16x64xf32>
    %522 = vector.broadcast %501 : vector<1x64xf32> to vector<16x64xf32>
    %523 = arith.mulf %522, %521 : vector<16x64xf32>
    %524 = vector.broadcast %503 : vector<1x64xf32> to vector<16x64xf32>
    %525 = arith.addf %523, %524 : vector<16x64xf32>
    %526 = arith.truncf %525 : vector<16x64xf32> to vector<16x64xbf16>
    %c2_181 = arith.constant 2 : index
    %c0_182 = arith.constant 0 : index
    %c0_183 = arith.constant 0 : index
    %527 = vector.load %arg9[%c2_181, %c0_182, %c0_183] : memref<4x64x256xbf16, #tpu.memory_space<vmem>>, vector<1x64x256xbf16>
    %528 = vector.shape_cast %527 : vector<1x64x256xbf16> to vector<64x256xbf16>
    %cst_184 = arith.constant dense<0.000000e+00> : vector<16x256xf32>
    %529 = tpu.matmul %526, %528, %cst_184 {dimension_numbers = #tpu.dot_dimension_numbers<[1], [0], [0], [1], [0, 0, 1, 1], [], []>} : vector<16x64xbf16>, vector<64x256xbf16>, vector<16x256xf32> -> vector<16x256xf32>
    %c2_185 = arith.constant 2 : index
    %c0_186 = arith.constant 0 : index
    %c0_187 = arith.constant 0 : index
    %530 = vector.load %arg10[%c2_185, %c0_186, %c0_187] : memref<4x1x256xf32, #tpu.memory_space<vmem>>, vector<1x1x256xf32>
    %531 = vector.shape_cast %530 : vector<1x1x256xf32> to vector<1x256xf32>
    %532 = vector.broadcast %531 : vector<1x256xf32> to vector<16x256xf32>
    %533 = arith.addf %529, %532 : vector<16x256xf32>
    %cst_188 = arith.constant 0.000000e+00 : f32
    %534 = vector.broadcast %cst_188 : f32 to vector<16x256xf32>
    %535 = arith.maximumf %533, %534 : vector<16x256xf32>
    %536 = arith.truncf %535 : vector<16x256xf32> to vector<16x256xbf16>
    %c2_189 = arith.constant 2 : index
    %c0_190 = arith.constant 0 : index
    %c0_191 = arith.constant 0 : index
    %537 = vector.load %arg11[%c2_189, %c0_190, %c0_191] : memref<4x256x64xbf16, #tpu.memory_space<vmem>>, vector<1x256x64xbf16>
    %538 = vector.shape_cast %537 : vector<1x256x64xbf16> to vector<256x64xbf16>
    %cst_192 = arith.constant dense<0.000000e+00> : vector<16x64xf32>
    %539 = tpu.matmul %536, %538, %cst_192 {dimension_numbers = #tpu.dot_dimension_numbers<[1], [0], [0], [1], [0, 0, 1, 1], [], []>} : vector<16x256xbf16>, vector<256x64xbf16>, vector<16x64xf32> -> vector<16x64xf32>
    %c2_193 = arith.constant 2 : index
    %c0_194 = arith.constant 0 : index
    %c0_195 = arith.constant 0 : index
    %540 = vector.load %arg12[%c2_193, %c0_194, %c0_195] : memref<4x1x64xf32, #tpu.memory_space<vmem>>, vector<1x1x64xf32>
    %541 = vector.shape_cast %540 : vector<1x1x64xf32> to vector<1x64xf32>
    %542 = vector.broadcast %541 : vector<1x64xf32> to vector<16x64xf32>
    %543 = arith.addf %539, %542 : vector<16x64xf32>
    %544 = arith.addf %499, %543 : vector<16x64xf32>
    %c3 = arith.constant 3 : index
    %c0_196 = arith.constant 0 : index
    %c0_197 = arith.constant 0 : index
    %545 = vector.load %arg2[%c3, %c0_196, %c0_197] : memref<4x1x64xf32, #tpu.memory_space<vmem>>, vector<1x1x64xf32>
    %546 = vector.shape_cast %545 : vector<1x1x64xf32> to vector<1x64xf32>
    %c3_198 = arith.constant 3 : index
    %c0_199 = arith.constant 0 : index
    %c0_200 = arith.constant 0 : index
    %547 = vector.load %arg3[%c3_198, %c0_199, %c0_200] : memref<4x1x64xf32, #tpu.memory_space<vmem>>, vector<1x1x64xf32>
    %548 = vector.shape_cast %547 : vector<1x1x64xf32> to vector<1x64xf32>
    %cst_201 = arith.constant dense<0.000000e+00> : vector<16xf32>
    %549 = vector.multi_reduction <add>, %544, %cst_201 [1] : vector<16x64xf32> to vector<16xf32>
    %550 = vector.shape_cast %549 : vector<16xf32> to vector<16x1xf32>
    %cst_202 = arith.constant 6.400000e+01 : f32
    %551 = vector.broadcast %cst_202 : f32 to vector<16x1xf32>
    %552 = arith.divf %550, %551 : vector<16x1xf32>
    %553 = vector.broadcast %552 : vector<16x1xf32> to vector<16x64xf32>
    %554 = arith.subf %544, %553 : vector<16x64xf32>
    %555 = arith.mulf %554, %554 : vector<16x64xf32>
    %cst_203 = arith.constant dense<0.000000e+00> : vector<16xf32>
    %556 = vector.multi_reduction <add>, %555, %cst_203 [1] : vector<16x64xf32> to vector<16xf32>
    %557 = vector.shape_cast %556 : vector<16xf32> to vector<16x1xf32>
    %cst_204 = arith.constant 6.400000e+01 : f32
    %558 = vector.broadcast %cst_204 : f32 to vector<16x1xf32>
    %559 = arith.divf %557, %558 : vector<16x1xf32>
    %560 = vector.broadcast %552 : vector<16x1xf32> to vector<16x64xf32>
    %561 = arith.subf %544, %560 : vector<16x64xf32>
    %cst_205 = arith.constant 9.99999974E-6 : f32
    %562 = vector.broadcast %cst_205 : f32 to vector<16x1xf32>
    %563 = arith.addf %559, %562 : vector<16x1xf32>
    %564 = math.rsqrt %563 : vector<16x1xf32>
    %565 = vector.broadcast %564 : vector<16x1xf32> to vector<16x64xf32>
    %566 = arith.mulf %561, %565 : vector<16x64xf32>
    %567 = vector.broadcast %546 : vector<1x64xf32> to vector<16x64xf32>
    %568 = arith.mulf %567, %566 : vector<16x64xf32>
    %569 = vector.broadcast %548 : vector<1x64xf32> to vector<16x64xf32>
    %570 = arith.addf %568, %569 : vector<16x64xf32>
    %571 = arith.truncf %570 : vector<16x64xf32> to vector<16x64xbf16>
    %c3_206 = arith.constant 3 : index
    %c0_207 = arith.constant 0 : index
    %c0_208 = arith.constant 0 : index
    %572 = vector.load %arg4[%c3_206, %c0_207, %c0_208] : memref<4x64x128xbf16, #tpu.memory_space<vmem>>, vector<1x64x128xbf16>
    %573 = vector.shape_cast %572 : vector<1x64x128xbf16> to vector<64x128xbf16>
    %cst_209 = arith.constant dense<0.000000e+00> : vector<16x128xf32>
    %574 = tpu.matmul %571, %573, %cst_209 {dimension_numbers = #tpu.dot_dimension_numbers<[1], [0], [0], [1], [0, 0, 1, 1], [], []>} : vector<16x64xbf16>, vector<64x128xbf16>, vector<16x128xf32> -> vector<16x128xf32>
    %c3_210 = arith.constant 3 : index
    %c0_211 = arith.constant 0 : index
    %c0_212 = arith.constant 0 : index
    %575 = vector.load %arg5[%c3_210, %c0_211, %c0_212] : memref<4x64x256xbf16, #tpu.memory_space<vmem>>, vector<1x64x256xbf16>
    %576 = vector.shape_cast %575 : vector<1x64x256xbf16> to vector<64x256xbf16>
    %cst_213 = arith.constant dense<0.000000e+00> : vector<16x256xf32>
    %577 = tpu.matmul %571, %576, %cst_213 {dimension_numbers = #tpu.dot_dimension_numbers<[1], [0], [0], [1], [0, 0, 1, 1], [], []>} : vector<16x64xbf16>, vector<64x256xbf16>, vector<16x256xf32> -> vector<16x256xf32>
    %578 = vector.shape_cast %574 : vector<16x128xf32> to vector<2x8x128xf32>
    %579 = vector.shape_cast %577 : vector<16x256xf32> to vector<2x8x256xf32>
    %cst_214 = arith.constant 0.000000e+00 : f32
    %580 = vector.broadcast %cst_214 : f32 to vector<2x8x64xf32>
    %581 = vector.extract_strided_slice %578 {offsets = [0, 0, 0], sizes = [2, 8, 16], strides = [1, 1, 1]} : vector<2x8x128xf32> to vector<2x8x16xf32>
    %582 = arith.truncf %581 : vector<2x8x16xf32> to vector<2x8x16xbf16>
    %583 = vector.extract_strided_slice %578 {offsets = [0, 0, 64], sizes = [2, 8, 16], strides = [1, 1, 1]} : vector<2x8x128xf32> to vector<2x8x16xf32>
    %584 = arith.truncf %583 : vector<2x8x16xf32> to vector<2x8x16xbf16>
    %585 = vector.extract_strided_slice %579 {offsets = [0, 0, 0], sizes = [2, 8, 64], strides = [1, 1, 1]} : vector<2x8x256xf32> to vector<2x8x64xf32>
    %586 = arith.truncf %585 : vector<2x8x64xf32> to vector<2x8x64xbf16>
    "tpu.trace_start"() <{level = 10 : i32, message = "bqd,bkd->bqk"}> : () -> ()
    %cst_215 = arith.constant dense<0.000000e+00> : vector<2x8x8xf32>
    %587 = tpu.matmul %582, %584, %cst_215 {dimension_numbers = #tpu.dot_dimension_numbers<[2], [2], [1], [1], [0, 0, 0, 1, 1, 1], [0], [0]>} : vector<2x8x16xbf16>, vector<2x8x16xbf16>, vector<2x8x8xf32> -> vector<2x8x8xf32>
    "tpu.trace_stop"() : () -> ()
    %588 = vector.shape_cast %7 : vector<8x8xf32> to vector<1x8x8xf32>
    %589 = vector.broadcast %588 : vector<1x8x8xf32> to vector<2x8x8xf32>
    %590 = arith.addf %587, %589 : vector<2x8x8xf32>
    %cst_216 = arith.constant dense<0xFF800000> : vector<2x8xf32>
    %591 = vector.multi_reduction <maximumf>, %590, %cst_216 [2] : vector<2x8x8xf32> to vector<2x8xf32>
    %592 = vector.shape_cast %591 : vector<2x8xf32> to vector<2x8x1xf32>
    %593 = vector.broadcast %592 : vector<2x8x1xf32> to vector<2x8x8xf32>
    %594 = arith.subf %590, %593 : vector<2x8x8xf32>
    %595 = math.exp %594 : vector<2x8x8xf32>
    %cst_217 = arith.constant dense<0.000000e+00> : vector<2x8xf32>
    %596 = vector.multi_reduction <add>, %595, %cst_217 [2] : vector<2x8x8xf32> to vector<2x8xf32>
    %597 = vector.shape_cast %596 : vector<2x8xf32> to vector<2x8x1xf32>
    %598 = tpu.reciprocal %597 {approx = true} : vector<2x8x1xf32> -> vector<2x8x1xf32>
    %599 = vector.broadcast %598 : vector<2x8x1xf32> to vector<2x8x8xf32>
    %600 = arith.mulf %595, %599 : vector<2x8x8xf32>
    %601 = arith.truncf %600 : vector<2x8x8xf32> to vector<2x8x8xbf16>
    "tpu.trace_start"() <{level = 10 : i32, message = "bqk,bkd->bqd"}> : () -> ()
    %cst_218 = arith.constant dense<0.000000e+00> : vector<2x8x64xf32>
    %602 = tpu.matmul %601, %586, %cst_218 {dimension_numbers = #tpu.dot_dimension_numbers<[2], [1], [1], [2], [0, 0, 0, 1, 1, 2], [0], [0]>} : vector<2x8x8xbf16>, vector<2x8x64xbf16>, vector<2x8x64xf32> -> vector<2x8x64xf32>
    "tpu.trace_stop"() : () -> ()
    %603 = arith.addf %580, %602 : vector<2x8x64xf32>
    %604 = vector.extract_strided_slice %578 {offsets = [0, 0, 16], sizes = [2, 8, 16], strides = [1, 1, 1]} : vector<2x8x128xf32> to vector<2x8x16xf32>
    %605 = arith.truncf %604 : vector<2x8x16xf32> to vector<2x8x16xbf16>
    %606 = vector.extract_strided_slice %578 {offsets = [0, 0, 80], sizes = [2, 8, 16], strides = [1, 1, 1]} : vector<2x8x128xf32> to vector<2x8x16xf32>
    %607 = arith.truncf %606 : vector<2x8x16xf32> to vector<2x8x16xbf16>
    %608 = vector.extract_strided_slice %579 {offsets = [0, 0, 64], sizes = [2, 8, 64], strides = [1, 1, 1]} : vector<2x8x256xf32> to vector<2x8x64xf32>
    %609 = arith.truncf %608 : vector<2x8x64xf32> to vector<2x8x64xbf16>
    "tpu.trace_start"() <{level = 10 : i32, message = "bqd,bkd->bqk"}> : () -> ()
    %cst_219 = arith.constant dense<0.000000e+00> : vector<2x8x8xf32>
    %610 = tpu.matmul %605, %607, %cst_219 {dimension_numbers = #tpu.dot_dimension_numbers<[2], [2], [1], [1], [0, 0, 0, 1, 1, 1], [0], [0]>} : vector<2x8x16xbf16>, vector<2x8x16xbf16>, vector<2x8x8xf32> -> vector<2x8x8xf32>
    "tpu.trace_stop"() : () -> ()
    %611 = vector.shape_cast %7 : vector<8x8xf32> to vector<1x8x8xf32>
    %612 = vector.broadcast %611 : vector<1x8x8xf32> to vector<2x8x8xf32>
    %613 = arith.addf %610, %612 : vector<2x8x8xf32>
    %cst_220 = arith.constant dense<0xFF800000> : vector<2x8xf32>
    %614 = vector.multi_reduction <maximumf>, %613, %cst_220 [2] : vector<2x8x8xf32> to vector<2x8xf32>
    %615 = vector.shape_cast %614 : vector<2x8xf32> to vector<2x8x1xf32>
    %616 = vector.broadcast %615 : vector<2x8x1xf32> to vector<2x8x8xf32>
    %617 = arith.subf %613, %616 : vector<2x8x8xf32>
    %618 = math.exp %617 : vector<2x8x8xf32>
    %cst_221 = arith.constant dense<0.000000e+00> : vector<2x8xf32>
    %619 = vector.multi_reduction <add>, %618, %cst_221 [2] : vector<2x8x8xf32> to vector<2x8xf32>
    %620 = vector.shape_cast %619 : vector<2x8xf32> to vector<2x8x1xf32>
    %621 = tpu.reciprocal %620 {approx = true} : vector<2x8x1xf32> -> vector<2x8x1xf32>
    %622 = vector.broadcast %621 : vector<2x8x1xf32> to vector<2x8x8xf32>
    %623 = arith.mulf %618, %622 : vector<2x8x8xf32>
    %624 = arith.truncf %623 : vector<2x8x8xf32> to vector<2x8x8xbf16>
    "tpu.trace_start"() <{level = 10 : i32, message = "bqk,bkd->bqd"}> : () -> ()
    %cst_222 = arith.constant dense<0.000000e+00> : vector<2x8x64xf32>
    %625 = tpu.matmul %624, %609, %cst_222 {dimension_numbers = #tpu.dot_dimension_numbers<[2], [1], [1], [2], [0, 0, 0, 1, 1, 2], [0], [0]>} : vector<2x8x8xbf16>, vector<2x8x64xbf16>, vector<2x8x64xf32> -> vector<2x8x64xf32>
    "tpu.trace_stop"() : () -> ()
    %626 = arith.addf %603, %625 : vector<2x8x64xf32>
    %627 = vector.extract_strided_slice %578 {offsets = [0, 0, 32], sizes = [2, 8, 16], strides = [1, 1, 1]} : vector<2x8x128xf32> to vector<2x8x16xf32>
    %628 = arith.truncf %627 : vector<2x8x16xf32> to vector<2x8x16xbf16>
    %629 = vector.extract_strided_slice %578 {offsets = [0, 0, 96], sizes = [2, 8, 16], strides = [1, 1, 1]} : vector<2x8x128xf32> to vector<2x8x16xf32>
    %630 = arith.truncf %629 : vector<2x8x16xf32> to vector<2x8x16xbf16>
    %631 = vector.extract_strided_slice %579 {offsets = [0, 0, 128], sizes = [2, 8, 64], strides = [1, 1, 1]} : vector<2x8x256xf32> to vector<2x8x64xf32>
    %632 = arith.truncf %631 : vector<2x8x64xf32> to vector<2x8x64xbf16>
    "tpu.trace_start"() <{level = 10 : i32, message = "bqd,bkd->bqk"}> : () -> ()
    %cst_223 = arith.constant dense<0.000000e+00> : vector<2x8x8xf32>
    %633 = tpu.matmul %628, %630, %cst_223 {dimension_numbers = #tpu.dot_dimension_numbers<[2], [2], [1], [1], [0, 0, 0, 1, 1, 1], [0], [0]>} : vector<2x8x16xbf16>, vector<2x8x16xbf16>, vector<2x8x8xf32> -> vector<2x8x8xf32>
    "tpu.trace_stop"() : () -> ()
    %634 = vector.shape_cast %7 : vector<8x8xf32> to vector<1x8x8xf32>
    %635 = vector.broadcast %634 : vector<1x8x8xf32> to vector<2x8x8xf32>
    %636 = arith.addf %633, %635 : vector<2x8x8xf32>
    %cst_224 = arith.constant dense<0xFF800000> : vector<2x8xf32>
    %637 = vector.multi_reduction <maximumf>, %636, %cst_224 [2] : vector<2x8x8xf32> to vector<2x8xf32>
    %638 = vector.shape_cast %637 : vector<2x8xf32> to vector<2x8x1xf32>
    %639 = vector.broadcast %638 : vector<2x8x1xf32> to vector<2x8x8xf32>
    %640 = arith.subf %636, %639 : vector<2x8x8xf32>
    %641 = math.exp %640 : vector<2x8x8xf32>
    %cst_225 = arith.constant dense<0.000000e+00> : vector<2x8xf32>
    %642 = vector.multi_reduction <add>, %641, %cst_225 [2] : vector<2x8x8xf32> to vector<2x8xf32>
    %643 = vector.shape_cast %642 : vector<2x8xf32> to vector<2x8x1xf32>
    %644 = tpu.reciprocal %643 {approx = true} : vector<2x8x1xf32> -> vector<2x8x1xf32>
    %645 = vector.broadcast %644 : vector<2x8x1xf32> to vector<2x8x8xf32>
    %646 = arith.mulf %641, %645 : vector<2x8x8xf32>
    %647 = arith.truncf %646 : vector<2x8x8xf32> to vector<2x8x8xbf16>
    "tpu.trace_start"() <{level = 10 : i32, message = "bqk,bkd->bqd"}> : () -> ()
    %cst_226 = arith.constant dense<0.000000e+00> : vector<2x8x64xf32>
    %648 = tpu.matmul %647, %632, %cst_226 {dimension_numbers = #tpu.dot_dimension_numbers<[2], [1], [1], [2], [0, 0, 0, 1, 1, 2], [0], [0]>} : vector<2x8x8xbf16>, vector<2x8x64xbf16>, vector<2x8x64xf32> -> vector<2x8x64xf32>
    "tpu.trace_stop"() : () -> ()
    %649 = arith.addf %626, %648 : vector<2x8x64xf32>
    %650 = vector.extract_strided_slice %578 {offsets = [0, 0, 48], sizes = [2, 8, 16], strides = [1, 1, 1]} : vector<2x8x128xf32> to vector<2x8x16xf32>
    %651 = arith.truncf %650 : vector<2x8x16xf32> to vector<2x8x16xbf16>
    %652 = vector.extract_strided_slice %578 {offsets = [0, 0, 112], sizes = [2, 8, 16], strides = [1, 1, 1]} : vector<2x8x128xf32> to vector<2x8x16xf32>
    %653 = arith.truncf %652 : vector<2x8x16xf32> to vector<2x8x16xbf16>
    %654 = vector.extract_strided_slice %579 {offsets = [0, 0, 192], sizes = [2, 8, 64], strides = [1, 1, 1]} : vector<2x8x256xf32> to vector<2x8x64xf32>
    %655 = arith.truncf %654 : vector<2x8x64xf32> to vector<2x8x64xbf16>
    "tpu.trace_start"() <{level = 10 : i32, message = "bqd,bkd->bqk"}> : () -> ()
    %cst_227 = arith.constant dense<0.000000e+00> : vector<2x8x8xf32>
    %656 = tpu.matmul %651, %653, %cst_227 {dimension_numbers = #tpu.dot_dimension_numbers<[2], [2], [1], [1], [0, 0, 0, 1, 1, 1], [0], [0]>} : vector<2x8x16xbf16>, vector<2x8x16xbf16>, vector<2x8x8xf32> -> vector<2x8x8xf32>
    "tpu.trace_stop"() : () -> ()
    %657 = vector.shape_cast %7 : vector<8x8xf32> to vector<1x8x8xf32>
    %658 = vector.broadcast %657 : vector<1x8x8xf32> to vector<2x8x8xf32>
    %659 = arith.addf %656, %658 : vector<2x8x8xf32>
    %cst_228 = arith.constant dense<0xFF800000> : vector<2x8xf32>
    %660 = vector.multi_reduction <maximumf>, %659, %cst_228 [2] : vector<2x8x8xf32> to vector<2x8xf32>
    %661 = vector.shape_cast %660 : vector<2x8xf32> to vector<2x8x1xf32>
    %662 = vector.broadcast %661 : vector<2x8x1xf32> to vector<2x8x8xf32>
    %663 = arith.subf %659, %662 : vector<2x8x8xf32>
    %664 = math.exp %663 : vector<2x8x8xf32>
    %cst_229 = arith.constant dense<0.000000e+00> : vector<2x8xf32>
    %665 = vector.multi_reduction <add>, %664, %cst_229 [2] : vector<2x8x8xf32> to vector<2x8xf32>
    %666 = vector.shape_cast %665 : vector<2x8xf32> to vector<2x8x1xf32>
    %667 = tpu.reciprocal %666 {approx = true} : vector<2x8x1xf32> -> vector<2x8x1xf32>
    %668 = vector.broadcast %667 : vector<2x8x1xf32> to vector<2x8x8xf32>
    %669 = arith.mulf %664, %668 : vector<2x8x8xf32>
    %670 = arith.truncf %669 : vector<2x8x8xf32> to vector<2x8x8xbf16>
    "tpu.trace_start"() <{level = 10 : i32, message = "bqk,bkd->bqd"}> : () -> ()
    %cst_230 = arith.constant dense<0.000000e+00> : vector<2x8x64xf32>
    %671 = tpu.matmul %670, %655, %cst_230 {dimension_numbers = #tpu.dot_dimension_numbers<[2], [1], [1], [2], [0, 0, 0, 1, 1, 2], [0], [0]>} : vector<2x8x8xbf16>, vector<2x8x64xbf16>, vector<2x8x64xf32> -> vector<2x8x64xf32>
    "tpu.trace_stop"() : () -> ()
    %672 = arith.addf %649, %671 : vector<2x8x64xf32>
    %673 = vector.shape_cast %672 : vector<2x8x64xf32> to vector<16x64xf32>
    %674 = arith.addf %544, %673 : vector<16x64xf32>
    %c3_231 = arith.constant 3 : index
    %c0_232 = arith.constant 0 : index
    %c0_233 = arith.constant 0 : index
    %675 = vector.load %arg6[%c3_231, %c0_232, %c0_233] : memref<4x1x64xf32, #tpu.memory_space<vmem>>, vector<1x1x64xf32>
    %676 = vector.shape_cast %675 : vector<1x1x64xf32> to vector<1x64xf32>
    %677 = vector.broadcast %676 : vector<1x64xf32> to vector<16x64xf32>
    %678 = arith.addf %674, %677 : vector<16x64xf32>
    %c3_234 = arith.constant 3 : index
    %c0_235 = arith.constant 0 : index
    %c0_236 = arith.constant 0 : index
    %679 = vector.load %arg7[%c3_234, %c0_235, %c0_236] : memref<4x1x64xf32, #tpu.memory_space<vmem>>, vector<1x1x64xf32>
    %680 = vector.shape_cast %679 : vector<1x1x64xf32> to vector<1x64xf32>
    %c3_237 = arith.constant 3 : index
    %c0_238 = arith.constant 0 : index
    %c0_239 = arith.constant 0 : index
    %681 = vector.load %arg8[%c3_237, %c0_238, %c0_239] : memref<4x1x64xf32, #tpu.memory_space<vmem>>, vector<1x1x64xf32>
    %682 = vector.shape_cast %681 : vector<1x1x64xf32> to vector<1x64xf32>
    %cst_240 = arith.constant dense<0.000000e+00> : vector<16xf32>
    %683 = vector.multi_reduction <add>, %678, %cst_240 [1] : vector<16x64xf32> to vector<16xf32>
    %684 = vector.shape_cast %683 : vector<16xf32> to vector<16x1xf32>
    %cst_241 = arith.constant 6.400000e+01 : f32
    %685 = vector.broadcast %cst_241 : f32 to vector<16x1xf32>
    %686 = arith.divf %684, %685 : vector<16x1xf32>
    %687 = vector.broadcast %686 : vector<16x1xf32> to vector<16x64xf32>
    %688 = arith.subf %678, %687 : vector<16x64xf32>
    %689 = arith.mulf %688, %688 : vector<16x64xf32>
    %cst_242 = arith.constant dense<0.000000e+00> : vector<16xf32>
    %690 = vector.multi_reduction <add>, %689, %cst_242 [1] : vector<16x64xf32> to vector<16xf32>
    %691 = vector.shape_cast %690 : vector<16xf32> to vector<16x1xf32>
    %cst_243 = arith.constant 6.400000e+01 : f32
    %692 = vector.broadcast %cst_243 : f32 to vector<16x1xf32>
    %693 = arith.divf %691, %692 : vector<16x1xf32>
    %694 = vector.broadcast %686 : vector<16x1xf32> to vector<16x64xf32>
    %695 = arith.subf %678, %694 : vector<16x64xf32>
    %cst_244 = arith.constant 9.99999974E-6 : f32
    %696 = vector.broadcast %cst_244 : f32 to vector<16x1xf32>
    %697 = arith.addf %693, %696 : vector<16x1xf32>
    %698 = math.rsqrt %697 : vector<16x1xf32>
    %699 = vector.broadcast %698 : vector<16x1xf32> to vector<16x64xf32>
    %700 = arith.mulf %695, %699 : vector<16x64xf32>
    %701 = vector.broadcast %680 : vector<1x64xf32> to vector<16x64xf32>
    %702 = arith.mulf %701, %700 : vector<16x64xf32>
    %703 = vector.broadcast %682 : vector<1x64xf32> to vector<16x64xf32>
    %704 = arith.addf %702, %703 : vector<16x64xf32>
    %705 = arith.truncf %704 : vector<16x64xf32> to vector<16x64xbf16>
    %c3_245 = arith.constant 3 : index
    %c0_246 = arith.constant 0 : index
    %c0_247 = arith.constant 0 : index
    %706 = vector.load %arg9[%c3_245, %c0_246, %c0_247] : memref<4x64x256xbf16, #tpu.memory_space<vmem>>, vector<1x64x256xbf16>
    %707 = vector.shape_cast %706 : vector<1x64x256xbf16> to vector<64x256xbf16>
    %cst_248 = arith.constant dense<0.000000e+00> : vector<16x256xf32>
    %708 = tpu.matmul %705, %707, %cst_248 {dimension_numbers = #tpu.dot_dimension_numbers<[1], [0], [0], [1], [0, 0, 1, 1], [], []>} : vector<16x64xbf16>, vector<64x256xbf16>, vector<16x256xf32> -> vector<16x256xf32>
    %c3_249 = arith.constant 3 : index
    %c0_250 = arith.constant 0 : index
    %c0_251 = arith.constant 0 : index
    %709 = vector.load %arg10[%c3_249, %c0_250, %c0_251] : memref<4x1x256xf32, #tpu.memory_space<vmem>>, vector<1x1x256xf32>
    %710 = vector.shape_cast %709 : vector<1x1x256xf32> to vector<1x256xf32>
    %711 = vector.broadcast %710 : vector<1x256xf32> to vector<16x256xf32>
    %712 = arith.addf %708, %711 : vector<16x256xf32>
    %cst_252 = arith.constant 0.000000e+00 : f32
    %713 = vector.broadcast %cst_252 : f32 to vector<16x256xf32>
    %714 = arith.maximumf %712, %713 : vector<16x256xf32>
    %715 = arith.truncf %714 : vector<16x256xf32> to vector<16x256xbf16>
    %c3_253 = arith.constant 3 : index
    %c0_254 = arith.constant 0 : index
    %c0_255 = arith.constant 0 : index
    %716 = vector.load %arg11[%c3_253, %c0_254, %c0_255] : memref<4x256x64xbf16, #tpu.memory_space<vmem>>, vector<1x256x64xbf16>
    %717 = vector.shape_cast %716 : vector<1x256x64xbf16> to vector<256x64xbf16>
    %cst_256 = arith.constant dense<0.000000e+00> : vector<16x64xf32>
    %718 = tpu.matmul %715, %717, %cst_256 {dimension_numbers = #tpu.dot_dimension_numbers<[1], [0], [0], [1], [0, 0, 1, 1], [], []>} : vector<16x256xbf16>, vector<256x64xbf16>, vector<16x64xf32> -> vector<16x64xf32>
    %c3_257 = arith.constant 3 : index
    %c0_258 = arith.constant 0 : index
    %c0_259 = arith.constant 0 : index
    %719 = vector.load %arg12[%c3_257, %c0_258, %c0_259] : memref<4x1x64xf32, #tpu.memory_space<vmem>>, vector<1x1x64xf32>
    %720 = vector.shape_cast %719 : vector<1x1x64xf32> to vector<1x64xf32>
    %721 = vector.broadcast %720 : vector<1x64xf32> to vector<16x64xf32>
    %722 = arith.addf %718, %721 : vector<16x64xf32>
    %723 = arith.addf %678, %722 : vector<16x64xf32>
    %c0_260 = arith.constant 0 : index
    %c0_261 = arith.constant 0 : index
    %724 = vector.load %arg13[%c0_260, %c0_261] : memref<1x64xf32, #tpu.memory_space<vmem>>, vector<1x64xf32>
    %c0_262 = arith.constant 0 : index
    %c0_263 = arith.constant 0 : index
    %725 = vector.load %arg14[%c0_262, %c0_263] : memref<1x64xf32, #tpu.memory_space<vmem>>, vector<1x64xf32>
    %cst_264 = arith.constant dense<0.000000e+00> : vector<16xf32>
    %726 = vector.multi_reduction <add>, %723, %cst_264 [1] : vector<16x64xf32> to vector<16xf32>
    %727 = vector.shape_cast %726 : vector<16xf32> to vector<16x1xf32>
    %cst_265 = arith.constant 6.400000e+01 : f32
    %728 = vector.broadcast %cst_265 : f32 to vector<16x1xf32>
    %729 = arith.divf %727, %728 : vector<16x1xf32>
    %730 = vector.broadcast %729 : vector<16x1xf32> to vector<16x64xf32>
    %731 = arith.subf %723, %730 : vector<16x64xf32>
    %732 = arith.mulf %731, %731 : vector<16x64xf32>
    %cst_266 = arith.constant dense<0.000000e+00> : vector<16xf32>
    %733 = vector.multi_reduction <add>, %732, %cst_266 [1] : vector<16x64xf32> to vector<16xf32>
    %734 = vector.shape_cast %733 : vector<16xf32> to vector<16x1xf32>
    %cst_267 = arith.constant 6.400000e+01 : f32
    %735 = vector.broadcast %cst_267 : f32 to vector<16x1xf32>
    %736 = arith.divf %734, %735 : vector<16x1xf32>
    %737 = vector.broadcast %729 : vector<16x1xf32> to vector<16x64xf32>
    %738 = arith.subf %723, %737 : vector<16x64xf32>
    %cst_268 = arith.constant 9.99999974E-6 : f32
    %739 = vector.broadcast %cst_268 : f32 to vector<16x1xf32>
    %740 = arith.addf %736, %739 : vector<16x1xf32>
    %741 = math.rsqrt %740 : vector<16x1xf32>
    %742 = vector.broadcast %741 : vector<16x1xf32> to vector<16x64xf32>
    %743 = arith.mulf %738, %742 : vector<16x64xf32>
    %744 = vector.broadcast %724 : vector<1x64xf32> to vector<16x64xf32>
    %745 = arith.mulf %744, %743 : vector<16x64xf32>
    %746 = vector.broadcast %725 : vector<1x64xf32> to vector<16x64xf32>
    %747 = arith.addf %745, %746 : vector<16x64xf32>
    %748 = arith.truncf %747 : vector<16x64xf32> to vector<16x64xbf16>
    %c0_269 = arith.constant 0 : index
    %c0_270 = arith.constant 0 : index
    %749 = vector.load %arg15[%c0_269, %c0_270] : memref<64x128xbf16, #tpu.memory_space<vmem>>, vector<64x128xbf16>
    %cst_271 = arith.constant dense<0.000000e+00> : vector<16x128xf32>
    %750 = tpu.matmul %748, %749, %cst_271 {dimension_numbers = #tpu.dot_dimension_numbers<[1], [0], [0], [1], [0, 0, 1, 1], [], []>} : vector<16x64xbf16>, vector<64x128xbf16>, vector<16x128xf32> -> vector<16x128xf32>
    %c0_272 = arith.constant 0 : index
    %c0_273 = arith.constant 0 : index
    %751 = vector.load %arg16[%c0_272, %c0_273] : memref<1x128xf32, #tpu.memory_space<vmem>>, vector<1x128xf32>
    %752 = vector.broadcast %751 : vector<1x128xf32> to vector<16x128xf32>
    %753 = arith.addf %750, %752 : vector<16x128xf32>
    %754 = vector.shape_cast %753 : vector<16x128xf32> to vector<2x8x128xf32>
    %c0_274 = arith.constant 0 : index
    %c0_275 = arith.constant 0 : index
    %c0_276 = arith.constant 0 : index
    %755 = vector.load %arg17[%c0_274, %c0_275, %c0_276] : memref<2x8x128xf32, #tpu.memory_space<vmem>>, vector<2x8x128xf32>
    tpu.vector_store %arg17[%c0_274, %c0_275, %c0_276], %754 {strides = array<i32>} : memref<2x8x128xf32, #tpu.memory_space<vmem>>, vector<2x8x128xf32>,
    return
  }
  func.func @transform_0(%arg0: i32) -> (i32, i32, i32) {
    %c0_i32 = arith.constant 0 : i32
    %c0_i32_0 = arith.constant 0 : i32
    %c0_i32_1 = arith.constant 0 : i32
    return %arg0, %c0_i32, %c0_i32_0 : i32, i32, i32
  }
  func.func @transform_1(%arg0: i32) -> (i32, i32, i32) {
    %c0_i32 = arith.constant 0 : i32
    %c0_i32_0 = arith.constant 0 : i32
    %c0_i32_1 = arith.constant 0 : i32
    %c0_i32_2 = arith.constant 0 : i32
    return %c0_i32, %c0_i32_0, %c0_i32_1 : i32, i32, i32
  }
  func.func @transform_2(%arg0: i32) -> (i32, i32, i32) {
    %c0_i32 = arith.constant 0 : i32
    %c0_i32_0 = arith.constant 0 : i32
    %c0_i32_1 = arith.constant 0 : i32
    %c0_i32_2 = arith.constant 0 : i32
    return %c0_i32, %c0_i32_0, %c0_i32_1 : i32, i32, i32
  }
  func.func @transform_3(%arg0: i32) -> (i32, i32, i32) {
    %c0_i32 = arith.constant 0 : i32
    %c0_i32_0 = arith.constant 0 : i32
    %c0_i32_1 = arith.constant 0 : i32
    %c0_i32_2 = arith.constant 0 : i32
    return %c0_i32, %c0_i32_0, %c0_i32_1 : i32, i32, i32
  }
  func.func @transform_4(%arg0: i32) -> (i32, i32, i32) {
    %c0_i32 = arith.constant 0 : i32
    %c0_i32_0 = arith.constant 0 : i32
    %c0_i32_1 = arith.constant 0 : i32
    %c0_i32_2 = arith.constant 0 : i32
    return %c0_i32, %c0_i32_0, %c0_i32_1 : i32, i32, i32
  }
  func.func @transform_5(%arg0: i32) -> (i32, i32, i32) {
    %c0_i32 = arith.constant 0 : i32
    %c0_i32_0 = arith.constant 0 : i32
    %c0_i32_1 = arith.constant 0 : i32
    %c0_i32_2 = arith.constant 0 : i32
    return %c0_i32, %c0_i32_0, %c0_i32_1 : i32, i32, i32
  }
  func.func @transform_6(%arg0: i32) -> (i32, i32, i32) {
    %c0_i32 = arith.constant 0 : i32
    %c0_i32_0 = arith.constant 0 : i32
    %c0_i32_1 = arith.constant 0 : i32
    %c0_i32_2 = arith.constant 0 : i32
    return %c0_i32, %c0_i32_0, %c0_i32_1 : i32, i32, i32
  }
  func.func @transform_7(%arg0: i32) -> (i32, i32, i32) {
    %c0_i32 = arith.constant 0 : i32
    %c0_i32_0 = arith.constant 0 : i32
    %c0_i32_1 = arith.constant 0 : i32
    %c0_i32_2 = arith.constant 0 : i32
    return %c0_i32, %c0_i32_0, %c0_i32_1 : i32, i32, i32
  }
  func.func @transform_8(%arg0: i32) -> (i32, i32, i32) {
    %c0_i32 = arith.constant 0 : i32
    %c0_i32_0 = arith.constant 0 : i32
    %c0_i32_1 = arith.constant 0 : i32
    %c0_i32_2 = arith.constant 0 : i32
    return %c0_i32, %c0_i32_0, %c0_i32_1 : i32, i32, i32
  }
  func.func @transform_9(%arg0: i32) -> (i32, i32, i32) {
    %c0_i32 = arith.constant 0 : i32
    %c0_i32_0 = arith.constant 0 : i32
    %c0_i32_1 = arith.constant 0 : i32
    %c0_i32_2 = arith.constant 0 : i32
    return %c0_i32, %c0_i32_0, %c0_i32_1 : i32, i32, i32
  }
  func.func @transform_10(%arg0: i32) -> (i32, i32, i32) {
    %c0_i32 = arith.constant 0 : i32
    %c0_i32_0 = arith.constant 0 : i32
    %c0_i32_1 = arith.constant 0 : i32
    %c0_i32_2 = arith.constant 0 : i32
    return %c0_i32, %c0_i32_0, %c0_i32_1 : i32, i32, i32
  }
  func.func @transform_11(%arg0: i32) -> (i32, i32, i32) {
    %c0_i32 = arith.constant 0 : i32
    %c0_i32_0 = arith.constant 0 : i32
    %c0_i32_1 = arith.constant 0 : i32
    %c0_i32_2 = arith.constant 0 : i32
    return %c0_i32, %c0_i32_0, %c0_i32_1 : i32, i32, i32
  }
  func.func @transform_12(%arg0: i32) -> (i32, i32) {
    %c0_i32 = arith.constant 0 : i32
    %c0_i32_0 = arith.constant 0 : i32
    %c0_i32_1 = arith.constant 0 : i32
    return %c0_i32, %c0_i32_0 : i32, i32
  }
  func.func @transform_13(%arg0: i32) -> (i32, i32) {
    %c0_i32 = arith.constant 0 : i32
    %c0_i32_0 = arith.constant 0 : i32
    %c0_i32_1 = arith.constant 0 : i32
    return %c0_i32, %c0_i32_0 : i32, i32
  }
  func.func @transform_14(%arg0: i32) -> (i32, i32) {
    %c0_i32 = arith.constant 0 : i32
    %c0_i32_0 = arith.constant 0 : i32
    %c0_i32_1 = arith.constant 0 : i32
    return %c0_i32, %c0_i32_0 : i32, i32
  }
  func.func @transform_15(%arg0: i32) -> (i32, i32) {
    %c0_i32 = arith.constant 0 : i32
    %c0_i32_0 = arith.constant 0 : i32
    %c0_i32_1 = arith.constant 0 : i32
    return %c0_i32, %c0_i32_0 : i32, i32
  }
  func.func @transform_16(%arg0: i32) -> (i32, i32, i32) {
    %c0_i32 = arith.constant 0 : i32
    %c0_i32_0 = arith.constant 0 : i32
    %c0_i32_1 = arith.constant 0 : i32
    return %arg0, %c0_i32, %c0_i32_0 : i32, i32, i32
  }
}

</mosaic_0001>

<bundles_post_ra>
// kernel: tpu_custom_call.1
= control target key start
LH: loop header
LB: loop body
LE: loop exit
PB: predicated region body
PF: predicated region fallthrough
CT: control target
= control target key end

     0   :  { %s6870_s0 = inlined_call_operand.vmem [shape: f32[2,8,64], index: 0, kind: input, shape index: {}]   ;;  %s6871_s1 = inlined_call_operand.vmem [shape: f32[4,1,64], index: 1, kind: input, shape index: {}]   ;;  %s6872_s2 = inlined_call_operand.vmem [shape: f32[4,1,64], index: 2, kind: input, shape index: {}]   ;;  %s6873_s3 = inlined_call_operand.vmem [shape: bf16[4,64,128], index: 3, kind: input, shape index: {}]   ;;  %s6874_s4 = inlined_call_operand.vmem [shape: bf16[4,64,256], index: 4, kind: input, shape index: {}]   ;;  %s6875_s5 = inlined_call_operand.vmem [shape: f32[4,1,64], index: 5, kind: input, shape index: {}]   ;;  %s6876_s6 = inlined_call_operand.vmem [shape: f32[4,1,64], index: 6, kind: input, shape index: {}]   ;;  %s6877_s7 = inlined_call_operand.vmem [shape: f32[4,1,64], index: 7, kind: input, shape index: {}]   ;;  %s6878_s8 = inlined_call_operand.vmem [shape: bf16[4,64,256], index: 8, kind: input, shape index: {}]   ;;  %s6879_s9 = inlined_call_operand.vmem [shape: f32[4,1,256], index: 9, kind: input, shape index: {}]   ;;  %s6880_s10 = inlined_call_operand.vmem [shape: bf16[4,256,64], index: 10, kind: input, shape index: {}]   ;;  %s6881_s11 = inlined_call_operand.vmem [shape: f32[4,1,64], index: 11, kind: input, shape index: {}]   ;;  %s6882_s12 = inlined_call_operand.vmem [shape: f32[1,64], index: 12, kind: input, shape index: {}]   ;;  %s6883_s13 = inlined_call_operand.vmem [shape: f32[1,64], index: 13, kind: input, shape index: {}]   ;;  %s6884_s14 = inlined_call_operand.vmem [shape: bf16[64,128], index: 14, kind: input, shape index: {}]   ;;  %s6885_s15 = inlined_call_operand.vmem [shape: f32[1,128], index: 15, kind: input, shape index: {}]   ;;  %s6886_s16 = inlined_call_operand.hbm [shape: f32[2,8,128], index: 16, kind: output, shape index: {}]  }
   0x1   :  { %6900 = sst [smem:[#allocation5_spill]] %s6870_s0 }
   0x2   :  { %s6901_s23 = sld [smem:[#allocation5_spill]]  ;;  %vm65_vm0 = vcmask 523264  }
   0x8   :  { %v5438_v0 = vld [vmem:[%s6901_s23] sm:$0xff]  ;;  %v5443_v1 = vld [vmem:[%s6901_s23 + $0x8] sm:$0xff] }
   0x9   :  { %v66_v2 = vsel %vm65_vm0, %v5438_v0, 0.0  ;;  %v69_v3 = vsel %vm65_vm0, %v5443_v1, 0.0 }
   0xa   :  { %67 = vadd.xlane.f32.xlu0 %v66_v2 }
  0x12   :  { %70 = vadd.xlane.f32.xlu0 %v69_v3 }
  0x13   :  { %21 = vsyncpa [#allocation3], 0  ;;  %v5338_v4 = vmov 64.0   ;;  %v4136_v21 = vld [vmem:[%s6874_s4 + $0x30] sm:$0xf]  ;;  %v4962_v23 = vld [vmem:[%s6873_s3 + $0x18] sm:$0xff] }
  0x14   :  { %5146 = vrcp.f32 %v5338_v4  ;;  %v4970_v22 = vld [vmem:[%s6874_s4 + $0x34] sm:$0xf0]  ;;  %167 = vmatpush.bf16.msra.mxu2 %v4962_v23  ;;  %v4128_v25 = vld [vmem:[%s6874_s4 + $0x20] sm:$0xf]  ;;  %v4968_v26 = vld [vmem:[%s6874_s4 + $0x24] sm:$0xf0] }
  0x15   :  { %v4137_v24 = vor.u32 %v4970_v22, %v4136_v21  ;;  %v4961_v27 = vld [vmem:[%s6873_s3 + $0x10] sm:$0xff]  ;;  %v4129_v28 = vor.u32 %v4968_v26, %v4128_v25  ;;  %v4966_v30 = vld [vmem:[%s6874_s4 + $0x14] sm:$0xf0]  ;;  %v4960_v31 = vld [vmem:[%s6873_s3 + $0x8] sm:$0xff]  ;;  %s5339_s25 = smov 112   ;;  %s6898_s26 = smov 48  }
  0x16   :  { %v4120_v29 = vld [vmem:[%s6874_s4 + $0x10] sm:$0xf]  ;;  %v4112_v33 = vld [vmem:[%s6874_s4] sm:$0xf]  ;;  %v4964_v34 = vld [vmem:[%s6874_s4 + $0x4] sm:$0xf0] }
  0x17   :  { %229 = vmatpush.bf16.msra.mxu1 %v4137_v24  ;;  %v4121_v32 = vor.u32 %v4966_v30, %v4120_v29  ;;  %v4959_v36 = vld [vmem:[%s6873_s3] sm:$0xff]  ;;  %v4113_v37 = vor.u32 %v4964_v34, %v4112_v33  ;;  %v4969_v40 = vld [vmem:[%s6874_s4 + $0x34] sm:$0xf]  ;;  %v4138_v41 = vld [vmem:[%s6874_s4 + $0x38] sm:$0xf0]  ;;  %s6896_s27 = smov 64  }
  0x18   :  { %168 = vmatpush.bf16.msra.mxu2 %v4961_v27  ;;  %v4141_v42 = vor.u32 %v4969_v40, %v4138_v41  ;;  %v4967_v43 = vld [vmem:[%s6874_s4 + $0x24] sm:$0xf]  ;;  %v4130_v44 = vld [vmem:[%s6874_s4 + $0x28] sm:$0xf0]  ;;  %v4965_v48 = vld [vmem:[%s6874_s4 + $0x14] sm:$0xf] }
  0x19   :  { %v4133_v46 = vor.u32 %v4967_v43, %v4130_v44  ;;  %v4122_v49 = vld [vmem:[%s6874_s4 + $0x18] sm:$0xf0]  ;;  %v4963_v54 = vld [vmem:[%s6874_s4 + $0x4] sm:$0xf]  ;;  %v4114_v55 = vld [vmem:[%s6874_s4 + $0x8] sm:$0xf0] }
  0x1a   :  { %v5147_v5 = vpop.eup %5146  ;;  %v4125_v53 = vor.u32 %v4965_v48, %v4122_v49  ;;  %v4117_v58 = vor.u32 %v4963_v54, %v4114_v55  ;;  %vm262_vm8 = vcmask 130048   ;;  %vm409_vm9 = vcmask 1043456   ;;  %s6894_s28 = smov 32   ;;  %s6892_s29 = smov 96  }
  0x1b   :  { %v73_v6 = vmul.f32 64.0, %v5147_v5  ;;  %vm77_vm1 = vweird.f32 %v5147_v5  ;;  %230 = vmatpush.bf16.msra.mxu1 %v4129_v28  ;;  %vm306_vm11 = vcmask 64512   ;;  %s6890_s30 = smov 16   ;;  %s6888_s0 = smov 80  }
  0x1c   :  { %169 = vmatpush.bf16.msra.mxu2 %v4960_v31  ;;  %s6904_s17 = smov 32   ;;  %s6905_s18 = smov 96  }
  0x1d   :  { %v74_v7 = vsub.f32 1.0, %v73_v6  ;;  %v5119_v6 = vld [vmem:[%s6871_s1] ss:$0 sm:$0xff] }
  0x1f   :  { %v75_v8 = vmul.f32 %v5147_v5, %v74_v7  ;;  %231 = vmatpush.bf16.msra.mxu1 %v4121_v32 }
  0x20   :  { %170 = vmatpush.bf16.msra.mxu2 %v4959_v36 }
  0x21   :  { %v76_v9 = vadd.f32 %v5147_v5, %v75_v8 }
  0x23   :  { %v5449_v10 = vsel %vm77_vm1, %v5147_v5, %v76_v9  ;;  %232 = vmatpush.bf16.msra.mxu1 %v4113_v37 }
  0x24   :  { %243 = vmatpush.bf16.msrb.mxu2 %v4141_v42 }
  0x28   :  { %244 = vmatpush.bf16.msrb.mxu2 %v4133_v46 }
  0x2c   :  { %245 = vmatpush.bf16.msrb.mxu2 %v4125_v53 }
  0x30   :  { %246 = vmatpush.bf16.msrb.mxu2 %v4117_v58 }
  0x7d   :  { %v68_v11 = vpop.xlane.xlu0 %67 }
  0x7e   :  { %v79_v12 = vmul.f32 %v5449_v10, %v68_v11 }
  0x80   :  { %v5453_v13 = vsub.f32 %v5438_v0, %v79_v12  ;;  %v5120_v12 = vld [vmem:[%s6872_s2] ss:$0 sm:$0xff] }
  0x82   :  { %v83_v14 = vmul.f32 %v5453_v13, %v5453_v13 }
  0x84   :  { %v85_v15 = vsel %vm65_vm0, %v83_v14, 0.0 }
  0x85   :  { %86 = vadd.xlane.f32.xlu1 %v85_v15  ;;  %v71_v16 = vpop.xlane.xlu0 %70 }
  0x86   :  { %v80_v17 = vmul.f32 %v5449_v10, %v71_v16 }
  0x88   :  { %v5460_v18 = vsub.f32 %v5443_v1, %v80_v17 }
  0x8a   :  { %v84_v19 = vmul.f32 %v5460_v18, %v5460_v18 }
  0x8c   :  { %v88_v20 = vsel %vm65_vm0, %v84_v19, 0.0 }
  0x8d   :  { %89 = vadd.xlane.f32.xlu1 %v88_v20 }
  0xf8   :  { %v87_v35 = vpop.xlane.xlu1 %86 }
  0xf9   :  { %v91_v38 = vmul.f32 %v87_v35, %v5449_v10 }
  0xfb   :  { %v93_v39 = vadd.f32 1e-05, %v91_v38 }
  0xfd   :  { %5148 = vrsqrt.f32 %v93_v39  ;;  %vm101_vm3 = vweird.f32 %v93_v39 }
 0x100   :  { %v90_v45 = vpop.xlane.xlu1 %89 }
 0x101   :  { %v92_v47 = vmul.f32 %v90_v45, %v5449_v10 }
 0x103   :  { %v5149_v50 = vpop.eup %5148  ;;  %v94_v51 = vadd.f32 1e-05, %v92_v47  ;;  %v57_v47 = vlaneseq }
 0x104   :  { %v96_v52 = vmul.f32 %v5149_v50, %v93_v39  ;;  %vm102_vm2 = vweird.f32 %v5149_v50 }
 0x105   :  { %5150 = vrsqrt.f32 %v94_v51  ;;  %vm103_vm4 = vmor %vm101_vm3, %vm102_vm2  ;;  %vm111_vm6 = vweird.f32 %v94_v51  ;;  %v58_v48 = vshrl.u32 %v57_v47, 7  ;;  %v60_v49 = vand.u32 127, %v57_v47 }
 0x106   :  { %v97_v56 = vmul.f32 %v5149_v50, %v96_v52 }
 0x107   :  { %vm61_vm10 = vcmp.ge.s32.totalorder %v58_v48, %v60_v49 }
 0x108   :  { %v98_v57 = vmul.f32 0.5, %v97_v56 }
 0x10a   :  { %v99_v59 = vsub.f32 1.5, %v98_v57 }
 0x10b   :  { %v5151_v60 = vpop.eup %5150 }
 0x10c   :  { %v100_v61 = vmul.f32 %v5149_v50, %v99_v59  ;;  %v106_v62 = vmul.f32 %v5151_v60, %v94_v51  ;;  %vm112_vm5 = vweird.f32 %v5151_v60 }
 0x10d   :  { %vm113_vm7 = vmor %vm111_vm6, %vm112_vm5 }
 0x10e   :  { %v107_v63 = vmul.f32 %v5151_v60, %v106_v62  ;;  %v104_v2 = vsel %vm103_vm4, %v5149_v50, %v100_v61  ;;  %v5342_v50 = vmov -1e+30  }
 0x10f   :  { %v115_v5 = vmul.f32 %v104_v2, %v5453_v13  ;;  %v5572_v51 = vsel %vm61_vm10, 0.0, %v5342_v50 }
 0x110   :  { %v108_v3 = vmul.f32 0.5, %v107_v63 }
 0x111   :  { %v120_v11 = vmul.f32 %v5119_v6, %v115_v5 }
 0x112   :  { %v109_v4 = vsub.f32 1.5, %v108_v3 }
 0x113   :  { %v125_v15 = vadd.f32 %v5120_v12, %v120_v11 }
 0x114   :  { %v110_v7 = vmul.f32 %v5151_v60, %v109_v4 }
 0x116   :  { %v114_v8 = vsel %vm113_vm7, %v5151_v60, %v110_v7 }
 0x117   :  { %v116_v9 = vmul.f32 %v114_v8, %v5460_v18 }
 0x119   :  { %v121_v14 = vmul.f32 %v5119_v6, %v116_v9 }
 0x11b   :  { %v126_v16 = vadd.f32 %v5120_v12, %v121_v14 }
 0x11d   :  { %v127_v17 = vpack.c.bf16 %v126_v16, %v125_v15 }
 0x11f   :  { %4109 = vmatmul.msk.bf16.vlgmr.msra.gmra.mxu2 %vm65_vm0, %v127_v17  ;;  %4142 = vmatmul.msk.bf16.vlgmr.msra.gmra.mxu1 %vm65_vm0, %v127_v17 }
 0x12f   :  { %4143 = vmatmul.msk.bf16.vlgmr.msrb.gmra.mxu2 %vm65_vm0, %v127_v17 }
 0x19c   :  { %v234_v25 = vpop.f32.mrf.mxu1 }
 0x19d   :  { %v255_v26 = vpack.c.bf16 %v234_v25, %v234_v25 }
 0x19f   :  { %v454_v29 = vsel %vm409_vm9, %v255_v26, 0  ;;  %v402_v60 = vunpack.c.l.b16 %v255_v26 }
 0x1a1   :  { %v403_v61 = vpack.c.b16 %v402_v60, %v402_v60 }
 0x1a2   :  { %v172_v13 = vpop.f32.mrf.mxu2 }
 0x1a3   :  { %v253_v19 = vpack.c.bf16 %v172_v13, %v172_v13 }
 0x1a4   :  { %v236_v30 = vpop.f32.mrf.mxu1 }
 0x1a5   :  { %v258_v20 = vunpack.c.l.b16 %v253_v19  ;;  %v256_v31 = vpack.c.bf16 %v236_v30, %v236_v30 }
 0x1a7   :  { %v5538_v21 = vpack.c.b16 %v258_v20, %v258_v20  ;;  %v473_v34 = vsel %vm409_vm9, %v256_v31, 0  ;;  %v427_v62 = vunpack.c.l.b16 %v256_v31 }
 0x1a9   :  { %331 = vrot.lane.b32.xlu0 %v5538_v21, %s5339_s25  ;;  %333 = vrot.lane.b32.xlu2 %v5538_v21, %s6898_s26  ;;  %v428_v2 = vpack.c.b16 %v427_v62, %v427_v62 }
 0x1aa   :  { %v174_v18 = vpop.f32.mrf.mxu2 }
 0x1ab   :  { %v254_v22 = vpack.c.bf16 %v174_v18, %v174_v18 }
 0x1ad   :  { %v283_v23 = vunpack.c.l.b16 %v254_v22 }
 0x1af   :  { %v5544_v24 = vpack.c.b16 %v283_v23, %v283_v23 }
 0x1b1   :  { %354 = vrot.lane.b32.xlu1 %v5544_v24, %s5339_s25  ;;  %356 = vrot.lane.b32.xlu2 %v5544_v24, %s6898_s26 }
 0x1b2   :  { %v248_v35 = vpop.f32.mrf.mxu2 }
 0x1b3   :  { %v5558_v36 = vpack.c.bf16 %v248_v35, %v248_v35 }
 0x1b5   :  { %v564_v38 = vsel %vm409_vm9, %v5558_v36, 0 }
 0x1b9   :  { %260 = vrot.lane.b32.xlu1 %v5538_v21, %s6896_s27 }
 0x1ba   :  { %v250_v39 = vpop.f32.mrf.mxu2 }
 0x1bb   :  { %v5563_v40 = vpack.c.bf16 %v250_v39, %v250_v39 }
 0x1bd   :  { %v583_v42 = vsel %vm409_vm9, %v5563_v40, 0 }
 0x1c1   :  { %285 = vrot.lane.b32.xlu1 %v5544_v24, %s6896_s27 }
 0x203   :  { %v334_v27 = vpop.permute.xlu2 %333 }
 0x204   :  { %v339_v28 = vsel %vm262_vm8, %v334_v27, 0 }
 0x205   :  { %348 = vmatpush.bf16.xpose.msra.mxu0 %v339_v28 }
 0x20b   :  { %v357_v32 = vpop.permute.xlu2 %356 }
 0x20c   :  { %v362_v33 = vsel %vm262_vm8, %v357_v32, 0 }
 0x20d   :  { %463 = vmatpush.bf16.msrb.mxu0 %v454_v29  ;;  %371 = vmatpush.bf16.xpose.msrb.mxu1 %v362_v33 }
 0x215   :  { %482 = vmatpush.bf16.msra.mxu1 %v473_v34 }
 0x21b   :  { %v332_v37 = vpop.permute.xlu0 %331 }
 0x21c   :  { %4146 = vmatmul.msk.bf16.vlgmr.msra.gmra.mxu0 %vm262_vm8, %v332_v37 }
 0x21d   :  { %573 = vmatpush.bf16.msra.mxu0 %v564_v38 }
 0x223   :  { %v355_v41 = vpop.permute.xlu1 %354 }
 0x224   :  { %4147 = vmatmul.msk.bf16.vlgmr.msrb.gmra.mxu1 %vm262_vm8, %v355_v41 }
 0x225   :  { %592 = vmatpush.bf16.msrb.mxu1 %v583_v42 }
 0x22b   :  { %v261_v43 = vpop.permute.xlu1 %260 }
 0x22c   :  { %v267_v44 = vsel %vm262_vm8, %v261_v43, 0 }
 0x22d   :  { %276 = vmatpush.bf16.xpose.msra.mxu3 %v267_v44 }
 0x233   :  { %v286_v45 = vpop.permute.xlu1 %285 }
 0x234   :  { %4144 = vmatmul.msk.bf16.vlgmr.msra.gmra.mxu3 %vm262_vm8, %v253_v19  ;;  %v291_v46 = vsel %vm262_vm8, %v286_v45, 0 }
 0x235   :  { %300 = vmatpush.bf16.xpose.msrb.mxu3 %v291_v46 }
 0x244   :  { %4145 = vmatmul.msk.bf16.vlgmr.msrb.gmra.mxu3 %vm262_vm8, %v254_v22 }
 0x299   :  { %v350_v52 = vpop.f32.mrf.mxu0 }
 0x29a   :  { %v351_v53 = vadd.f32 %v350_v52, %v5572_v51 }
 0x29c   :  { %v377_v54 = vsel %vm306_vm11, %v351_v53, -inf }
 0x29d   :  { %378 = vmax.xlane.f32.xlu2 %v377_v54 }
 0x2a1   :  { %v352_v55 = vpop.f32.mrf.mxu0  ;;  %v373_v56 = vpop.f32.mrf.mxu1 }
 0x2a2   :  { %v374_v57 = vadd.f32 %v373_v56, %v5572_v51 }
 0x2a4   :  { %v380_v58 = vsel %vm306_vm11, %v374_v57, -inf }
 0x2a5   :  { %381 = vmax.xlane.f32.xlu0 %v380_v58 }
 0x2a9   :  { %v375_v59 = vpop.f32.mrf.mxu1 }
 0x2b5   :  { %404 = vrot.lane.b32.xlu2 %v403_v61, %s6896_s27 }
 0x2b7   :  { %v278_v63 = vpop.f32.mrf.mxu3 }
 0x2b8   :  { %v279_v29 = vadd.f32 %v278_v63, %v5572_v51 }
 0x2b9   :  { %429 = vrot.lane.b32.xlu0 %v428_v2, %s6896_s27 }
 0x2ba   :  { %v307_v30 = vsel %vm306_vm11, %v279_v29, -inf }
 0x2bd   :  { %492 = vrot.lane.b32.xlu2 %v5538_v21, %s6894_s28 }
 0x2bf   :  { %v280_v3 = vpop.f32.mrf.mxu3 }
 0x2c1   :  { %490 = vrot.lane.b32.xlu0 %v5538_v21, %s6892_s29 }
 0x2c5   :  { %515 = vrot.lane.b32.xlu2 %v5544_v24, %s6894_s28 }
 0x2c7   :  { %v302_v4 = vpop.f32.mrf.mxu3 }
 0x2c8   :  { %v5591_v6 = vadd.f32 %v302_v4, %v5572_v51 }
 0x2c9   :  { %625 = vrot.lane.b32.xlu0 %v5544_v24, %s6890_s30 }
 0x2ca   :  { %v310_v7 = vsel %vm306_vm11, %v5591_v6, -inf }
 0x2cf   :  { %v304_v5 = vpop.f32.mrf.mxu3 }
 0x2d1   :  { %623 = vrot.lane.b32.xlu0 %v5544_v24, %s6888_s0 }
 0x2fb   :  { %311 = vmax.xlane.f32.xlu0 %v310_v7 }
 0x310   :  { %v379_v8 = vpop.xlane.xlu2 %378 }
 0x311   :  { %v383_v9 = vsub.f32 %v351_v53, %v379_v8 }
 0x313   :  { %v385_v11 = vmul.f32 1.442695, %v383_v9 }
 0x315   :  { %5152 = vpow2.f32 %v385_v11 }
 0x318   :  { %v382_v12 = vpop.xlane.xlu0 %381  ;;  %v405_v14 = vpop.permute.xlu2 %404 }
 0x319   :  { %v384_v15 = vsub.f32 %v374_v57, %v382_v12  ;;  %v411_v16 = vsel %vm409_vm9, %v405_v14, 0 }
 0x31a   :  { %420 = vmatpush.bf16.msra.mxu2 %v411_v16 }
 0x31b   :  { %v5153_v17 = vpop.eup %5152  ;;  %v387_v13 = vmul.f32 1.442695, %v384_v15 }
 0x31c   :  { %v389_v19 = vsel %vm306_vm11, %v5153_v17, 0.0 }
 0x31d   :  { %5154 = vpow2.f32 %v387_v13  ;;  %390 = vadd.xlane.f32.xlu1 %v389_v19 }
 0x320   :  { %v493_v20 = vpop.permute.xlu2 %492 }
 0x321   :  { %v498_v18 = vsel %vm262_vm8, %v493_v20, 0 }
 0x322   :  { %507 = vmatpush.bf16.xpose.msrb.mxu2 %v498_v18 }
 0x323   :  { %v5155_v22 = vpop.eup %5154 }
 0x324   :  { %v392_v23 = vsel %vm306_vm11, %v5155_v22, 0.0 }
 0x325   :  { %393 = vadd.xlane.f32.xlu2 %v392_v23 }
 0x328   :  { %v516_v25 = vpop.permute.xlu2 %515 }
 0x329   :  { %v521_v28 = vsel %vm262_vm8, %v516_v25, 0 }
 0x32b   :  { %v430_v26 = vpop.permute.xlu0 %429 }
 0x32c   :  { %v435_v27 = vsel %vm409_vm9, %v430_v26, 0 }
 0x32d   :  { %444 = vmatpush.bf16.msra.mxu3 %v435_v27 }
 0x331   :  { %530 = vmatpush.bf16.xpose.msrb.mxu3 %v521_v28 }
 0x333   :  { %v491_v33 = vpop.permute.xlu0 %490 }
 0x336   :  { %513 = vrot.lane.b32.xlu1 %v5544_v24, %s6892_s29 }
 0x33b   :  { %v626_v41 = vpop.permute.xlu0 %625 }
 0x33c   :  { %v631_v43 = vsel %vm262_vm8, %v626_v41, 0 }
 0x33d   :  { %602 = vrot.lane.b32.xlu2 %v5538_v21, %s6890_s30  ;;  %s6902_s30 = smov 16  }
 0x343   :  { %v624_v46 = vpop.permute.xlu0 %623 }
 0x345   :  { %600 = vrot.lane.b32.xlu2 %v5538_v21, %s6888_s0  ;;  %s6903_s0 = smov 80  }
 0x36e   :  { %308 = vmax.xlane.f32.xlu2 %v307_v30  ;;  %v312_v58 = vpop.xlane.xlu0 %311 }
 0x36f   :  { %v314_v62 = vsub.f32 %v5591_v6, %v312_v58 }
 0x371   :  { %v317_v2 = vmul.f32 1.442695, %v314_v62 }
 0x390   :  { %v391_v31 = vpop.xlane.xlu1 %390 }
 0x391   :  { %5156 = vrcp.f32 %v391_v31 }
 0x397   :  { %v5157_v32 = vpop.eup %5156 }
 0x398   :  { %v397_v34 = vmul.f32 %v5157_v32, %v5153_v17  ;;  %v394_v35 = vpop.xlane.xlu2 %393 }
 0x399   :  { %5158 = vrcp.f32 %v394_v35 }
 0x39a   :  { %v399_v37 = vpack.c.bf16 %v397_v34, %v397_v34 }
 0x39c   :  { %4148 = vmatmul.msk.bf16.vlgmr.msra.gmra.mxu2 %vm306_vm11, %v399_v37 }
 0x39f   :  { %v5159_v24 = vpop.eup %5158 }
 0x3a0   :  { %v398_v38 = vmul.f32 %v5159_v24, %v5155_v22  ;;  %v603_v39 = vpop.permute.xlu2 %602 }
 0x3a1   :  { %v608_v21 = vsel %vm262_vm8, %v603_v39, 0 }
 0x3a2   :  { %v400_v42 = vpack.c.bf16 %v398_v38, %v398_v38  ;;  %617 = vmatpush.bf16.xpose.msra.mxu2 %v608_v21 }
 0x3a4   :  { %4149 = vmatmul.msk.bf16.vlgmr.msra.gmra.mxu3 %vm306_vm11, %v400_v42 }
 0x3a5   :  { %640 = vmatpush.bf16.xpose.msra.mxu3 %v631_v43 }
 0x3a8   :  { %v514_v44 = vpop.permute.xlu1 %513  ;;  %v601_v45 = vpop.permute.xlu2 %600 }
 0x3ac   :  { %4152 = vmatmul.msk.bf16.vlgmr.msrb.gmra.mxu2 %vm262_vm8, %v491_v33 }
 0x3b4   :  { %4153 = vmatmul.msk.bf16.vlgmr.msrb.gmra.mxu3 %vm262_vm8, %v514_v44 }
 0x3bc   :  { %4156 = vmatmul.msk.bf16.vlgmr.msra.gmra.mxu2 %vm262_vm8, %v601_v45 }
 0x3c4   :  { %4157 = vmatmul.msk.bf16.vlgmr.msra.gmra.mxu3 %vm262_vm8, %v624_v46 }
 0x3e1   :  { %v309_v50 = vpop.xlane.xlu2 %308 }
 0x3e2   :  { %v313_v55 = vsub.f32 %v279_v29, %v309_v50 }
 0x3e4   :  { %v315_v57 = vmul.f32 1.442695, %v313_v55 }
 0x3e6   :  { %5160 = vpow2.f32 %v315_v57 }
 0x3e7   :  { %5162 = vpow2.f32 %v317_v2 }
 0x3ec   :  { %v5161_v3 = vpop.eup %5160 }
 0x3ed   :  { %v319_v8 = vsel %vm306_vm11, %v5161_v3, 0.0  ;;  %v5163_v11 = vpop.eup %5162 }
 0x3ee   :  { %v322_v15 = vsel %vm306_vm11, %v5163_v11, 0.0 }
 0x41f   :  { %v5617_v47 = vpop.f32.mrf.mxu2 }
 0x427   :  { %v424_v48 = vpop.f32.mrf.mxu2  ;;  %v5619_v49 = vpop.f32.mrf.mxu3 }
 0x428   :  { %v671_v48 = vunpack.c.l.b16 %v5558_v36 }
 0x42a   :  { %v672_v50 = vpack.c.b16 %v671_v48, %v671_v48 }
 0x42f   :  { %v448_v52 = vpop.f32.mrf.mxu3  ;;  %v509_v53 = vpop.f32.mrf.mxu2 }
 0x430   :  { %v510_v54 = vadd.f32 %v509_v53, %v5572_v51  ;;  %v695_v52 = vunpack.c.l.b16 %v5563_v40 }
 0x432   :  { %v536_v56 = vsel %vm306_vm11, %v510_v54, -inf  ;;  %v696_v53 = vpack.c.b16 %v695_v52, %v695_v52 }
 0x433   :  { %537 = vmax.xlane.f32.xlu1 %v536_v56 }
 0x437   :  { %v511_v59 = vpop.f32.mrf.mxu2  ;;  %v532_v60 = vpop.f32.mrf.mxu3 }
 0x438   :  { %v533_v61 = vadd.f32 %v532_v60, %v5572_v51 }
 0x43a   :  { %v539_v63 = vsel %vm306_vm11, %v533_v61, -inf }
 0x43b   :  { %540 = vmax.xlane.f32.xlu2 %v539_v63 }
 0x43f   :  { %v534_v4 = vpop.f32.mrf.mxu3  ;;  %v619_v5 = vpop.f32.mrf.mxu2 }
 0x440   :  { %v620_v7 = vadd.f32 %v619_v5, %v5572_v51 }
 0x442   :  { %v646_v9 = vsel %vm306_vm11, %v620_v7, -inf }
 0x443   :  { %320 = vadd.xlane.f32.xlu2 %v319_v8  ;;  %647 = vmax.xlane.f32.xlu0 %v646_v9 }
 0x447   :  { %v621_v12 = vpop.f32.mrf.mxu2  ;;  %v642_v6 = vpop.f32.mrf.mxu3 }
 0x448   :  { %v643_v14 = vadd.f32 %v642_v6, %v5572_v51 }
 0x44a   :  { %v649_v16 = vsel %vm306_vm11, %v643_v14, -inf }
 0x44b   :  { %323 = vadd.xlane.f32.xlu0 %v322_v15  ;;  %650 = vmax.xlane.f32.xlu1 %v649_v16 }
 0x44f   :  { %v644_v17 = vpop.f32.mrf.mxu3 }
 0x4a6   :  { %v538_v13 = vpop.xlane.xlu1 %537 }
 0x4a7   :  { %v542_v19 = vsub.f32 %v510_v54, %v538_v13 }
 0x4a9   :  { %v544_v20 = vmul.f32 1.442695, %v542_v19 }
 0x4ab   :  { %5164 = vpow2.f32 %v544_v20 }
 0x4ae   :  { %v541_v18 = vpop.xlane.xlu2 %540 }
 0x4af   :  { %v543_v22 = vsub.f32 %v533_v61, %v541_v18 }
 0x4b1   :  { %v5165_v23 = vpop.eup %5164  ;;  %v546_v25 = vmul.f32 1.442695, %v543_v22 }
 0x4b2   :  { %v548_v26 = vsel %vm306_vm11, %v5165_v23, 0.0 }
 0x4b3   :  { %5166 = vpow2.f32 %v546_v25  ;;  %549 = vadd.xlane.f32.xlu1 %v548_v26  ;;  %v5121_v25 = vld [vmem:[%s6875_s5] ss:$0 sm:$0xff] }
 0x4b6   :  { %v321_v27 = vpop.xlane.xlu2 %320  ;;  %v648_v28 = vpop.xlane.xlu0 %647 }
 0x4b7   :  { %5168 = vrcp.f32 %v321_v27  ;;  %v652_v29 = vsub.f32 %v620_v7, %v648_v28 }
 0x4b9   :  { %v5167_v30 = vpop.eup %5166  ;;  %v654_v31 = vmul.f32 1.442695, %v652_v29 }
 0x4ba   :  { %v551_v32 = vsel %vm306_vm11, %v5167_v30, 0.0 }
 0x4bb   :  { %5170 = vpow2.f32 %v654_v31  ;;  %552 = vadd.xlane.f32.xlu2 %v551_v32 }
 0x4bd   :  { %v5169_v33 = vpop.eup %5168 }
 0x4be   :  { %v327_v34 = vmul.f32 %v5169_v33, %v5161_v3  ;;  %v324_v35 = vpop.xlane.xlu0 %323  ;;  %v651_v37 = vpop.xlane.xlu1 %650 }
 0x4bf   :  { %5172 = vrcp.f32 %v324_v35  ;;  %v653_v24 = vsub.f32 %v643_v14, %v651_v37 }
 0x4c0   :  { %v329_v38 = vpack.c.bf16 %v327_v34, %v327_v34 }
 0x4c1   :  { %v5171_v39 = vpop.eup %5170  ;;  %v656_v41 = vmul.f32 1.442695, %v653_v24 }
 0x4c2   :  { %4150 = vmatmul.msk.bf16.vlgmr.msrb.gmra.mxu0 %vm306_vm11, %v329_v38  ;;  %v658_v21 = vsel %vm306_vm11, %v5171_v39, 0.0 }
 0x4c3   :  { %5174 = vpow2.f32 %v656_v41  ;;  %659 = vadd.xlane.f32.xlu0 %v658_v21 }
 0x4c5   :  { %v5173_v42 = vpop.eup %5172 }
 0x4c6   :  { %v328_v43 = vmul.f32 %v5173_v42, %v5163_v11 }
 0x4c8   :  { %v330_v44 = vpack.c.bf16 %v328_v43, %v328_v43 }
 0x4c9   :  { %v5175_v45 = vpop.eup %5174 }
 0x4ca   :  { %4151 = vmatmul.msk.bf16.vlgmr.msra.gmra.mxu1 %vm306_vm11, %v330_v44  ;;  %v661_v46 = vsel %vm306_vm11, %v5175_v45, 0.0  ;;  %v4186_v44 = vld [vmem:[%s6878_s8 + $0x30] sm:$0xf] }
 0x4cb   :  { %662 = vadd.xlane.f32.xlu1 %v661_v46  ;;  %v4977_v46 = vld [vmem:[%s6878_s8 + $0x34] sm:$0xf] }
 0x4d3   :  { %673 = vrot.lane.b32.xlu2 %v672_v50, %s6896_s27  ;;  %v4188_v50 = vld [vmem:[%s6878_s8 + $0x38] sm:$0xf0] }
 0x4d4   :  { %v4191_v52 = vor.u32 %v4977_v46, %v4188_v50  ;;  %v4989_v50 = vld [vmem:[%s6880_s10 + $0x50] sm:$0xff] }
 0x4d6   :  { %860 = vmatpush.bf16.msrb.mxu3 %v4191_v52  ;;  %v4980_v52 = vld [vmem:[%s6880_s10 + $0x8] sm:$0xff] }
 0x4d7   :  { %697 = vrot.lane.b32.xlu0 %v696_v53, %s6896_s27  ;;  %v4178_v53 = vld [vmem:[%s6878_s8 + $0x20] sm:$0xf] }
 0x526   :  { %v550_v54 = vpop.xlane.xlu1 %549 }
 0x527   :  { %5176 = vrcp.f32 %v550_v54  ;;  %v4976_v54 = vld [vmem:[%s6878_s8 + $0x24] sm:$0xf0] }
 0x52d   :  { %v5177_v55 = vpop.eup %5176 }
 0x52e   :  { %v556_v56 = vmul.f32 %v5177_v55, %v5165_v23  ;;  %v553_v57 = vpop.xlane.xlu2 %552  ;;  %v4975_v55 = vld [vmem:[%s6878_s8 + $0x24] sm:$0xf] }
 0x52f   :  { %5178 = vrcp.f32 %v553_v57  ;;  %v4180_v57 = vld [vmem:[%s6878_s8 + $0x28] sm:$0xf0] }
 0x530   :  { %v558_v58 = vpack.c.bf16 %v556_v56, %v556_v56  ;;  %v4179_v56 = vor.u32 %v4976_v54, %v4178_v53  ;;  %v4988_v53 = vld [vmem:[%s6880_s10 + $0x48] sm:$0xff]  ;;  %v4979_v54 = vld [vmem:[%s6880_s10] sm:$0xff] }
 0x532   :  { %4154 = vmatmul.msk.bf16.vlgmr.msra.gmra.mxu0 %vm306_vm11, %v558_v58 }
 0x535   :  { %v5179_v59 = vpop.eup %5178 }
 0x536   :  { %v557_v60 = vmul.f32 %v5179_v59, %v5167_v30  ;;  %v674_v36 = vpop.permute.xlu2 %673  ;;  %v660_v61 = vpop.xlane.xlu0 %659  ;;  %v4183_v59 = vor.u32 %v4975_v55, %v4180_v57  ;;  %v4987_v55 = vld [vmem:[%s6880_s10 + $0x40] sm:$0xff] }
 0x537   :  { %v679_v40 = vsel %vm409_vm9, %v674_v36, 0  ;;  %5180 = vrcp.f32 %v660_v61  ;;  %v4170_v36 = vld [vmem:[%s6878_s8 + $0x10] sm:$0xf]  ;;  %v4974_v61 = vld [vmem:[%s6878_s8 + $0x14] sm:$0xf0] }
 0x538   :  { %v559_v62 = vpack.c.bf16 %v557_v60, %v557_v60  ;;  %688 = vmatpush.bf16.msrb.mxu0 %v679_v40  ;;  %861 = vmatpush.bf16.msrb.mxu3 %v4183_v59  ;;  %v4973_v40 = vld [vmem:[%s6878_s8 + $0x14] sm:$0xf] }
 0x53a   :  { %4155 = vmatmul.msk.bf16.vlgmr.msrb.gmra.mxu1 %vm306_vm11, %v559_v62 }
 0x53d   :  { %v5181_v63 = vpop.eup %5180 }
 0x53e   :  { %v666_v2 = vmul.f32 %v5181_v63, %v5171_v39  ;;  %v663_v3 = vpop.xlane.xlu1 %662  ;;  %v4171_v63 = vor.u32 %v4974_v61, %v4170_v36 }
 0x53f   :  { %5182 = vrcp.f32 %v663_v3  ;;  %v465_v4 = vpop.f32.mrf.mxu0 }
 0x540   :  { %v668_v5 = vpack.c.bf16 %v666_v2, %v666_v2  ;;  %v466_v19 = vadd.f32 %v465_v4, %v5617_v47  ;;  %v4172_v2 = vld [vmem:[%s6878_s8 + $0x18] sm:$0xf0]  ;;  %v4162_v4 = vld [vmem:[%s6878_s8] sm:$0xf] }
 0x541   :  { %v4175_v3 = vor.u32 %v4973_v40, %v4172_v2 }
 0x542   :  { %4158 = vmatmul.msk.bf16.vlgmr.msrb.gmra.mxu0 %vm306_vm11, %v668_v5  ;;  %v4972_v5 = vld [vmem:[%s6878_s8 + $0x4] sm:$0xf0] }
 0x543   :  { %862 = vmatpush.bf16.msrb.mxu3 %v4175_v3 }
 0x545   :  { %v5183_v7 = vpop.eup %5182 }
 0x546   :  { %v667_v11 = vmul.f32 %v5183_v7, %v5175_v45  ;;  %v4978_v45 = vld [vmem:[%s6878_s8 + $0x34] sm:$0xf0]  ;;  %v4971_v7 = vld [vmem:[%s6878_s8 + $0x4] sm:$0xf] }
 0x547   :  { %v467_v8 = vpop.f32.mrf.mxu0  ;;  %v484_v9 = vpop.f32.mrf.mxu1  ;;  %v4187_v48 = vor.u32 %v4978_v45, %v4186_v44 }
 0x548   :  { %v669_v14 = vpack.c.bf16 %v667_v11, %v667_v11  ;;  %v485_v30 = vadd.f32 %v484_v9, %v5619_v49  ;;  %v4163_v8 = vor.u32 %v4972_v5, %v4162_v4  ;;  %v4164_v9 = vld [vmem:[%s6878_s8 + $0x8] sm:$0xf0] }
 0x549   :  { %v698_v12 = vpop.permute.xlu0 %697  ;;  %846 = vmatpush.bf16.msrb.mxu2 %v4187_v48  ;;  %v4167_v11 = vor.u32 %v4971_v7, %v4164_v9  ;;  %v4990_v48 = vld [vmem:[%s6880_s10 + $0x58] sm:$0xff] }
 0x54a   :  { %v703_v6 = vsel %vm409_vm9, %v698_v12, 0 }
 0x54b   :  { %712 = vmatpush.bf16.msra.mxu1 %v703_v6  ;;  %863 = vmatpush.bf16.msrb.mxu3 %v4167_v11  ;;  %v4986_v6 = vld [vmem:[%s6880_s10 + $0x38] sm:$0xff]  ;;  %v5124_v11 = vld [vmem:[%s6881_s11] ss:$0 sm:$0xff] }
 0x54c   :  { %1008 = vmatpush.bf16.msra.mxu0 %v4986_v6 }
 0x54d   :  { %847 = vmatpush.bf16.msrb.mxu2 %v4179_v56  ;;  %v793_v56 = vld [vmem:[%s6879_s9] sm:$0x3] }
 0x54e   :  { %4159 = vmatmul.msk.bf16.vlgmr.msra.gmra.mxu1 %vm306_vm11, %v669_v14  ;;  %v4994_v14 = vld [vmem:[%s6880_s10 + $0x78] sm:$0xff]  ;;  %v795_v59 = vperm.slane %v793_v56, 0 }
 0x54f   :  { %v486_v15 = vpop.f32.mrf.mxu1  ;;  %1022 = vmatpush.bf16.msrb.mxu1 %v4994_v14 }
 0x551   :  { %848 = vmatpush.bf16.msrb.mxu2 %v4171_v63 }
 0x555   :  { %849 = vmatpush.bf16.msrb.mxu2 %v4163_v8 }
 0x5af   :  { %v575_v16 = vpop.f32.mrf.mxu0 }
 0x5b0   :  { %v598_v20 = vadd.f32 %v575_v16, %v466_v19  ;;  %v4993_v19 = vld [vmem:[%s6880_s10 + $0x70] sm:$0xff] }
 0x5b1   :  { %1023 = vmatpush.bf16.msrb.mxu1 %v4993_v19 }
 0x5b7   :  { %v577_v17 = vpop.f32.mrf.mxu0  ;;  %v594_v13 = vpop.f32.mrf.mxu1 }
 0x5b8   :  { %v599_v47 = vadd.f32 %v594_v13, %v485_v30  ;;  %v4985_v13 = vld [vmem:[%s6880_s10 + $0x30] sm:$0xff] }
 0x5b9   :  { %1009 = vmatpush.bf16.msra.mxu0 %v4985_v13 }
 0x5bf   :  { %v596_v18 = vpop.f32.mrf.mxu1  ;;  %v690_v22 = vpop.f32.mrf.mxu0 }
 0x5c0   :  { %v718_v23 = vadd.f32 %v690_v22, %v598_v20 }
 0x5c2   :  { %v720_v26 = vadd.f32 %v718_v23, %v5438_v0  ;;  %v4984_v23 = vld [vmem:[%s6880_s10 + $0x28] sm:$0xff] }
 0x5c3   :  { %1010 = vmatpush.bf16.msra.mxu0 %v4984_v23 }
 0x5c4   :  { %v5653_v27 = vadd.f32 %v5121_v25, %v720_v26 }
 0x5c6   :  { %v730_v28 = vsel %vm65_vm0, %v5653_v27, 0.0 }
 0x5c7   :  { %731 = vadd.xlane.f32.xlu1 %v730_v28  ;;  %v692_v29 = vpop.f32.mrf.mxu0  ;;  %v4983_v28 = vld [vmem:[%s6880_s10 + $0x20] sm:$0xff] }
 0x5c8   :  { %v4991_v29 = vld [vmem:[%s6880_s10 + $0x60] sm:$0xff]  ;;  %1011 = vmatpush.bf16.msra.mxu0 %v4983_v28 }
 0x5cb   :  { %v714_v31 = vpop.f32.mrf.mxu1 }
 0x5cc   :  { %v719_v32 = vadd.f32 %v714_v31, %v599_v47 }
 0x5ce   :  { %v721_v33 = vadd.f32 %v719_v32, %v5443_v1 }
 0x5d0   :  { %v5659_v34 = vadd.f32 %v5121_v25, %v721_v33  ;;  %v4992_v25 = vld [vmem:[%s6880_s10 + $0x68] sm:$0xff] }
 0x5d1   :  { %1024 = vmatpush.bf16.msrb.mxu1 %v4992_v25 }
 0x5d2   :  { %v733_v35 = vsel %vm65_vm0, %v5659_v34, 0.0 }
 0x5d3   :  { %734 = vadd.xlane.f32.xlu1 %v733_v35  ;;  %v716_v0 = vpop.f32.mrf.mxu1 }
 0x5d5   :  { %1025 = vmatpush.bf16.msrb.mxu1 %v4991_v29 }
 0x5d9   :  { %1026 = vmatpush.bf16.msrb.mxu1 %v4990_v48  ;;  %v5000_v48 = vld [vmem:[%s6874_s4 + $0x44] sm:$0xf0] }
 0x5dd   :  { %1027 = vmatpush.bf16.msrb.mxu1 %v4989_v50  ;;  %v4995_v50 = vld [vmem:[%s6873_s3 + $0x20] sm:$0xff] }
 0x5e1   :  { %1028 = vmatpush.bf16.msrb.mxu1 %v4988_v53  ;;  %v5005_v53 = vld [vmem:[%s6874_s4 + $0x74] sm:$0xf] }
 0x5e5   :  { %1029 = vmatpush.bf16.msrb.mxu1 %v4987_v55 }
 0x63a   :  { %v732_v37 = vpop.xlane.xlu1 %731 }
 0x63b   :  { %v736_v24 = vmul.f32 %v732_v37, %v5449_v10  ;;  %v5122_v37 = vld [vmem:[%s6876_s6] ss:$0 sm:$0xff] }
 0x63d   :  { %v5665_v38 = vsub.f32 %v5653_v27, %v736_v24 }
 0x63f   :  { %v740_v49 = vmul.f32 %v5665_v38, %v5665_v38 }
 0x641   :  { %v742_v39 = vsel %vm65_vm0, %v740_v49, 0.0 }
 0x642   :  { %743 = vadd.xlane.f32.xlu1 %v742_v39 }
 0x646   :  { %v735_v1 = vpop.xlane.xlu1 %734 }
 0x647   :  { %v737_v41 = vmul.f32 %v735_v1, %v5449_v10  ;;  %v5123_v1 = vld [vmem:[%s6877_s7] ss:$0 sm:$0xff] }
 0x649   :  { %v5672_v21 = vsub.f32 %v5659_v34, %v737_v41 }
 0x64b   :  { %v741_v42 = vmul.f32 %v5672_v21, %v5672_v21 }
 0x64d   :  { %v745_v43 = vsel %vm65_vm0, %v741_v42, 0.0 }
 0x64e   :  { %746 = vadd.xlane.f32.xlu0 %v745_v43 }
 0x6b5   :  { %v744_v58 = vpop.xlane.xlu1 %743 }
 0x6b6   :  { %v748_v60 = vmul.f32 %v744_v58, %v5449_v10 }
 0x6b8   :  { %v750_v62 = vadd.f32 1e-05, %v748_v60  ;;  %v796_v60 = vperm.slane %v793_v56, 1  ;;  %v5003_v56 = vld [vmem:[%s6874_s4 + $0x64] sm:$0xf] }
 0x6ba   :  { %5184 = vrsqrt.f32 %v750_v62  ;;  %vm758_vm13 = vweird.f32 %v750_v62 }
 0x6c0   :  { %v5185_v12 = vpop.eup %5184 }
 0x6c1   :  { %v753_v15 = vmul.f32 %v5185_v12, %v750_v62  ;;  %v747_v16 = vpop.xlane.xlu0 %746  ;;  %vm759_vm12 = vweird.f32 %v5185_v12 }
 0x6c2   :  { %v749_v17 = vmul.f32 %v747_v16, %v5449_v10  ;;  %vm760_vm14 = vmor %vm758_vm13, %vm759_vm12 }
 0x6c3   :  { %v754_v20 = vmul.f32 %v5185_v12, %v753_v15 }
 0x6c4   :  { %v751_v18 = vadd.f32 1e-05, %v749_v17 }
 0x6c5   :  { %v755_v22 = vmul.f32 0.5, %v754_v20 }
 0x6c6   :  { %5186 = vrsqrt.f32 %v751_v18  ;;  %vm768_vm1 = vweird.f32 %v751_v18 }
 0x6c7   :  { %v756_v26 = vsub.f32 1.5, %v755_v22 }
 0x6c9   :  { %v757_v47 = vmul.f32 %v5185_v12, %v756_v26 }
 0x6cb   :  { %v761_v33 = vsel %vm760_vm14, %v5185_v12, %v757_v47 }
 0x6cc   :  { %v5187_v30 = vpop.eup %5186  ;;  %v772_v24 = vmul.f32 %v761_v33, %v5665_v38  ;;  %v4982_v38 = vld [vmem:[%s6880_s10 + $0x18] sm:$0xff]  ;;  %v4319_v33 = vld [vmem:[%s6874_s4 + $0x70] sm:$0xf] }
 0x6cd   :  { %v763_v31 = vmul.f32 %v5187_v30, %v751_v18  ;;  %vm769_vm15 = vweird.f32 %v5187_v30  ;;  %1012 = vmatpush.bf16.msra.mxu0 %v4982_v38  ;;  %v4295_v38 = vld [vmem:[%s6874_s4 + $0x40] sm:$0xf] }
 0x6ce   :  { %vm770_vm2 = vmor %vm768_vm1, %vm769_vm15  ;;  %v777_v41 = vmul.f32 %v5122_v37, %v772_v24  ;;  %v4311_v24 = vld [vmem:[%s6874_s4 + $0x60] sm:$0xf] }
 0x6cf   :  { %v764_v32 = vmul.f32 %v5187_v30, %v763_v31 }
 0x6d0   :  { %v782_v44 = vadd.f32 %v5123_v1, %v777_v41  ;;  %v4303_v41 = vld [vmem:[%s6874_s4 + $0x50] sm:$0xf] }
 0x6d1   :  { %v765_v35 = vmul.f32 0.5, %v764_v32 }
 0x6d3   :  { %v766_v0 = vsub.f32 1.5, %v765_v35  ;;  %v5006_v35 = vld [vmem:[%s6874_s4 + $0x74] sm:$0xf0] }
 0x6d5   :  { %v767_v49 = vmul.f32 %v5187_v30, %v766_v0  ;;  %v4998_v0 = vld [vmem:[%s6873_s3 + $0x38] sm:$0xff] }
 0x6d6   :  { %1137 = vmatpush.bf16.msra.mxu2 %v4998_v0 }
 0x6d7   :  { %v771_v39 = vsel %vm770_vm2, %v5187_v30, %v767_v49  ;;  %v5004_v49 = vld [vmem:[%s6874_s4 + $0x64] sm:$0xf0] }
 0x6d8   :  { %v773_v42 = vmul.f32 %v771_v39, %v5672_v21  ;;  %v4981_v21 = vld [vmem:[%s6880_s10 + $0x10] sm:$0xff] }
 0x6d9   :  { %1013 = vmatpush.bf16.msra.mxu0 %v4981_v21  ;;  %v4997_v39 = vld [vmem:[%s6873_s3 + $0x30] sm:$0xff] }
 0x6da   :  { %v778_v43 = vmul.f32 %v5122_v37, %v773_v42  ;;  %v4320_v37 = vor.u32 %v5006_v35, %v4319_v33  ;;  %1138 = vmatpush.bf16.msra.mxu2 %v4997_v39  ;;  %v5002_v42 = vld [vmem:[%s6874_s4 + $0x54] sm:$0xf0] }
 0x6dc   :  { %v783_v45 = vadd.f32 %v5123_v1, %v778_v43  ;;  %1200 = vmatpush.bf16.msra.mxu3 %v4320_v37  ;;  %v4312_v1 = vor.u32 %v5004_v49, %v4311_v24  ;;  %v4996_v43 = vld [vmem:[%s6873_s3 + $0x28] sm:$0xff] }
 0x6dd   :  { %1014 = vmatpush.bf16.msra.mxu0 %v4980_v52  ;;  %v4296_v52 = vor.u32 %v5000_v48, %v4295_v38 }
 0x6de   :  { %v784_v46 = vpack.c.bf16 %v783_v45, %v782_v44  ;;  %v4304_v44 = vor.u32 %v5002_v42, %v4303_v41  ;;  %1139 = vmatpush.bf16.msra.mxu2 %v4996_v43 }
 0x6e0   :  { %4192 = vmatmul.msk.bf16.vlgmr.msrb.gmra.mxu2 %vm65_vm0, %v784_v46  ;;  %4193 = vmatmul.msk.bf16.vlgmr.msrb.gmra.mxu3 %vm65_vm0, %v784_v46 }
 0x6e1   :  { %1015 = vmatpush.bf16.msra.mxu0 %v4979_v54  ;;  %1201 = vmatpush.bf16.msra.mxu3 %v4312_v1  ;;  %v4321_v54 = vld [vmem:[%s6874_s4 + $0x78] sm:$0xf0] }
 0x6e2   :  { %1140 = vmatpush.bf16.msra.mxu2 %v4995_v50  ;;  %v4324_v55 = vor.u32 %v5005_v53, %v4321_v54 }
 0x6e5   :  { %1202 = vmatpush.bf16.msra.mxu3 %v4304_v44 }
 0x6e6   :  { %1214 = vmatpush.bf16.msrb.mxu2 %v4324_v55 }
 0x6e9   :  { %1203 = vmatpush.bf16.msra.mxu3 %v4296_v52 }
 0x763   :  { %v851_v57 = vpop.f32.mrf.mxu2  ;;  %v865_v58 = vpop.f32.mrf.mxu3 }
 0x764   :  { %v852_v36 = vadd.f32 %v851_v57, %v795_v59  ;;  %v866_v61 = vadd.f32 %v865_v58, %v796_v60  ;;  %v4313_v57 = vld [vmem:[%s6874_s4 + $0x68] sm:$0xf0] }
 0x766   :  { %v870_v3 = vmax.f32 %v852_v36, 0.0  ;;  %v871_v4 = vmax.f32 %v866_v61, 0.0  ;;  %v5001_v36 = vld [vmem:[%s6874_s4 + $0x54] sm:$0xf]  ;;  %v4305_v61 = vld [vmem:[%s6874_s4 + $0x58] sm:$0xf0] }
 0x76b   :  { %v853_v40 = vpop.f32.mrf.mxu2  ;;  %v867_v62 = vpop.f32.mrf.mxu3 }
 0x76c   :  { %v854_v63 = vadd.f32 %v853_v40, %v795_v59  ;;  %v868_v2 = vadd.f32 %v867_v62, %v796_v60  ;;  %v4316_v60 = vor.u32 %v5003_v56, %v4313_v57 }
 0x76e   :  { %v872_v5 = vmax.f32 %v854_v63, 0.0  ;;  %v873_v7 = vmax.f32 %v868_v2, 0.0  ;;  %1215 = vmatpush.bf16.msrb.mxu2 %v4316_v60  ;;  %v4308_v2 = vor.u32 %v5001_v36, %v4305_v61 }
 0x770   :  { %v874_v8 = vpack.c.bf16 %v872_v5, %v870_v3  ;;  %v875_v9 = vpack.c.bf16 %v873_v7, %v871_v4  ;;  %v4999_v4 = vld [vmem:[%s6874_s4 + $0x44] sm:$0xf]  ;;  %v4297_v5 = vld [vmem:[%s6874_s4 + $0x48] sm:$0xf0] }
 0x772   :  { %1016 = vmatmul.bf16.vlgmr.msra.gmra.mxu0 %v874_v8  ;;  %1030 = vmatmul.bf16.vlgmr.msrb.gmra.mxu1 %v875_v9  ;;  %v4300_v8 = vor.u32 %v4999_v4, %v4297_v5 }
 0x773   :  { %1216 = vmatpush.bf16.msrb.mxu2 %v4308_v2 }
 0x777   :  { %1217 = vmatpush.bf16.msrb.mxu2 %v4300_v8 }
 0x7ef   :  { %v1017_v12 = vpop.f32.mrf.mxu0  ;;  %v1031_v6 = vpop.f32.mrf.mxu1 }
 0x7f0   :  { %v1018_v14 = vadd.f32 %v5124_v11, %v1017_v12 }
 0x7f2   :  { %v1032_v15 = vadd.f32 %v1031_v6, %v1018_v14 }
 0x7f4   :  { %v5792_v16 = vadd.f32 %v1032_v15, %v5653_v27 }
 0x7f6   :  { %v1042_v17 = vsel %vm65_vm0, %v5792_v16, 0.0 }
 0x7f7   :  { %v1019_v13 = vpop.f32.mrf.mxu0  ;;  %1043 = vadd.xlane.f32.xlu2 %v1042_v17  ;;  %v1033_v20 = vpop.f32.mrf.mxu1 }
 0x7f8   :  { %v1020_v19 = vadd.f32 %v5124_v11, %v1019_v13 }
 0x7fa   :  { %v1034_v18 = vadd.f32 %v1033_v20, %v1020_v19  ;;  %v5125_v19 = vld [vmem:[%s6871_s1 + $0x1] ss:$0 sm:$0xff] }
 0x7fc   :  { %v5797_v22 = vadd.f32 %v1034_v18, %v5659_v34 }
 0x7fe   :  { %v1045_v23 = vsel %vm65_vm0, %v5797_v22, 0.0 }
 0x7ff   :  { %1046 = vadd.xlane.f32.xlu1 %v1045_v23 }
 0x86a   :  { %v1044_v25 = vpop.xlane.xlu2 %1043 }
 0x86b   :  { %v1048_v26 = vmul.f32 %v1044_v25, %v5449_v10  ;;  %v5126_v25 = vld [vmem:[%s6872_s2 + $0x1] ss:$0 sm:$0xff] }
 0x86d   :  { %v5803_v27 = vsub.f32 %v5792_v16, %v1048_v26 }
 0x86f   :  { %v1052_v28 = vmul.f32 %v5803_v27, %v5803_v27 }
 0x871   :  { %v1054_v29 = vsel %vm65_vm0, %v1052_v28, 0.0 }
 0x872   :  { %v1047_v30 = vpop.xlane.xlu1 %1046  ;;  %1055 = vadd.xlane.f32.xlu1 %v1054_v29 }
 0x873   :  { %v1049_v34 = vmul.f32 %v1047_v30, %v5449_v10 }
 0x875   :  { %v5810_v47 = vsub.f32 %v5797_v22, %v1049_v34 }
 0x877   :  { %v1053_v31 = vmul.f32 %v5810_v47, %v5810_v47 }
 0x879   :  { %v1057_v32 = vsel %vm65_vm0, %v1053_v31, 0.0 }
 0x87a   :  { %1058 = vadd.xlane.f32.xlu1 %v1057_v32 }
 0x8e5   :  { %v1056_v45 = vpop.xlane.xlu1 %1055 }
 0x8e6   :  { %v1060_v46 = vmul.f32 %v1056_v45, %v5449_v10 }
 0x8e8   :  { %v1062_v21 = vadd.f32 1e-05, %v1060_v46 }
 0x8ea   :  { %5188 = vrsqrt.f32 %v1062_v21  ;;  %vm1070_vm4 = vweird.f32 %v1062_v21 }
 0x8ed   :  { %v1059_v58 = vpop.xlane.xlu1 %1058 }
 0x8ee   :  { %v1061_v59 = vmul.f32 %v1059_v58, %v5449_v10 }
 0x8f0   :  { %v5189_v40 = vpop.eup %5188  ;;  %v1063_v62 = vadd.f32 1e-05, %v1061_v59 }
 0x8f1   :  { %v1065_v63 = vmul.f32 %v5189_v40, %v1062_v21  ;;  %vm1071_vm3 = vweird.f32 %v5189_v40 }
 0x8f2   :  { %5190 = vrsqrt.f32 %v1063_v62  ;;  %vm1072_vm5 = vmor %vm1070_vm4, %vm1071_vm3  ;;  %vm1080_vm7 = vweird.f32 %v1063_v62 }
 0x8f3   :  { %v1066_v3 = vmul.f32 %v5189_v40, %v1065_v63 }
 0x8f5   :  { %v1067_v7 = vmul.f32 0.5, %v1066_v3 }
 0x8f7   :  { %v1068_v9 = vsub.f32 1.5, %v1067_v7 }
 0x8f8   :  { %v5191_v11 = vpop.eup %5190 }
 0x8f9   :  { %v1069_v12 = vmul.f32 %v5189_v40, %v1068_v9  ;;  %v1075_v6 = vmul.f32 %v5191_v11, %v1063_v62  ;;  %vm1081_vm6 = vweird.f32 %v5191_v11 }
 0x8fa   :  { %vm1082_vm10 = vmor %vm1080_vm7, %vm1081_vm6 }
 0x8fb   :  { %v1076_v14 = vmul.f32 %v5191_v11, %v1075_v6  ;;  %v1073_v15 = vsel %vm1072_vm5, %v5189_v40, %v1069_v12 }
 0x8fc   :  { %v1084_v20 = vmul.f32 %v1073_v15, %v5803_v27 }
 0x8fd   :  { %v1077_v17 = vmul.f32 0.5, %v1076_v14 }
 0x8fe   :  { %v1089_v26 = vmul.f32 %v5125_v19, %v1084_v20 }
 0x8ff   :  { %v1078_v13 = vsub.f32 1.5, %v1077_v17 }
 0x900   :  { %v1094_v30 = vadd.f32 %v5126_v25, %v1089_v26 }
 0x901   :  { %v1079_v18 = vmul.f32 %v5191_v11, %v1078_v13 }
 0x903   :  { %v1083_v23 = vsel %vm1082_vm10, %v5191_v11, %v1079_v18 }
 0x904   :  { %v1085_v28 = vmul.f32 %v1083_v23, %v5810_v47 }
 0x906   :  { %v1090_v29 = vmul.f32 %v5125_v19, %v1085_v28 }
 0x908   :  { %v1095_v34 = vadd.f32 %v5126_v25, %v1090_v29 }
 0x90a   :  { %v1096_v31 = vpack.c.bf16 %v1095_v34, %v1094_v30 }
 0x90c   :  { %4284 = vmatmul.msk.bf16.vlgmr.msra.gmra.mxu2 %vm65_vm0, %v1096_v31  ;;  %4325 = vmatmul.msk.bf16.vlgmr.msra.gmra.mxu3 %vm65_vm0, %v1096_v31 }
 0x91c   :  { %4326 = vmatmul.msk.bf16.vlgmr.msrb.gmra.mxu2 %vm65_vm0, %v1096_v31 }
 0x98f   :  { %v1142_v27 = vpop.f32.mrf.mxu2  ;;  %v1205_v1 = vpop.f32.mrf.mxu3 }
 0x990   :  { %v1224_v32 = vpack.c.bf16 %v1142_v27, %v1142_v27  ;;  %v1226_v42 = vpack.c.bf16 %v1205_v1, %v1205_v1 }
 0x992   :  { %v1229_v33 = vunpack.c.l.b16 %v1224_v32  ;;  %v1422_v48 = vsel %vm409_vm9, %v1226_v42, 0  ;;  %v1371_v6 = vunpack.c.l.b16 %v1226_v42 }
 0x994   :  { %v5888_v35 = vpack.c.b16 %v1229_v33, %v1229_v33  ;;  %v1372_v14 = vpack.c.b16 %v1371_v6, %v1371_v6 }
 0x996   :  { %1302 = vrot.lane.b32.xlu0 %v5888_v35, %s6898_s26 }
 0x997   :  { %v1144_v0 = vpop.f32.mrf.mxu2  ;;  %v1207_v21 = vpop.f32.mrf.mxu3 }
 0x998   :  { %v1225_v47 = vpack.c.bf16 %v1144_v0, %v1144_v0  ;;  %v1227_v50 = vpack.c.bf16 %v1207_v21, %v1207_v21 }
 0x99a   :  { %v1253_v37 = vunpack.c.l.b16 %v1225_v47  ;;  %v1441_v55 = vsel %vm409_vm9, %v1227_v50, 0  ;;  %v1395_v11 = vunpack.c.l.b16 %v1227_v50 }
 0x99c   :  { %v5892_v24 = vpack.c.b16 %v1253_v37, %v1253_v37  ;;  %v1396_v12 = vpack.c.b16 %v1395_v11, %v1395_v11 }
 0x99e   :  { %1323 = vrot.lane.b32.xlu2 %v5892_v24, %s5339_s25  ;;  %1325 = vrot.lane.b32.xlu1 %v5892_v24, %s6898_s26 }
 0x99f   :  { %v1219_v43 = vpop.f32.mrf.mxu2 }
 0x9a0   :  { %v5912_v56 = vpack.c.bf16 %v1219_v43, %v1219_v43 }
 0x9a2   :  { %v1532_v59 = vsel %vm409_vm9, %v5912_v56, 0 }
 0x9a6   :  { %1231 = vrot.lane.b32.xlu2 %v5888_v35, %s6896_s27  ;;  %1300 = vrot.lane.b32.xlu1 %v5888_v35, %s5339_s25 }
 0x9a7   :  { %v1221_v54 = vpop.f32.mrf.mxu2 }
 0x9a8   :  { %v5914_v57 = vpack.c.bf16 %v1221_v54, %v1221_v54 }
 0x9aa   :  { %v1551_v60 = vsel %vm409_vm9, %v5914_v57, 0 }
 0x9ae   :  { %1255 = vrot.lane.b32.xlu2 %v5892_v24, %s6896_s27 }
 0x9f8   :  { %v1324_v49 = vpop.permute.xlu2 %1323 }
 0xa00   :  { %v1232_v39 = vpop.permute.xlu2 %1231 }
 0xa01   :  { %v1237_v41 = vsel %vm262_vm8, %v1232_v39, 0 }
 0xa02   :  { %1246 = vmatpush.bf16.xpose.msrb.mxu3 %v1237_v41 }
 0xa08   :  { %v1303_v44 = vpop.permute.xlu0 %1302  ;;  %v1256_v45 = vpop.permute.xlu2 %1255 }
 0xa09   :  { %v1308_v46 = vsel %vm262_vm8, %v1303_v44, 0  ;;  %v1261_v38 = vsel %vm262_vm8, %v1256_v45, 0  ;;  %4327 = vmatmul.msk.bf16.vlgmr.msrb.gmra.mxu3 %vm262_vm8, %v1224_v32 }
 0xa0a   :  { %1270 = vmatpush.bf16.xpose.msrb.mxu0 %v1261_v38  ;;  %1317 = vmatpush.bf16.xpose.msra.mxu1 %v1308_v46 }
 0xa10   :  { %v1326_v52 = vpop.permute.xlu1 %1325 }
 0xa11   :  { %v1331_v53 = vsel %vm262_vm8, %v1326_v52, 0  ;;  %4328 = vmatmul.msk.bf16.vlgmr.msrb.gmra.mxu0 %vm262_vm8, %v1225_v47 }
 0xa12   :  { %1431 = vmatpush.bf16.msrb.mxu1 %v1422_v48  ;;  %1340 = vmatpush.bf16.xpose.msra.mxu2 %v1331_v53 }
 0xa18   :  { %v1301_v58 = vpop.permute.xlu1 %1300 }
 0xa19   :  { %4329 = vmatmul.msk.bf16.vlgmr.msra.gmra.mxu1 %vm262_vm8, %v1301_v58  ;;  %4330 = vmatmul.msk.bf16.vlgmr.msra.gmra.mxu2 %vm262_vm8, %v1324_v49 }
 0xa1a   :  { %1450 = vmatpush.bf16.msrb.mxu2 %v1441_v55  ;;  %1541 = vmatpush.bf16.msra.mxu1 %v1532_v59 }
 0xa1e   :  { %1560 = vmatpush.bf16.msra.mxu2 %v1551_v60 }
 0xa8c   :  { %v1248_v36 = vpop.f32.mrf.mxu3 }
 0xa8d   :  { %v1249_v47 = vadd.f32 %v1248_v36, %v5572_v51 }
 0xa8e   :  { %v1272_v61 = vpop.f32.mrf.mxu0 }
 0xa8f   :  { %v5937_v15 = vadd.f32 %v1272_v61, %v5572_v51  ;;  %v1276_v37 = vsel %vm306_vm11, %v1249_v47, -inf }
 0xa91   :  { %v1279_v17 = vsel %vm306_vm11, %v5937_v15, -inf }
 0xa94   :  { %v1250_v40 = vpop.f32.mrf.mxu3 }
 0xa96   :  { %v1274_v62 = vpop.f32.mrf.mxu0  ;;  %v1319_v63 = vpop.f32.mrf.mxu1 }
 0xa97   :  { %v1320_v2 = vadd.f32 %v1319_v63, %v5572_v51 }
 0xa99   :  { %v1346_v3 = vsel %vm306_vm11, %v1320_v2, -inf }
 0xa9a   :  { %1347 = vmax.xlane.f32.xlu0 %v1346_v3 }
 0xa9c   :  { %v1342_v4 = vpop.f32.mrf.mxu2 }
 0xa9d   :  { %v1343_v5 = vadd.f32 %v1342_v4, %v5572_v51 }
 0xa9e   :  { %v1321_v7 = vpop.f32.mrf.mxu1 }
 0xa9f   :  { %v1349_v8 = vsel %vm306_vm11, %v1343_v5, -inf }
 0xaa0   :  { %1350 = vmax.xlane.f32.xlu1 %v1349_v8 }
 0xaa4   :  { %v1344_v9 = vpop.f32.mrf.mxu2 }
 0xaae   :  { %1397 = vrot.lane.b32.xlu0 %v1396_v12, %s6896_s27 }
 0xab6   :  { %1458 = vrot.lane.b32.xlu0 %v5888_v35, %s6892_s29 }
 0xab9   :  { %1373 = vrot.lane.b32.xlu1 %v1372_v14, %s6896_s27 }
 0xac1   :  { %1483 = vrot.lane.b32.xlu1 %v5892_v24, %s6894_s28 }
 0xac9   :  { %1481 = vrot.lane.b32.xlu1 %v5892_v24, %s6892_s29 }
 0xad1   :  { %1593 = vrot.lane.b32.xlu1 %v5892_v24, %s6902_s30 }
 0xafb   :  { %1280 = vmax.xlane.f32.xlu1 %v1279_v17 }
 0xb0d   :  { %v1348_v13 = vpop.xlane.xlu0 %1347 }
 0xb0e   :  { %v1352_v19 = vsub.f32 %v1320_v2, %v1348_v13 }
 0xb10   :  { %v1354_v20 = vmul.f32 1.442695, %v1352_v19 }
 0xb12   :  { %5192 = vpow2.f32 %v1354_v20 }
 0xb13   :  { %v1351_v18 = vpop.xlane.xlu1 %1350 }
 0xb14   :  { %v1353_v23 = vsub.f32 %v1343_v5, %v1351_v18 }
 0xb16   :  { %v1356_v25 = vmul.f32 1.442695, %v1353_v23 }
 0xb18   :  { %v5193_v26 = vpop.eup %5192  ;;  %5194 = vpow2.f32 %v1356_v25 }
 0xb19   :  { %v1358_v28 = vsel %vm306_vm11, %v5193_v26, 0.0 }
 0xb1a   :  { %1359 = vadd.xlane.f32.xlu2 %v1358_v28 }
 0xb1e   :  { %v5195_v29 = vpop.eup %5194 }
 0xb1f   :  { %v1361_v30 = vsel %vm306_vm11, %v5195_v29, 0.0 }
 0xb20   :  { %v1398_v34 = vpop.permute.xlu0 %1397  ;;  %1362 = vadd.xlane.f32.xlu0 %v1361_v30 }
 0xb21   :  { %v1403_v31 = vsel %vm409_vm9, %v1398_v34, 0 }
 0xb22   :  { %1412 = vmatpush.bf16.msra.mxu0 %v1403_v31 }
 0xb28   :  { %v1459_v49 = vpop.permute.xlu0 %1458 }
 0xb2b   :  { %v1374_v27 = vpop.permute.xlu1 %1373 }
 0xb2c   :  { %v1379_v32 = vsel %vm409_vm9, %v1374_v27, 0 }
 0xb2d   :  { %1388 = vmatpush.bf16.msra.mxu3 %v1379_v32 }
 0xb32   :  { %1460 = vrot.lane.b32.xlu2 %v5888_v35, %s6894_s28 }
 0xb33   :  { %v1484_v33 = vpop.permute.xlu1 %1483 }
 0xb34   :  { %v1489_v0 = vsel %vm262_vm8, %v1484_v33, 0  ;;  %1570 = vrot.lane.b32.xlu0 %v5888_v35, %s6902_s30 }
 0xb35   :  { %1498 = vmatpush.bf16.xpose.msrb.mxu0 %v1489_v0 }
 0xb3a   :  { %1591 = vrot.lane.b32.xlu2 %v5892_v24, %s6903_s0 }
 0xb3b   :  { %v1482_v1 = vpop.permute.xlu1 %1481 }
 0xb3c   :  { %1568 = vrot.lane.b32.xlu0 %v5888_v35, %s6903_s0 }
 0xb43   :  { %v1594_v38 = vpop.permute.xlu1 %1593 }
 0xb44   :  { %v1599_v21 = vsel %vm262_vm8, %v1594_v38, 0 }
 0xb66   :  { %1277 = vmax.xlane.f32.xlu0 %v1276_v37 }
 0xb6e   :  { %v1281_v59 = vpop.xlane.xlu1 %1280 }
 0xb6f   :  { %v1283_v61 = vsub.f32 %v5937_v15, %v1281_v59 }
 0xb71   :  { %v1286_v40 = vmul.f32 1.442695, %v1283_v61 }
 0xb8d   :  { %v1360_v39 = vpop.xlane.xlu2 %1359 }
 0xb8e   :  { %5196 = vrcp.f32 %v1360_v39 }
 0xb93   :  { %v1363_v41 = vpop.xlane.xlu0 %1362 }
 0xb94   :  { %v5197_v42 = vpop.eup %5196  ;;  %5198 = vrcp.f32 %v1363_v41 }
 0xb95   :  { %v1366_v43 = vmul.f32 %v5197_v42, %v5193_v26  ;;  %v1461_v44 = vpop.permute.xlu2 %1460  ;;  %5200 = vpow2.f32 %v1286_v40 }
 0xb96   :  { %v1466_v45 = vsel %vm262_vm8, %v1461_v44, 0 }
 0xb97   :  { %v1368_v24 = vpack.c.bf16 %v1366_v43, %v1366_v43  ;;  %1475 = vmatpush.bf16.xpose.msrb.mxu3 %v1466_v45 }
 0xb99   :  { %4331 = vmatmul.msk.bf16.vlgmr.msra.gmra.mxu3 %vm306_vm11, %v1368_v24 }
 0xb9a   :  { %v5199_v35 = vpop.eup %5198 }
 0xb9b   :  { %v1367_v46 = vmul.f32 %v5199_v35, %v5195_v29  ;;  %v5201_v8 = vpop.eup %5200 }
 0xb9c   :  { %v1291_v6 = vsel %vm306_vm11, %v5201_v8, 0.0 }
 0xb9d   :  { %v1369_v48 = vpack.c.bf16 %v1367_v46, %v1367_v46  ;;  %v1592_v54 = vpop.permute.xlu2 %1591 }
 0xb9f   :  { %4332 = vmatmul.msk.bf16.vlgmr.msra.gmra.mxu0 %vm306_vm11, %v1369_v48 }
 0xba0   :  { %1608 = vmatpush.bf16.xpose.msra.mxu0 %v1599_v21 }
 0xba6   :  { %v1571_v50 = vpop.permute.xlu0 %1570 }
 0xba7   :  { %v1576_v52 = vsel %vm262_vm8, %v1571_v50, 0 }
 0xba8   :  { %1585 = vmatpush.bf16.xpose.msra.mxu3 %v1576_v52 }
 0xba9   :  { %4335 = vmatmul.msk.bf16.vlgmr.msrb.gmra.mxu3 %vm262_vm8, %v1459_v49 }
 0xbae   :  { %v1569_v53 = vpop.permute.xlu0 %1568 }
 0xbaf   :  { %4336 = vmatmul.msk.bf16.vlgmr.msrb.gmra.mxu0 %vm262_vm8, %v1482_v1 }
 0xbb9   :  { %4339 = vmatmul.msk.bf16.vlgmr.msra.gmra.mxu3 %vm262_vm8, %v1569_v53 }
 0xbbf   :  { %4340 = vmatmul.msk.bf16.vlgmr.msra.gmra.mxu0 %vm262_vm8, %v1592_v54  ;;  %v1663_v54 = vunpack.c.l.b16 %v5914_v57 }
 0xbd9   :  { %v1278_v7 = vpop.xlane.xlu0 %1277 }
 0xbda   :  { %v1282_v12 = vsub.f32 %v1249_v47, %v1278_v7 }
 0xbdc   :  { %v1284_v14 = vmul.f32 1.442695, %v1282_v12 }
 0xbde   :  { %5202 = vpow2.f32 %v1284_v14 }
 0xbe4   :  { %v5203_v23 = vpop.eup %5202 }
 0xbe5   :  { %v1288_v28 = vsel %vm306_vm11, %v5203_v23, 0.0 }
 0xc1c   :  { %v5965_v55 = vpop.f32.mrf.mxu3  ;;  %v5967_v58 = vpop.f32.mrf.mxu0 }
 0xc24   :  { %v1392_v60 = vpop.f32.mrf.mxu3  ;;  %v1416_v36 = vpop.f32.mrf.mxu0 }
 0xc25   :  { %v1664_v60 = vpack.c.b16 %v1663_v54, %v1663_v54  ;;  %v1639_v36 = vunpack.c.l.b16 %v5912_v56  ;;  %v5013_v54 = vld [vmem:[%s6878_s8 + $0x74] sm:$0xf] }
 0xc27   :  { %v1640_v61 = vpack.c.b16 %v1639_v36, %v1639_v36 }
 0xc2c   :  { %v1477_v62 = vpop.f32.mrf.mxu3  ;;  %v1500_v63 = vpop.f32.mrf.mxu0 }
 0xc2d   :  { %v1478_v2 = vadd.f32 %v1477_v62, %v5572_v51  ;;  %v1501_v3 = vadd.f32 %v1500_v63, %v5572_v51 }
 0xc2f   :  { %v1504_v4 = vsel %vm306_vm11, %v1478_v2, -inf  ;;  %v1507_v5 = vsel %vm306_vm11, %v1501_v3, -inf }
 0xc30   :  { %1505 = vmax.xlane.f32.xlu1 %v1504_v4  ;;  %1508 = vmax.xlane.f32.xlu2 %v1507_v5 }
 0xc34   :  { %v1479_v9 = vpop.f32.mrf.mxu3  ;;  %v1502_v11 = vpop.f32.mrf.mxu0 }
 0xc38   :  { %1292 = vadd.xlane.f32.xlu1 %v1291_v6 }
 0xc3c   :  { %v1587_v15 = vpop.f32.mrf.mxu3  ;;  %v1610_v17 = vpop.f32.mrf.mxu0 }
 0xc3d   :  { %v1588_v13 = vadd.f32 %v1587_v15, %v5572_v51  ;;  %v1611_v19 = vadd.f32 %v1610_v17, %v5572_v51 }
 0xc3f   :  { %v1614_v20 = vsel %vm306_vm11, %v1588_v13, -inf  ;;  %v1617_v18 = vsel %vm306_vm11, %v1611_v19, -inf }
 0xc40   :  { %1615 = vmax.xlane.f32.xlu0 %v1614_v20  ;;  %1618 = vmax.xlane.f32.xlu2 %v1617_v18 }
 0xc44   :  { %v1589_v25 = vpop.f32.mrf.mxu3  ;;  %v1612_v26 = vpop.f32.mrf.mxu0 }
 0xc48   :  { %1289 = vadd.xlane.f32.xlu2 %v1288_v28 }
 0xca3   :  { %v1509_v29 = vpop.xlane.xlu2 %1508  ;;  %v1506_v30 = vpop.xlane.xlu1 %1505 }
 0xca4   :  { %v1511_v34 = vsub.f32 %v1501_v3, %v1509_v29  ;;  %v1510_v31 = vsub.f32 %v1478_v2, %v1506_v30 }
 0xca6   :  { %v1514_v27 = vmul.f32 1.442695, %v1511_v34  ;;  %v1512_v32 = vmul.f32 1.442695, %v1510_v31 }
 0xca8   :  { %5204 = vpow2.f32 %v1514_v27 }
 0xca9   :  { %5206 = vpow2.f32 %v1512_v32 }
 0xcab   :  { %v1293_v33 = vpop.xlane.xlu1 %1292 }
 0xcac   :  { %5208 = vrcp.f32 %v1293_v33  ;;  %v5127_v33 = vld [vmem:[%s6875_s5 + $0x1] ss:$0 sm:$0xff] }
 0xcae   :  { %v5205_v0 = vpop.eup %5204 }
 0xcaf   :  { %v5207_v47 = vpop.eup %5206  ;;  %v1519_v37 = vsel %vm306_vm11, %v5205_v0, 0.0 }
 0xcb0   :  { %1520 = vadd.xlane.f32.xlu0 %v1519_v37  ;;  %v1516_v49 = vsel %vm306_vm11, %v5207_v47, 0.0 }
 0xcb1   :  { %1517 = vadd.xlane.f32.xlu1 %v1516_v49 }
 0xcb2   :  { %v5209_v39 = vpop.eup %5208 }
 0xcb3   :  { %v1297_v1 = vmul.f32 %v5209_v39, %v5201_v8  ;;  %v1616_v41 = vpop.xlane.xlu0 %1615  ;;  %v1619_v42 = vpop.xlane.xlu2 %1618 }
 0xcb4   :  { %v1620_v43 = vsub.f32 %v1588_v13, %v1616_v41  ;;  %v1621_v44 = vsub.f32 %v1611_v19, %v1619_v42 }
 0xcb5   :  { %v1299_v45 = vpack.c.bf16 %v1297_v1, %v1297_v1 }
 0xcb6   :  { %v1622_v24 = vmul.f32 1.442695, %v1620_v43  ;;  %v1624_v35 = vmul.f32 1.442695, %v1621_v44 }
 0xcb7   :  { %4334 = vmatmul.msk.bf16.vlgmr.msrb.gmra.mxu2 %vm306_vm11, %v1299_v45 }
 0xcb8   :  { %5210 = vpow2.f32 %v1622_v24 }
 0xcb9   :  { %5212 = vpow2.f32 %v1624_v35 }
 0xcbb   :  { %v1290_v46 = vpop.xlane.xlu2 %1289 }
 0xcbc   :  { %5214 = vrcp.f32 %v1290_v46 }
 0xcbe   :  { %v5211_v38 = vpop.eup %5210 }
 0xcbf   :  { %v5213_v48 = vpop.eup %5212  ;;  %v1626_v21 = vsel %vm306_vm11, %v5211_v38, 0.0 }
 0xcc0   :  { %1627 = vadd.xlane.f32.xlu0 %v1626_v21  ;;  %v1629_v50 = vsel %vm306_vm11, %v5213_v48, 0.0 }
 0xcc1   :  { %1630 = vadd.xlane.f32.xlu2 %v1629_v50 }
 0xcc2   :  { %v5215_v52 = vpop.eup %5214 }
 0xcc3   :  { %v1296_v53 = vmul.f32 %v5215_v52, %v5203_v23  ;;  %v4381_v52 = vld [vmem:[%s6878_s8 + $0x70] sm:$0xf] }
 0xcc5   :  { %v1298_v59 = vpack.c.bf16 %v1296_v53, %v1296_v53  ;;  %v5014_v53 = vld [vmem:[%s6878_s8 + $0x74] sm:$0xf0] }
 0xcc7   :  { %4333 = vmatmul.msk.bf16.vlgmr.msrb.gmra.mxu1 %vm306_vm11, %v1298_v59  ;;  %v4382_v59 = vor.u32 %v5014_v53, %v4381_v52 }
 0xcc9   :  { %1819 = vmatpush.bf16.msrb.mxu3 %v4382_v59  ;;  %v5018_v59 = vld [vmem:[%s6880_s10 + $0x98] sm:$0xff] }
 0xcca   :  { %1665 = vrot.lane.b32.xlu1 %v1664_v60, %s6896_s27  ;;  %v4383_v60 = vld [vmem:[%s6878_s8 + $0x78] sm:$0xf0] }
 0xccb   :  { %v4386_v36 = vor.u32 %v5013_v54, %v4383_v60  ;;  %v5019_v54 = vld [vmem:[%s6880_s10 + $0xa0] sm:$0xff]  ;;  %v5024_v60 = vld [vmem:[%s6880_s10 + $0xc8] sm:$0xff] }
 0xccd   :  { %1833 = vmatpush.bf16.msrb.mxu0 %v4386_v36  ;;  %v5017_v36 = vld [vmem:[%s6880_s10 + $0x90] sm:$0xff] }
 0xcd9   :  { %1641 = vrot.lane.b32.xlu2 %v1640_v61, %s6896_s27  ;;  %v4373_v61 = vld [vmem:[%s6878_s8 + $0x60] sm:$0xf] }
 0xd23   :  { %v1521_v40 = vpop.xlane.xlu0 %1520 }
 0xd24   :  { %5216 = vrcp.f32 %v1521_v40  ;;  %v1518_v62 = vpop.xlane.xlu1 %1517  ;;  %v5012_v40 = vld [vmem:[%s6878_s8 + $0x64] sm:$0xf0] }
 0xd25   :  { %5218 = vrcp.f32 %v1518_v62  ;;  %v5011_v62 = vld [vmem:[%s6878_s8 + $0x64] sm:$0xf] }
 0xd2a   :  { %v5217_v63 = vpop.eup %5216 }
 0xd2b   :  { %v5219_v2 = vpop.eup %5218  ;;  %v1525_v3 = vmul.f32 %v5217_v63, %v5205_v0  ;;  %v4374_v63 = vor.u32 %v5012_v40, %v4373_v61  ;;  %v5023_v61 = vld [vmem:[%s6880_s10 + $0xc0] sm:$0xff]  ;;  %v5016_v40 = vld [vmem:[%s6880_s10 + $0x88] sm:$0xff] }
 0xd2c   :  { %v1524_v4 = vmul.f32 %v5219_v2, %v5207_v47  ;;  %v4375_v2 = vld [vmem:[%s6878_s8 + $0x68] sm:$0xf0] }
 0xd2d   :  { %v1527_v57 = vpack.c.bf16 %v1525_v3, %v1525_v3  ;;  %v4378_v3 = vor.u32 %v5011_v62, %v4375_v2  ;;  %1820 = vmatpush.bf16.msrb.mxu3 %v4374_v63  ;;  %v5015_v62 = vld [vmem:[%s6880_s10 + $0x80] sm:$0xff] }
 0xd2e   :  { %v1526_v5 = vpack.c.bf16 %v1524_v4, %v1524_v4  ;;  %v4365_v4 = vld [vmem:[%s6878_s8 + $0x50] sm:$0xf]  ;;  %v4354_v63 = vld [vmem:[%s6879_s9 + $0x2] sm:$0x3] }
 0xd2f   :  { %4338 = vmatmul.msk.bf16.vlgmr.msra.gmra.mxu2 %vm306_vm11, %v1527_v57  ;;  %1834 = vmatpush.bf16.msrb.mxu0 %v4378_v3  ;;  %v5010_v57 = vld [vmem:[%s6878_s8 + $0x54] sm:$0xf0]  ;;  %v1769_v3 = vperm.slane %v4354_v63, 1 }
 0xd30   :  { %4337 = vmatmul.msk.bf16.vlgmr.msra.gmra.mxu1 %vm306_vm11, %v1526_v5  ;;  %v5009_v5 = vld [vmem:[%s6878_s8 + $0x54] sm:$0xf] }
 0xd33   :  { %v1628_v7 = vpop.xlane.xlu0 %1627 }
 0xd34   :  { %5220 = vrcp.f32 %v1628_v7  ;;  %v1631_v56 = vpop.xlane.xlu2 %1630  ;;  %v4366_v7 = vor.u32 %v5010_v57, %v4365_v4 }
 0xd35   :  { %5222 = vrcp.f32 %v1631_v56  ;;  %v4367_v56 = vld [vmem:[%s6878_s8 + $0x58] sm:$0xf0] }
 0xd36   :  { %1821 = vmatpush.bf16.msrb.mxu3 %v4366_v7  ;;  %v1768_v7 = vperm.slane %v4354_v63, 0  ;;  %v5039_v63 = vld [vmem:[%s6874_s4 + $0xa4] sm:$0xf] }
 0xd3a   :  { %v5221_v8 = vpop.eup %5220  ;;  %v1452_v9 = vpop.f32.mrf.mxu2 }
 0xd3b   :  { %v5223_v11 = vpop.eup %5222  ;;  %v1634_v12 = vmul.f32 %v5221_v8, %v5211_v38  ;;  %v1453_v0 = vadd.f32 %v1452_v9, %v5967_v58  ;;  %v4370_v8 = vor.u32 %v5009_v5, %v4367_v56 }
 0xd3c   :  { %v1635_v6 = vmul.f32 %v5223_v11, %v5213_v48  ;;  %v1642_v14 = vpop.permute.xlu2 %1641  ;;  %v1666_v15 = vpop.permute.xlu1 %1665 }
 0xd3d   :  { %v1636_v17 = vpack.c.bf16 %v1634_v12, %v1634_v12  ;;  %v1647_v13 = vsel %vm409_vm9, %v1642_v14, 0  ;;  %v1671_v19 = vsel %vm409_vm9, %v1666_v15, 0  ;;  %1835 = vmatpush.bf16.msrb.mxu0 %v4370_v8  ;;  %v4357_v12 = vld [vmem:[%s6878_s8 + $0x40] sm:$0xf]  ;;  %v5007_v14 = vld [vmem:[%s6878_s8 + $0x44] sm:$0xf] }
 0xd3e   :  { %v1637_v20 = vpack.c.bf16 %v1635_v6, %v1635_v6  ;;  %1656 = vmatpush.bf16.msrb.mxu1 %v1647_v13  ;;  %1680 = vmatpush.bf16.msrb.mxu2 %v1671_v19  ;;  %v5008_v6 = vld [vmem:[%s6878_s8 + $0x44] sm:$0xf0] }
 0xd3f   :  { %v4358_v15 = vor.u32 %v5008_v6, %v4357_v12 }
 0xd41   :  { %4341 = vmatmul.msk.bf16.vlgmr.msrb.gmra.mxu1 %vm306_vm11, %v1636_v17  ;;  %4342 = vmatmul.msk.bf16.vlgmr.msrb.gmra.mxu2 %vm306_vm11, %v1637_v20  ;;  %v4359_v17 = vld [vmem:[%s6878_s8 + $0x48] sm:$0xf0]  ;;  %v5030_v20 = vld [vmem:[%s6880_s10 + $0xf8] sm:$0xff] }
 0xd42   :  { %v1454_v18 = vpop.f32.mrf.mxu2  ;;  %v4362_v19 = vor.u32 %v5007_v14, %v4359_v17  ;;  %1822 = vmatpush.bf16.msrb.mxu3 %v4358_v15  ;;  %1997 = vmatpush.bf16.msra.mxu2 %v5030_v20 }
 0xd43   :  { %v5022_v18 = vld [vmem:[%s6880_s10 + $0xb8] sm:$0xff] }
 0xd44   :  { %v1433_v23 = vpop.f32.mrf.mxu1  ;;  %1836 = vmatpush.bf16.msrb.mxu0 %v4362_v19  ;;  %1983 = vmatpush.bf16.msra.mxu1 %v5022_v18  ;;  %v5130_v19 = vld [vmem:[%s6881_s11 + $0x1] ss:$0 sm:$0xff] }
 0xd45   :  { %v1434_v34 = vadd.f32 %v1433_v23, %v5965_v55 }
 0xd4c   :  { %v1435_v25 = vpop.f32.mrf.mxu1 }
 0xdad   :  { %v1543_v26 = vpop.f32.mrf.mxu1 }
 0xdae   :  { %v1566_v31 = vadd.f32 %v1543_v26, %v1434_v34  ;;  %v5029_v26 = vld [vmem:[%s6880_s10 + $0xf0] sm:$0xff] }
 0xdaf   :  { %1998 = vmatpush.bf16.msra.mxu2 %v5029_v26 }
 0xdb2   :  { %v1562_v28 = vpop.f32.mrf.mxu2 }
 0xdb3   :  { %v1567_v37 = vadd.f32 %v1562_v28, %v1453_v0  ;;  %v5021_v28 = vld [vmem:[%s6880_s10 + $0xb0] sm:$0xff]  ;;  %v5027_v0 = vld [vmem:[%s6880_s10 + $0xe0] sm:$0xff] }
 0xdb4   :  { %1984 = vmatpush.bf16.msra.mxu1 %v5021_v28 }
 0xdb5   :  { %v1545_v29 = vpop.f32.mrf.mxu1 }
 0xdba   :  { %v1564_v30 = vpop.f32.mrf.mxu2 }
 0xdbe   :  { %v1658_v27 = vpop.f32.mrf.mxu1 }
 0xdbf   :  { %v1686_v32 = vadd.f32 %v1658_v27, %v1566_v31  ;;  %v5028_v31 = vld [vmem:[%s6880_s10 + $0xe8] sm:$0xff] }
 0xdc0   :  { %v5020_v27 = vld [vmem:[%s6880_s10 + $0xa8] sm:$0xff]  ;;  %1999 = vmatpush.bf16.msra.mxu2 %v5028_v31 }
 0xdc1   :  { %v1688_v47 = vadd.f32 %v1686_v32, %v5792_v16  ;;  %1985 = vmatpush.bf16.msra.mxu1 %v5020_v27 }
 0xdc3   :  { %v6002_v49 = vadd.f32 %v5127_v33, %v1688_v47 }
 0xdc4   :  { %v1682_v39 = vpop.f32.mrf.mxu2  ;;  %2000 = vmatpush.bf16.msra.mxu2 %v5027_v0 }
 0xdc5   :  { %v1687_v1 = vadd.f32 %v1682_v39, %v1567_v37  ;;  %v1701_v41 = vsel %vm65_vm0, %v6002_v49, 0.0  ;;  %1986 = vmatpush.bf16.msra.mxu1 %v5019_v54  ;;  %v4523_v54 = vld [vmem:[%s6874_s4 + $0x80] sm:$0xf] }
 0xdc6   :  { %1702 = vadd.xlane.f32.xlu0 %v1701_v41  ;;  %v1660_v55 = vpop.f32.mrf.mxu1 }
 0xdc7   :  { %v1689_v42 = vadd.f32 %v1687_v1, %v5797_v22 }
 0xdc9   :  { %v6007_v43 = vadd.f32 %v5127_v33, %v1689_v42  ;;  %1987 = vmatpush.bf16.msra.mxu1 %v5018_v59  ;;  %v5031_v59 = vld [vmem:[%s6873_s3 + $0x40] sm:$0xff] }
 0xdcb   :  { %v1704_v58 = vsel %vm65_vm0, %v6007_v43, 0.0 }
 0xdcc   :  { %v1684_v44 = vpop.f32.mrf.mxu2 }
 0xdcd   :  { %1988 = vmatpush.bf16.msra.mxu1 %v5017_v36 }
 0xdce   :  { %1705 = vadd.xlane.f32.xlu0 %v1704_v58  ;;  %v5128_v58 = vld [vmem:[%s6876_s6 + $0x1] ss:$0 sm:$0xff] }
 0xdd1   :  { %1989 = vmatpush.bf16.msra.mxu1 %v5016_v40  ;;  %v4549_v40 = vld [vmem:[%s6874_s4 + $0xb8] sm:$0xf0] }
 0xdd5   :  { %1990 = vmatpush.bf16.msra.mxu1 %v5015_v62 }
 0xe39   :  { %v1703_v16 = vpop.xlane.xlu0 %1702 }
 0xe3a   :  { %v1707_v45 = vmul.f32 %v1703_v16, %v5449_v10 }
 0xe3c   :  { %v6013_v24 = vsub.f32 %v6002_v49, %v1707_v45 }
 0xe3e   :  { %v1711_v35 = vmul.f32 %v6013_v24, %v6013_v24 }
 0xe40   :  { %v1713_v46 = vsel %vm65_vm0, %v1711_v35, 0.0 }
 0xe41   :  { %1714 = vadd.xlane.f32.xlu0 %v1713_v46  ;;  %v1706_v22 = vpop.xlane.xlu0 %1705  ;;  %v5129_v46 = vld [vmem:[%s6877_s7 + $0x1] ss:$0 sm:$0xff] }
 0xe42   :  { %v1708_v38 = vmul.f32 %v1706_v22, %v5449_v10 }
 0xe44   :  { %v6020_v48 = vsub.f32 %v6007_v43, %v1708_v38 }
 0xe46   :  { %v1712_v21 = vmul.f32 %v6020_v48, %v6020_v48 }
 0xe48   :  { %v1716_v50 = vsel %vm65_vm0, %v1712_v21, 0.0 }
 0xe49   :  { %1717 = vadd.xlane.f32.xlu1 %v1716_v50 }
 0xeb4   :  { %v1715_v9 = vpop.xlane.xlu0 %1714 }
 0xeb5   :  { %v1719_v11 = vmul.f32 %v1715_v9, %v5449_v10 }
 0xeb7   :  { %v1721_v13 = vadd.f32 1e-05, %v1719_v11 }
 0xeb9   :  { %5224 = vrsqrt.f32 %v1721_v13  ;;  %vm1729_vm13 = vweird.f32 %v1721_v13 }
 0xebc   :  { %v1718_v23 = vpop.xlane.xlu1 %1717 }
 0xebd   :  { %v1720_v25 = vmul.f32 %v1718_v23, %v5449_v10 }
 0xebf   :  { %v5225_v29 = vpop.eup %5224  ;;  %v1722_v30 = vadd.f32 1e-05, %v1720_v25 }
 0xec0   :  { %v1724_v34 = vmul.f32 %v5225_v29, %v1721_v13  ;;  %vm1730_vm12 = vweird.f32 %v5225_v29 }
 0xec1   :  { %5226 = vrsqrt.f32 %v1722_v30  ;;  %vm1731_vm14 = vmor %vm1729_vm13, %vm1730_vm12  ;;  %vm1739_vm1 = vweird.f32 %v1722_v30 }
 0xec2   :  { %v1725_v32 = vmul.f32 %v5225_v29, %v1724_v34 }
 0xec4   :  { %v1726_v33 = vmul.f32 0.5, %v1725_v32 }
 0xec6   :  { %v1727_v47 = vsub.f32 1.5, %v1726_v33 }
 0xec7   :  { %v5227_v37 = vpop.eup %5226 }
 0xec8   :  { %v1728_v39 = vmul.f32 %v5225_v29, %v1727_v47  ;;  %v1734_v1 = vmul.f32 %v5227_v37, %v1722_v30  ;;  %vm1740_vm15 = vweird.f32 %v5227_v37 }
 0xec9   :  { %vm1741_vm2 = vmor %vm1739_vm1, %vm1740_vm15 }
 0xeca   :  { %v1735_v41 = vmul.f32 %v5227_v37, %v1734_v1  ;;  %v1732_v55 = vsel %vm1731_vm14, %v5225_v29, %v1728_v39 }
 0xecb   :  { %v1743_v16 = vmul.f32 %v1732_v55, %v6013_v24  ;;  %v5026_v24 = vld [vmem:[%s6880_s10 + $0xd8] sm:$0xff] }
 0xecc   :  { %v1736_v42 = vmul.f32 0.5, %v1735_v41  ;;  %2001 = vmatpush.bf16.msra.mxu2 %v5026_v24 }
 0xecd   :  { %v1748_v22 = vmul.f32 %v5128_v58, %v1743_v16 }
 0xece   :  { %v1737_v44 = vsub.f32 1.5, %v1736_v42  ;;  %v4547_v42 = vld [vmem:[%s6874_s4 + $0xb0] sm:$0xf] }
 0xecf   :  { %v1753_v50 = vadd.f32 %v5129_v46, %v1748_v22 }
 0xed0   :  { %v1738_v45 = vmul.f32 %v5227_v37, %v1737_v44  ;;  %v5042_v44 = vld [vmem:[%s6874_s4 + $0xb4] sm:$0xf0] }
 0xed1   :  { %v4548_v16 = vor.u32 %v5042_v44, %v4547_v42 }
 0xed2   :  { %v1742_v35 = vsel %vm1741_vm2, %v5227_v37, %v1738_v45  ;;  %v4539_v45 = vld [vmem:[%s6874_s4 + $0xa0] sm:$0xf] }
 0xed3   :  { %v1744_v38 = vmul.f32 %v1742_v35, %v6020_v48  ;;  %v5025_v48 = vld [vmem:[%s6880_s10 + $0xd0] sm:$0xff]  ;;  %2175 = vmatpush.bf16.msra.mxu0 %v4548_v16  ;;  %v5040_v35 = vld [vmem:[%s6874_s4 + $0xa4] sm:$0xf0] }
 0xed4   :  { %2002 = vmatpush.bf16.msra.mxu2 %v5025_v48  ;;  %v4540_v22 = vor.u32 %v5040_v35, %v4539_v45  ;;  %v5036_v48 = vld [vmem:[%s6874_s4 + $0x84] sm:$0xf0] }
 0xed5   :  { %v1749_v21 = vmul.f32 %v5128_v58, %v1744_v38  ;;  %v5034_v58 = vld [vmem:[%s6873_s3 + $0x58] sm:$0xff]  ;;  %v4531_v38 = vld [vmem:[%s6874_s4 + $0x90] sm:$0xf] }
 0xed6   :  { %2112 = vmatpush.bf16.msra.mxu3 %v5034_v58 }
 0xed7   :  { %v1754_v52 = vadd.f32 %v5129_v46, %v1749_v21  ;;  %v5033_v46 = vld [vmem:[%s6873_s3 + $0x50] sm:$0xff]  ;;  %2176 = vmatpush.bf16.msra.mxu0 %v4540_v22  ;;  %v5038_v21 = vld [vmem:[%s6874_s4 + $0x94] sm:$0xf0] }
 0xed8   :  { %2003 = vmatpush.bf16.msra.mxu2 %v5024_v60  ;;  %v4524_v60 = vor.u32 %v5036_v48, %v4523_v54 }
 0xed9   :  { %v1755_v53 = vpack.c.bf16 %v1754_v52, %v1753_v50  ;;  %v5032_v50 = vld [vmem:[%s6873_s3 + $0x48] sm:$0xff]  ;;  %v4532_v52 = vor.u32 %v5038_v21, %v4531_v38 }
 0xeda   :  { %2113 = vmatpush.bf16.msra.mxu3 %v5033_v46 }
 0xedb   :  { %4387 = vmatmul.msk.bf16.vlgmr.msrb.gmra.mxu3 %vm65_vm0, %v1755_v53  ;;  %4388 = vmatmul.msk.bf16.vlgmr.msrb.gmra.mxu0 %vm65_vm0, %v1755_v53 }
 0xedc   :  { %2004 = vmatpush.bf16.msra.mxu2 %v5023_v61  ;;  %2177 = vmatpush.bf16.msra.mxu0 %v4532_v52  ;;  %v5041_v61 = vld [vmem:[%s6874_s4 + $0xb4] sm:$0xf] }
 0xedd   :  { %v4552_v62 = vor.u32 %v5041_v61, %v4549_v40 }
 0xede   :  { %2114 = vmatpush.bf16.msra.mxu3 %v5032_v50 }
 0xee0   :  { %2178 = vmatpush.bf16.msra.mxu0 %v4524_v60 }
 0xee2   :  { %2115 = vmatpush.bf16.msra.mxu3 %v5031_v59 }
 0xee6   :  { %2189 = vmatpush.bf16.msrb.mxu3 %v4552_v62 }
 0xf58   :  { %v1838_v2 = vpop.f32.mrf.mxu0 }
 0xf59   :  { %v1839_v57 = vadd.f32 %v1838_v2, %v1769_v3  ;;  %v4541_v2 = vld [vmem:[%s6874_s4 + $0xa8] sm:$0xf0] }
 0xf5b   :  { %v1844_v8 = vmax.f32 %v1839_v57, 0.0 }
 0xf5e   :  { %v1824_v4 = vpop.f32.mrf.mxu3 }
 0xf5f   :  { %v1825_v11 = vadd.f32 %v1824_v4, %v1768_v7  ;;  %v4544_v4 = vor.u32 %v5039_v63, %v4541_v2 }
 0xf60   :  { %v1840_v5 = vpop.f32.mrf.mxu0 }
 0xf61   :  { %v1841_v56 = vadd.f32 %v1840_v5, %v1769_v3  ;;  %v1843_v15 = vmax.f32 %v1825_v11, 0.0  ;;  %v5037_v5 = vld [vmem:[%s6874_s4 + $0x94] sm:$0xf]  ;;  %2190 = vmatpush.bf16.msrb.mxu3 %v4544_v4 }
 0xf63   :  { %v1846_v9 = vmax.f32 %v1841_v56, 0.0 }
 0xf65   :  { %v1848_v12 = vpack.c.bf16 %v1846_v9, %v1844_v8 }
 0xf66   :  { %v1826_v6 = vpop.f32.mrf.mxu3 }
 0xf67   :  { %v1827_v14 = vadd.f32 %v1826_v6, %v1768_v7  ;;  %2005 = vmatmul.bf16.vlgmr.msra.gmra.mxu2 %v1848_v12  ;;  %v4533_v7 = vld [vmem:[%s6874_s4 + $0x98] sm:$0xf0]  ;;  %v5035_v12 = vld [vmem:[%s6874_s4 + $0x84] sm:$0xf]  ;;  %v4525_v6 = vld [vmem:[%s6874_s4 + $0x88] sm:$0xf0] }
 0xf68   :  { %v4536_v11 = vor.u32 %v5037_v5, %v4533_v7 }
 0xf69   :  { %v1845_v17 = vmax.f32 %v1827_v14, 0.0 }
 0xf6a   :  { %2191 = vmatpush.bf16.msrb.mxu3 %v4536_v11 }
 0xf6b   :  { %v1847_v13 = vpack.c.bf16 %v1845_v17, %v1843_v15  ;;  %v4528_v17 = vor.u32 %v5035_v12, %v4525_v6 }
 0xf6d   :  { %1991 = vmatmul.bf16.vlgmr.msra.gmra.mxu1 %v1847_v13 }
 0xf6e   :  { %2192 = vmatpush.bf16.msrb.mxu3 %v4528_v17 }
 0xfea   :  { %v1992_v20 = vpop.f32.mrf.mxu1  ;;  %v2006_v18 = vpop.f32.mrf.mxu2 }
 0xfeb   :  { %v1993_v23 = vadd.f32 %v5130_v19, %v1992_v20 }
 0xfed   :  { %v2007_v25 = vadd.f32 %v2006_v18, %v1993_v23 }
 0xfef   :  { %v6140_v26 = vadd.f32 %v2007_v25, %v6002_v49 }
 0xff1   :  { %v2017_v28 = vsel %vm65_vm0, %v6140_v26, 0.0 }
 0xff2   :  { %v1994_v29 = vpop.f32.mrf.mxu1  ;;  %2018 = vadd.xlane.f32.xlu2 %v2017_v28  ;;  %v2008_v34 = vpop.f32.mrf.mxu2 }
 0xff3   :  { %v1995_v30 = vadd.f32 %v5130_v19, %v1994_v29 }
 0xff5   :  { %v2009_v31 = vadd.f32 %v2008_v34, %v1995_v30  ;;  %v5131_v30 = vld [vmem:[%s6871_s1 + $0x2] ss:$0 sm:$0xff] }
 0xff7   :  { %v6145_v27 = vadd.f32 %v2009_v31, %v6007_v43 }
 0xff9   :  { %v2020_v32 = vsel %vm65_vm0, %v6145_v27, 0.0 }
 0xffa   :  { %2021 = vadd.xlane.f32.xlu0 %v2020_v32 }
0x1065   :  { %v2019_v33 = vpop.xlane.xlu2 %2018 }
0x1066   :  { %v2023_v0 = vmul.f32 %v2019_v33, %v5449_v10  ;;  %v5132_v33 = vld [vmem:[%s6872_s2 + $0x2] ss:$0 sm:$0xff] }
0x1068   :  { %v6151_v49 = vsub.f32 %v6140_v26, %v2023_v0 }
0x106a   :  { %v2027_v47 = vmul.f32 %v6151_v49, %v6151_v49 }
0x106c   :  { %v2029_v37 = vsel %vm65_vm0, %v2027_v47, 0.0 }
0x106d   :  { %v2022_v39 = vpop.xlane.xlu0 %2021  ;;  %2030 = vadd.xlane.f32.xlu0 %v2029_v37 }
0x106e   :  { %v2024_v43 = vmul.f32 %v2022_v39, %v5449_v10 }
0x1070   :  { %v6158_v1 = vsub.f32 %v6145_v27, %v2024_v43 }
0x1072   :  { %v2028_v41 = vmul.f32 %v6158_v1, %v6158_v1 }
0x1074   :  { %v2032_v55 = vsel %vm65_vm0, %v2028_v41, 0.0 }
0x1075   :  { %2033 = vadd.xlane.f32.xlu0 %v2032_v55 }
0x10e0   :  { %v2031_v53 = vpop.xlane.xlu0 %2030 }
0x10e1   :  { %v2035_v24 = vmul.f32 %v2031_v53, %v5449_v10 }
0x10e3   :  { %v2037_v36 = vadd.f32 1e-05, %v2035_v24 }
0x10e5   :  { %5228 = vrsqrt.f32 %v2037_v36  ;;  %vm2045_vm4 = vweird.f32 %v2037_v36 }
0x10e8   :  { %v2034_v3 = vpop.xlane.xlu0 %2033 }
0x10e9   :  { %v2036_v57 = vmul.f32 %v2034_v3, %v5449_v10 }
0x10eb   :  { %v5229_v56 = vpop.eup %5228  ;;  %v2038_v8 = vadd.f32 1e-05, %v2036_v57 }
0x10ec   :  { %v2040_v9 = vmul.f32 %v5229_v56, %v2037_v36  ;;  %vm2046_vm3 = vweird.f32 %v5229_v56 }
0x10ed   :  { %5230 = vrsqrt.f32 %v2038_v8  ;;  %vm2047_vm5 = vmor %vm2045_vm4, %vm2046_vm3  ;;  %vm2055_vm7 = vweird.f32 %v2038_v8 }
0x10ee   :  { %v2041_v14 = vmul.f32 %v5229_v56, %v2040_v9 }
0x10f0   :  { %v2042_v15 = vmul.f32 0.5, %v2041_v14 }
0x10f2   :  { %v2043_v13 = vsub.f32 1.5, %v2042_v15 }
0x10f3   :  { %v5231_v19 = vpop.eup %5230 }
0x10f4   :  { %v2044_v20 = vmul.f32 %v5229_v56, %v2043_v13  ;;  %v2050_v18 = vmul.f32 %v5231_v19, %v2038_v8  ;;  %vm2056_vm6 = vweird.f32 %v5231_v19 }
0x10f5   :  { %vm2057_vm10 = vmor %vm2055_vm7, %vm2056_vm6 }
0x10f6   :  { %v2051_v23 = vmul.f32 %v5231_v19, %v2050_v18  ;;  %v2048_v25 = vsel %vm2047_vm5, %v5229_v56, %v2044_v20 }
0x10f7   :  { %v2059_v34 = vmul.f32 %v2048_v25, %v6151_v49 }
0x10f8   :  { %v2052_v28 = vmul.f32 0.5, %v2051_v23 }
0x10f9   :  { %v2064_v0 = vmul.f32 %v5131_v30, %v2059_v34 }
0x10fa   :  { %v2053_v29 = vsub.f32 1.5, %v2052_v28 }
0x10fb   :  { %v2069_v39 = vadd.f32 %v5132_v33, %v2064_v0 }
0x10fc   :  { %v2054_v31 = vmul.f32 %v5231_v19, %v2053_v29 }
0x10fe   :  { %v2058_v32 = vsel %vm2057_vm10, %v5231_v19, %v2054_v31 }
0x10ff   :  { %v2060_v47 = vmul.f32 %v2058_v32, %v6158_v1 }
0x1101   :  { %v2065_v37 = vmul.f32 %v5131_v30, %v2060_v47 }
0x1103   :  { %v2070_v43 = vadd.f32 %v5132_v33, %v2065_v37 }
0x1105   :  { %v2071_v41 = vpack.c.bf16 %v2070_v43, %v2069_v39 }
0x1107   :  { %4512 = vmatmul.msk.bf16.vlgmr.msra.gmra.mxu3 %vm65_vm0, %v2071_v41  ;;  %4553 = vmatmul.msk.bf16.vlgmr.msra.gmra.mxu0 %vm65_vm0, %v2071_v41 }
0x1117   :  { %4554 = vmatmul.msk.bf16.vlgmr.msrb.gmra.mxu3 %vm65_vm0, %v2071_v41 }
0x1184   :  { %v2180_v35 = vpop.f32.mrf.mxu0 }
0x1185   :  { %v2201_v53 = vpack.c.bf16 %v2180_v35, %v2180_v35 }
0x1187   :  { %v2397_v59 = vsel %vm409_vm9, %v2201_v53, 0  ;;  %v2346_v13 = vunpack.c.l.b16 %v2201_v53 }
0x1189   :  { %v2347_v20 = vpack.c.b16 %v2346_v13, %v2346_v13 }
0x118a   :  { %v2117_v49 = vpop.f32.mrf.mxu3 }
0x118b   :  { %v2199_v55 = vpack.c.bf16 %v2117_v49, %v2117_v49 }
0x118c   :  { %v2182_v46 = vpop.f32.mrf.mxu0 }
0x118d   :  { %v2204_v42 = vunpack.c.l.b16 %v2199_v55  ;;  %v2202_v22 = vpack.c.bf16 %v2182_v46, %v2182_v46 }
0x118f   :  { %v6236_v44 = vpack.c.b16 %v2204_v42, %v2204_v42  ;;  %v2416_v50 = vsel %vm409_vm9, %v2202_v22, 0  ;;  %v2370_v18 = vunpack.c.l.b16 %v2202_v22 }
0x1191   :  { %2275 = vrot.lane.b32.xlu1 %v6236_v44, %s5339_s25  ;;  %2277 = vrot.lane.b32.xlu0 %v6236_v44, %s6898_s26  ;;  %v2371_v23 = vpack.c.b16 %v2370_v18, %v2370_v18 }
0x1192   :  { %v2119_v1 = vpop.f32.mrf.mxu3 }
0x1193   :  { %v2200_v58 = vpack.c.bf16 %v2119_v1, %v2119_v1 }
0x1195   :  { %v2228_v16 = vunpack.c.l.b16 %v2200_v58 }
0x1197   :  { %v6242_v45 = vpack.c.b16 %v2228_v16, %v2228_v16 }
0x1199   :  { %2206 = vrot.lane.b32.xlu1 %v6236_v44, %s6896_s27  ;;  %2298 = vrot.lane.b32.xlu0 %v6242_v45, %s5339_s25 }
0x119a   :  { %2300 = vrot.lane.b32.xlu2 %v6242_v45, %s6898_s26  ;;  %v2194_v52 = vpop.f32.mrf.mxu3 }
0x119b   :  { %v6258_v61 = vpack.c.bf16 %v2194_v52, %v2194_v52 }
0x119d   :  { %v2507_v3 = vsel %vm409_vm9, %v6258_v61, 0 }
0x11a1   :  { %2230 = vrot.lane.b32.xlu1 %v6242_v45, %s6896_s27 }
0x11a2   :  { %v2196_v60 = vpop.f32.mrf.mxu3 }
0x11a3   :  { %v6256_v36 = vpack.c.bf16 %v2196_v60, %v2196_v60 }
0x11a5   :  { %v2526_v63 = vsel %vm409_vm9, %v6256_v36, 0 }
0x11f4   :  { %v2301_v38 = vpop.permute.xlu2 %2300 }
0x11f5   :  { %v2306_v21 = vsel %vm262_vm8, %v2301_v38, 0 }
0x11f6   :  { %2315 = vmatpush.bf16.xpose.msra.mxu3 %v2306_v21 }
0x11fe   :  { %2425 = vmatpush.bf16.msrb.mxu3 %v2416_v50 }
0x1203   :  { %v2276_v24 = vpop.permute.xlu1 %2275  ;;  %v2278_v54 = vpop.permute.xlu0 %2277 }
0x1204   :  { %v2283_v48 = vsel %vm262_vm8, %v2278_v54, 0 }
0x1205   :  { %2292 = vmatpush.bf16.xpose.msrb.mxu2 %v2283_v48 }
0x120b   :  { %v2207_v40 = vpop.permute.xlu1 %2206  ;;  %v2299_v62 = vpop.permute.xlu0 %2298 }
0x120c   :  { %v2212_v2 = vsel %vm262_vm8, %v2207_v40, 0  ;;  %4557 = vmatmul.msk.bf16.vlgmr.msrb.gmra.mxu2 %vm262_vm8, %v2276_v24  ;;  %4558 = vmatmul.msk.bf16.vlgmr.msra.gmra.mxu3 %vm262_vm8, %v2299_v62 }
0x120d   :  { %2406 = vmatpush.bf16.msra.mxu2 %v2397_v59  ;;  %2535 = vmatpush.bf16.msra.mxu3 %v2526_v63 }
0x120e   :  { %2221 = vmatpush.bf16.xpose.msrb.mxu0 %v2212_v2 }
0x1211   :  { %2516 = vmatpush.bf16.msrb.mxu2 %v2507_v3 }
0x1213   :  { %v2231_v4 = vpop.permute.xlu1 %2230 }
0x1214   :  { %v2236_v57 = vsel %vm262_vm8, %v2231_v4, 0 }
0x1215   :  { %4555 = vmatmul.msk.bf16.vlgmr.msrb.gmra.mxu0 %vm262_vm8, %v2199_v55  ;;  %2245 = vmatpush.bf16.xpose.msrb.mxu1 %v2236_v57 }
0x121c   :  { %4556 = vmatmul.msk.bf16.vlgmr.msrb.gmra.mxu1 %vm262_vm8, %v2200_v58 }
0x128f   :  { %v2294_v5 = vpop.f32.mrf.mxu2  ;;  %v2317_v7 = vpop.f32.mrf.mxu3 }
0x1290   :  { %v2295_v56 = vadd.f32 %v2294_v5, %v5572_v51  ;;  %v2318_v8 = vadd.f32 %v2317_v7, %v5572_v51 }
0x1292   :  { %v2223_v9 = vpop.f32.mrf.mxu0  ;;  %v2321_v11 = vsel %vm306_vm11, %v2295_v56, -inf  ;;  %v2324_v12 = vsel %vm306_vm11, %v2318_v8, -inf }
0x1293   :  { %2322 = vmax.xlane.f32.xlu0 %v2321_v11  ;;  %2325 = vmax.xlane.f32.xlu2 %v2324_v12  ;;  %v2224_v1 = vadd.f32 %v2223_v9, %v5572_v51 }
0x1295   :  { %v2251_v58 = vsel %vm306_vm11, %v2224_v1, -inf }
0x1297   :  { %v2296_v6 = vpop.f32.mrf.mxu2  ;;  %v2319_v14 = vpop.f32.mrf.mxu3 }
0x1299   :  { %v2247_v17 = vpop.f32.mrf.mxu1 }
0x129a   :  { %v2225_v15 = vpop.f32.mrf.mxu0  ;;  %v6287_v25 = vadd.f32 %v2247_v17, %v5572_v51 }
0x129c   :  { %v2254_v28 = vsel %vm306_vm11, %v6287_v25, -inf }
0x12a1   :  { %v2249_v19 = vpop.f32.mrf.mxu1 }
0x12a7   :  { %2348 = vrot.lane.b32.xlu0 %v2347_v20, %s6896_s27 }
0x12ab   :  { %2372 = vrot.lane.b32.xlu2 %v2371_v23, %s6896_s27 }
0x12af   :  { %2435 = vrot.lane.b32.xlu0 %v6236_v44, %s6904_s17 }
0x12b3   :  { %2433 = vrot.lane.b32.xlu2 %v6236_v44, %s6905_s18 }
0x12b7   :  { %2456 = vrot.lane.b32.xlu0 %v6242_v45, %s6905_s18 }
0x12bb   :  { %2545 = vrot.lane.b32.xlu2 %v6236_v44, %s6902_s30 }
0x12c3   :  { %2543 = vrot.lane.b32.xlu2 %v6236_v44, %s6903_s0 }
0x12ec   :  { %2255 = vmax.xlane.f32.xlu2 %v2254_v28 }
0x1306   :  { %v2323_v29 = vpop.xlane.xlu0 %2322  ;;  %v2326_v30 = vpop.xlane.xlu2 %2325 }
0x1307   :  { %v2327_v34 = vsub.f32 %v2295_v56, %v2323_v29  ;;  %v2328_v31 = vsub.f32 %v2318_v8, %v2326_v30 }
0x1309   :  { %v2329_v32 = vmul.f32 1.442695, %v2327_v34  ;;  %v2331_v33 = vmul.f32 1.442695, %v2328_v31 }
0x130b   :  { %5232 = vpow2.f32 %v2329_v32 }
0x130c   :  { %5234 = vpow2.f32 %v2331_v33 }
0x130e   :  { %v2373_v0 = vpop.permute.xlu2 %2372 }
0x130f   :  { %v2378_v47 = vsel %vm409_vm9, %v2373_v0, 0 }
0x1310   :  { %2387 = vmatpush.bf16.msra.mxu1 %v2378_v47 }
0x1311   :  { %v5233_v37 = vpop.eup %5232 }
0x1312   :  { %v5235_v39 = vpop.eup %5234  ;;  %v2333_v43 = vsel %vm306_vm11, %v5233_v37, 0.0 }
0x1313   :  { %2334 = vadd.xlane.f32.xlu1 %v2333_v43  ;;  %v2336_v41 = vsel %vm306_vm11, %v5235_v39, 0.0 }
0x1314   :  { %2337 = vadd.xlane.f32.xlu0 %v2336_v41 }
0x1316   :  { %v2434_v35 = vpop.permute.xlu2 %2433 }
0x1319   :  { %v2349_v49 = vpop.permute.xlu0 %2348 }
0x131a   :  { %v2354_v55 = vsel %vm409_vm9, %v2349_v49, 0 }
0x131b   :  { %2363 = vmatpush.bf16.msra.mxu0 %v2354_v55 }
0x131e   :  { %v2546_v52 = vpop.permute.xlu2 %2545 }
0x1321   :  { %v2436_v42 = vpop.permute.xlu0 %2435 }
0x1322   :  { %v2441_v44 = vsel %vm262_vm8, %v2436_v42, 0 }
0x1323   :  { %2450 = vmatpush.bf16.xpose.msrb.mxu0 %v2441_v44 }
0x1326   :  { %v2544_v62 = vpop.permute.xlu2 %2543 }
0x1328   :  { %2568 = vrot.lane.b32.xlu0 %v6242_v45, %s6902_s30 }
0x1329   :  { %v2457_v16 = vpop.permute.xlu0 %2456 }
0x132c   :  { %2458 = vrot.lane.b32.xlu1 %v6242_v45, %s6904_s17 }
0x1330   :  { %2566 = vrot.lane.b32.xlu0 %v6242_v45, %s6903_s0  ;;  %v2551_v45 = vsel %vm262_vm8, %v2546_v52, 0 }
0x1356   :  { %2252 = vmax.xlane.f32.xlu1 %v2251_v58 }
0x135f   :  { %v2256_v14 = vpop.xlane.xlu2 %2255 }
0x1360   :  { %v2258_v13 = vsub.f32 %v6287_v25, %v2256_v14 }
0x1362   :  { %v2261_v18 = vmul.f32 1.442695, %v2258_v13 }
0x1386   :  { %v2335_v46 = vpop.xlane.xlu1 %2334 }
0x1387   :  { %5236 = vrcp.f32 %v2335_v46  ;;  %v2338_v22 = vpop.xlane.xlu0 %2337 }
0x1388   :  { %5238 = vrcp.f32 %v2338_v22 }
0x138d   :  { %v5237_v38 = vpop.eup %5236 }
0x138e   :  { %v5239_v21 = vpop.eup %5238  ;;  %v2341_v50 = vmul.f32 %v5237_v38, %v5233_v37 }
0x138f   :  { %v2342_v53 = vmul.f32 %v5239_v21, %v5235_v39 }
0x1390   :  { %v2343_v24 = vpack.c.bf16 %v2341_v50, %v2341_v50 }
0x1391   :  { %v2344_v54 = vpack.c.bf16 %v2342_v53, %v2342_v53 }
0x1392   :  { %4559 = vmatmul.msk.bf16.vlgmr.msra.gmra.mxu0 %vm306_vm11, %v2343_v24 }
0x1393   :  { %4560 = vmatmul.msk.bf16.vlgmr.msra.gmra.mxu1 %vm306_vm11, %v2344_v54  ;;  %2560 = vmatpush.bf16.xpose.msra.mxu0 %v2551_v45 }
0x139a   :  { %v2569_v48 = vpop.permute.xlu0 %2568 }
0x139b   :  { %v2574_v40 = vsel %vm262_vm8, %v2569_v48, 0 }
0x139e   :  { %v2459_v59 = vpop.permute.xlu1 %2458 }
0x139f   :  { %v2464_v60 = vsel %vm262_vm8, %v2459_v59, 0 }
0x13a0   :  { %2473 = vmatpush.bf16.xpose.msrb.mxu1 %v2464_v60 }
0x13a2   :  { %4563 = vmatmul.msk.bf16.vlgmr.msrb.gmra.mxu0 %vm262_vm8, %v2434_v35  ;;  %v2567_v63 = vpop.permute.xlu0 %2566 }
0x13a7   :  { %4564 = vmatmul.msk.bf16.vlgmr.msrb.gmra.mxu1 %vm262_vm8, %v2457_v16 }
0x13a8   :  { %2583 = vmatpush.bf16.xpose.msra.mxu1 %v2574_v40 }
0x13b2   :  { %4567 = vmatmul.msk.bf16.vlgmr.msra.gmra.mxu0 %vm262_vm8, %v2544_v62 }
0x13b7   :  { %4568 = vmatmul.msk.bf16.vlgmr.msra.gmra.mxu1 %vm262_vm8, %v2567_v63 }
0x13c9   :  { %v2253_v5 = vpop.xlane.xlu1 %2252 }
0x13ca   :  { %v2257_v7 = vsub.f32 %v2224_v1, %v2253_v5  ;;  %v2638_v5 = vunpack.c.l.b16 %v6256_v36 }
0x13cc   :  { %v2259_v9 = vmul.f32 1.442695, %v2257_v7  ;;  %v2639_v7 = vpack.c.b16 %v2638_v5, %v2638_v5 }
0x13ce   :  { %5240 = vpow2.f32 %v2259_v9 }
0x13cf   :  { %5242 = vpow2.f32 %v2261_v18 }
0x13d4   :  { %v5241_v19 = vpop.eup %5240 }
0x13d5   :  { %v2263_v28 = vsel %vm306_vm11, %v5241_v19, 0.0  ;;  %v5243_v32 = vpop.eup %5242 }
0x13d6   :  { %v2266_v0 = vsel %vm306_vm11, %v5243_v32, 0.0 }
0x140f   :  { %v6313_v2 = vpop.f32.mrf.mxu0 }
0x1410   :  { %v6315_v3 = vpop.f32.mrf.mxu1 }
0x1417   :  { %v2367_v4 = vpop.f32.mrf.mxu0 }
0x1418   :  { %v2391_v57 = vpop.f32.mrf.mxu1  ;;  %v2614_v4 = vunpack.c.l.b16 %v6258_v61 }
0x141a   :  { %v2615_v57 = vpack.c.b16 %v2614_v4, %v2614_v4 }
0x141f   :  { %v2452_v56 = vpop.f32.mrf.mxu0 }
0x1420   :  { %v2453_v8 = vadd.f32 %v2452_v56, %v5572_v51 }
0x1422   :  { %v2479_v11 = vsel %vm306_vm11, %v2453_v8, -inf }
0x1423   :  { %2480 = vmax.xlane.f32.xlu0 %v2479_v11 }
0x1424   :  { %v2475_v12 = vpop.f32.mrf.mxu1 }
0x1425   :  { %v2476_v6 = vadd.f32 %v2475_v12, %v5572_v51 }
0x1427   :  { %v2454_v15 = vpop.f32.mrf.mxu0  ;;  %v2482_v17 = vsel %vm306_vm11, %v2476_v6, -inf }
0x1428   :  { %2483 = vmax.xlane.f32.xlu1 %v2482_v17 }
0x142c   :  { %v2477_v20 = vpop.f32.mrf.mxu1 }
0x142f   :  { %v2562_v23 = vpop.f32.mrf.mxu0 }
0x1430   :  { %v2563_v29 = vadd.f32 %v2562_v23, %v5572_v51  ;;  %2264 = vadd.xlane.f32.xlu1 %v2263_v28 }
0x1432   :  { %v2589_v30 = vsel %vm306_vm11, %v2563_v29, -inf }
0x1433   :  { %2590 = vmax.xlane.f32.xlu2 %v2589_v30 }
0x1434   :  { %v2585_v34 = vpop.f32.mrf.mxu1 }
0x1435   :  { %v2586_v31 = vadd.f32 %v2585_v34, %v5572_v51 }
0x1437   :  { %v2564_v33 = vpop.f32.mrf.mxu0  ;;  %v2592_v25 = vsel %vm306_vm11, %v2586_v31, -inf }
0x1438   :  { %2593 = vmax.xlane.f32.xlu0 %v2592_v25 }
0x143b   :  { %2267 = vadd.xlane.f32.xlu2 %v2266_v0 }
0x143c   :  { %v2587_v47 = vpop.f32.mrf.mxu1 }
0x1496   :  { %v2481_v37 = vpop.xlane.xlu0 %2480 }
0x1497   :  { %v2485_v39 = vsub.f32 %v2453_v8, %v2481_v37 }
0x1499   :  { %v2487_v43 = vmul.f32 1.442695, %v2485_v39 }
0x149b   :  { %5244 = vpow2.f32 %v2487_v43  ;;  %v2484_v41 = vpop.xlane.xlu1 %2483 }
0x149c   :  { %v2486_v49 = vsub.f32 %v2476_v6, %v2484_v41 }
0x149e   :  { %v2489_v55 = vmul.f32 1.442695, %v2486_v49 }
0x14a0   :  { %5246 = vpow2.f32 %v2489_v55 }
0x14a1   :  { %v5245_v42 = vpop.eup %5244 }
0x14a2   :  { %v2491_v44 = vsel %vm306_vm11, %v5245_v42, 0.0 }
0x14a3   :  { %v2265_v1 = vpop.xlane.xlu1 %2264  ;;  %2492 = vadd.xlane.f32.xlu0 %v2491_v44 }
0x14a4   :  { %5248 = vrcp.f32 %v2265_v1  ;;  %v5133_v1 = vld [vmem:[%s6875_s5 + $0x2] ss:$0 sm:$0xff] }
0x14a6   :  { %v5247_v58 = vpop.eup %5246  ;;  %v2591_v16 = vpop.xlane.xlu2 %2590 }
0x14a7   :  { %v2595_v35 = vsub.f32 %v2563_v29, %v2591_v16  ;;  %v2494_v46 = vsel %vm306_vm11, %v5247_v58, 0.0 }
0x14a8   :  { %2495 = vadd.xlane.f32.xlu1 %v2494_v46 }
0x14a9   :  { %v2597_v22 = vmul.f32 1.442695, %v2595_v35 }
0x14aa   :  { %v5249_v38 = vpop.eup %5248 }
0x14ab   :  { %v2271_v21 = vmul.f32 %v5249_v38, %v5241_v19  ;;  %5250 = vpow2.f32 %v2597_v22  ;;  %v2594_v50 = vpop.xlane.xlu0 %2593 }
0x14ac   :  { %v2596_v52 = vsub.f32 %v2586_v31, %v2594_v50 }
0x14ad   :  { %v2273_v53 = vpack.c.bf16 %v2271_v21, %v2271_v21 }
0x14ae   :  { %v2599_v24 = vmul.f32 1.442695, %v2596_v52  ;;  %v2268_v54 = vpop.xlane.xlu2 %2267 }
0x14af   :  { %5252 = vrcp.f32 %v2268_v54  ;;  %4561 = vmatmul.msk.bf16.vlgmr.msra.gmra.mxu2 %vm306_vm11, %v2273_v53 }
0x14b0   :  { %5254 = vpow2.f32 %v2599_v24 }
0x14b1   :  { %v5251_v45 = vpop.eup %5250 }
0x14b2   :  { %v2601_v48 = vsel %vm306_vm11, %v5251_v45, 0.0 }
0x14b3   :  { %2602 = vadd.xlane.f32.xlu2 %v2601_v48 }
0x14b5   :  { %v5253_v59 = vpop.eup %5252 }
0x14b6   :  { %v5255_v60 = vpop.eup %5254  ;;  %v2272_v40 = vmul.f32 %v5253_v59, %v5243_v32 }
0x14b7   :  { %v2604_v62 = vsel %vm306_vm11, %v5255_v60, 0.0 }
0x14b8   :  { %v2274_v63 = vpack.c.bf16 %v2272_v40, %v2272_v40  ;;  %2605 = vadd.xlane.f32.xlu0 %v2604_v62  ;;  %v4609_v40 = vld [vmem:[%s6878_s8 + $0xb0] sm:$0xf]  ;;  %v5050_v62 = vld [vmem:[%s6878_s8 + $0xb4] sm:$0xf0] }
0x14b9   :  { %v4610_v4 = vor.u32 %v5050_v62, %v4609_v40 }
0x14ba   :  { %4562 = vmatmul.msk.bf16.vlgmr.msrb.gmra.mxu3 %vm306_vm11, %v2274_v63  ;;  %v5049_v63 = vld [vmem:[%s6878_s8 + $0xb4] sm:$0xf] }
0x14bb   :  { %2794 = vmatpush.bf16.msrb.mxu0 %v4610_v4  ;;  %v5062_v4 = vld [vmem:[%s6880_s10 + $0x158] sm:$0xff] }
0x14c1   :  { %2616 = vrot.lane.b32.xlu1 %v2615_v57, %s6896_s27  ;;  %v4611_v57 = vld [vmem:[%s6878_s8 + $0xb8] sm:$0xf0] }
0x14c2   :  { %v4614_v5 = vor.u32 %v5049_v63, %v4611_v57  ;;  %v5061_v57 = vld [vmem:[%s6880_s10 + $0x150] sm:$0xff] }
0x14c4   :  { %2808 = vmatpush.bf16.msrb.mxu1 %v4614_v5  ;;  %v5052_v5 = vld [vmem:[%s6880_s10 + $0x108] sm:$0xff] }
0x14cb   :  { %2640 = vrot.lane.b32.xlu2 %v2639_v7, %s6896_s27  ;;  %v4601_v7 = vld [vmem:[%s6878_s8 + $0xa0] sm:$0xf] }
0x1516   :  { %v2493_v56 = vpop.xlane.xlu0 %2492 }
0x1517   :  { %5256 = vrcp.f32 %v2493_v56  ;;  %v5048_v56 = vld [vmem:[%s6878_s8 + $0xa4] sm:$0xf0] }
0x151b   :  { %v2496_v8 = vpop.xlane.xlu1 %2495 }
0x151c   :  { %5258 = vrcp.f32 %v2496_v8  ;;  %v5047_v8 = vld [vmem:[%s6878_s8 + $0xa4] sm:$0xf] }
0x151d   :  { %v5257_v9 = vpop.eup %5256 }
0x151e   :  { %v2499_v11 = vmul.f32 %v5257_v9, %v5245_v42  ;;  %v4602_v9 = vor.u32 %v5048_v56, %v4601_v7  ;;  %v5060_v7 = vld [vmem:[%s6880_s10 + $0x148] sm:$0xff]  ;;  %v5051_v56 = vld [vmem:[%s6880_s10 + $0x100] sm:$0xff] }
0x1520   :  { %v2501_v12 = vpack.c.bf16 %v2499_v11, %v2499_v11  ;;  %v4603_v11 = vld [vmem:[%s6878_s8 + $0xa8] sm:$0xf0]  ;;  %2795 = vmatpush.bf16.msrb.mxu0 %v4602_v9  ;;  %v4582_v9 = vld [vmem:[%s6879_s9 + $0x4] sm:$0x3] }
0x1522   :  { %v5259_v6 = vpop.eup %5258  ;;  %4565 = vmatmul.msk.bf16.vlgmr.msrb.gmra.mxu2 %vm306_vm11, %v2501_v12  ;;  %v4606_v12 = vor.u32 %v5047_v8, %v4603_v11  ;;  %v5059_v8 = vld [vmem:[%s6880_s10 + $0x140] sm:$0xff] }
0x1523   :  { %v2500_v14 = vmul.f32 %v5259_v6, %v5247_v58  ;;  %v4593_v6 = vld [vmem:[%s6878_s8 + $0x90] sm:$0xf] }
0x1524   :  { %2809 = vmatpush.bf16.msrb.mxu1 %v4606_v12 }
0x1525   :  { %v2502_v61 = vpack.c.bf16 %v2500_v14, %v2500_v14  ;;  %v5046_v14 = vld [vmem:[%s6878_s8 + $0x94] sm:$0xf0] }
0x1526   :  { %v2603_v15 = vpop.xlane.xlu2 %2602 }
0x1527   :  { %4566 = vmatmul.msk.bf16.vlgmr.msra.gmra.mxu3 %vm306_vm11, %v2502_v61  ;;  %5260 = vrcp.f32 %v2603_v15  ;;  %v5045_v61 = vld [vmem:[%s6878_s8 + $0x94] sm:$0xf]  ;;  %v4594_v15 = vor.u32 %v5046_v14, %v4593_v6  ;;  %v2743_v6 = vperm.slane %v4582_v9, 0  ;;  %v2744_v14 = vperm.slane %v4582_v9, 1  ;;  %v5075_v9 = vld [vmem:[%s6874_s4 + $0xe4] sm:$0xf] }
0x1529   :  { %2796 = vmatpush.bf16.msrb.mxu0 %v4594_v15 }
0x152b   :  { %v2606_v36 = vpop.xlane.xlu0 %2605 }
0x152c   :  { %5262 = vrcp.f32 %v2606_v36  ;;  %v4595_v36 = vld [vmem:[%s6878_s8 + $0x98] sm:$0xf0] }
0x152d   :  { %v5261_v13 = vpop.eup %5260 }
0x152e   :  { %v2641_v17 = vpop.permute.xlu2 %2640  ;;  %v2609_v18 = vmul.f32 %v5261_v13, %v5251_v45  ;;  %v4598_v13 = vor.u32 %v5045_v61, %v4595_v36 }
0x152f   :  { %v2646_v19 = vsel %vm409_vm9, %v2641_v17, 0 }
0x1530   :  { %2655 = vmatpush.bf16.msrb.mxu3 %v2646_v19  ;;  %v2611_v31 = vpack.c.bf16 %v2609_v18, %v2609_v18  ;;  %2810 = vmatpush.bf16.msrb.mxu1 %v4598_v13  ;;  %v5044_v18 = vld [vmem:[%s6878_s8 + $0x84] sm:$0xf0] }
0x1532   :  { %v5263_v20 = vpop.eup %5262  ;;  %v2408_v23 = vpop.f32.mrf.mxu2 }
0x1533   :  { %v2610_v28 = vmul.f32 %v5263_v20, %v5255_v60  ;;  %v2617_v29 = vpop.permute.xlu1 %2616  ;;  %v2409_v43 = vadd.f32 %v2408_v23, %v6313_v2  ;;  %v4585_v20 = vld [vmem:[%s6878_s8 + $0x80] sm:$0xf]  ;;  %v5043_v23 = vld [vmem:[%s6878_s8 + $0x84] sm:$0xf] }
0x1534   :  { %v2622_v30 = vsel %vm409_vm9, %v2617_v29, 0  ;;  %v4586_v29 = vor.u32 %v5044_v18, %v4585_v20 }
0x1535   :  { %v2612_v34 = vpack.c.bf16 %v2610_v28, %v2610_v28  ;;  %2631 = vmatpush.bf16.msra.mxu2 %v2622_v30  ;;  %v4587_v30 = vld [vmem:[%s6878_s8 + $0x88] sm:$0xf0] }
0x1536   :  { %2797 = vmatpush.bf16.msrb.mxu0 %v4586_v29 }
0x1537   :  { %4570 = vmatmul.msk.bf16.vlgmr.msrb.gmra.mxu3 %vm306_vm11, %v2612_v34  ;;  %v4590_v34 = vor.u32 %v5043_v23, %v4587_v30 }
0x1538   :  { %4569 = vmatmul.msk.bf16.vlgmr.msra.gmra.mxu2 %vm306_vm11, %v2611_v31  ;;  %v5058_v31 = vld [vmem:[%s6880_s10 + $0x138] sm:$0xff] }
0x1539   :  { %2811 = vmatpush.bf16.msrb.mxu1 %v4590_v34  ;;  %2958 = vmatpush.bf16.msrb.mxu2 %v5058_v31  ;;  %v5136_v34 = vld [vmem:[%s6881_s11 + $0x2] ss:$0 sm:$0xff] }
0x153a   :  { %v2410_v32 = vpop.f32.mrf.mxu2 }
0x153b   :  { %v5066_v32 = vld [vmem:[%s6880_s10 + $0x178] sm:$0xff] }
0x153c   :  { %2972 = vmatpush.bf16.msra.mxu3 %v5066_v32 }
0x153d   :  { %v2427_v33 = vpop.f32.mrf.mxu3 }
0x153e   :  { %v2428_v41 = vadd.f32 %v2427_v33, %v6315_v3 }
0x1545   :  { %v2429_v25 = vpop.f32.mrf.mxu3 }
0x15a5   :  { %v2518_v0 = vpop.f32.mrf.mxu2 }
0x15a6   :  { %v2541_v49 = vadd.f32 %v2518_v0, %v2409_v43  ;;  %v5057_v0 = vld [vmem:[%s6880_s10 + $0x130] sm:$0xff] }
0x15a7   :  { %2959 = vmatpush.bf16.msrb.mxu2 %v5057_v0 }
0x15aa   :  { %v2537_v47 = vpop.f32.mrf.mxu3 }
0x15ab   :  { %v2542_v44 = vadd.f32 %v2537_v47, %v2428_v41  ;;  %v5065_v47 = vld [vmem:[%s6880_s10 + $0x170] sm:$0xff]  ;;  %v5056_v41 = vld [vmem:[%s6880_s10 + $0x128] sm:$0xff] }
0x15ac   :  { %2973 = vmatpush.bf16.msra.mxu3 %v5065_v47  ;;  %2960 = vmatpush.bf16.msrb.mxu2 %v5056_v41 }
0x15ad   :  { %v2520_v37 = vpop.f32.mrf.mxu2 }
0x15b2   :  { %v2539_v39 = vpop.f32.mrf.mxu3 }
0x15ba   :  { %v2657_v55 = vpop.f32.mrf.mxu3 }
0x15bb   :  { %v2633_v42 = vpop.f32.mrf.mxu2  ;;  %v2662_v16 = vadd.f32 %v2657_v55, %v2542_v44  ;;  %v5055_v44 = vld [vmem:[%s6880_s10 + $0x120] sm:$0xff] }
0x15bc   :  { %v2661_v58 = vadd.f32 %v2633_v42, %v2541_v49  ;;  %v5064_v49 = vld [vmem:[%s6880_s10 + $0x168] sm:$0xff]  ;;  %2961 = vmatpush.bf16.msrb.mxu2 %v5055_v44 }
0x15bd   :  { %v2664_v22 = vadd.f32 %v2662_v16, %v6145_v27  ;;  %2974 = vmatpush.bf16.msra.mxu3 %v5064_v49 }
0x15be   :  { %v2663_v35 = vadd.f32 %v2661_v58, %v6140_v26 }
0x15bf   :  { %v6355_v21 = vadd.f32 %v5133_v1, %v2664_v22 }
0x15c0   :  { %v6350_v46 = vadd.f32 %v5133_v1, %v2663_v35  ;;  %v5063_v1 = vld [vmem:[%s6880_s10 + $0x160] sm:$0xff] }
0x15c1   :  { %v2679_v50 = vsel %vm65_vm0, %v6355_v21, 0.0  ;;  %2975 = vmatpush.bf16.msra.mxu3 %v5063_v1 }
0x15c2   :  { %v2659_v38 = vpop.f32.mrf.mxu3  ;;  %v2676_v2 = vsel %vm65_vm0, %v6350_v46, 0.0 }
0x15c3   :  { %2677 = vadd.xlane.f32.xlu0 %v2676_v2  ;;  %v2635_v3 = vpop.f32.mrf.mxu2 }
0x15c5   :  { %2976 = vmatpush.bf16.msra.mxu3 %v5062_v4  ;;  %v5072_v4 = vld [vmem:[%s6874_s4 + $0xc4] sm:$0xf0] }
0x15c9   :  { %2977 = vmatpush.bf16.msra.mxu3 %v5061_v57  ;;  %v5067_v57 = vld [vmem:[%s6873_s3 + $0x60] sm:$0xff] }
0x15cb   :  { %2680 = vadd.xlane.f32.xlu0 %v2679_v50 }
0x15cd   :  { %2978 = vmatpush.bf16.msra.mxu3 %v5060_v7  ;;  %v5077_v7 = vld [vmem:[%s6874_s4 + $0xf4] sm:$0xf] }
0x15d1   :  { %2979 = vmatpush.bf16.msra.mxu3 %v5059_v8 }
0x1636   :  { %v2678_v52 = vpop.xlane.xlu0 %2677 }
0x1637   :  { %v2682_v53 = vmul.f32 %v2678_v52, %v5449_v10  ;;  %v5134_v52 = vld [vmem:[%s6876_s6 + $0x2] ss:$0 sm:$0xff] }
0x1639   :  { %v6361_v26 = vsub.f32 %v6350_v46, %v2682_v53 }
0x163b   :  { %v2686_v27 = vmul.f32 %v6361_v26, %v6361_v26 }
0x163d   :  { %v2688_v24 = vsel %vm65_vm0, %v2686_v27, 0.0 }
0x163e   :  { %2689 = vadd.xlane.f32.xlu0 %v2688_v24  ;;  %v2681_v54 = vpop.xlane.xlu0 %2680 }
0x163f   :  { %v2683_v45 = vmul.f32 %v2681_v54, %v5449_v10  ;;  %v5135_v54 = vld [vmem:[%s6877_s7 + $0x2] ss:$0 sm:$0xff] }
0x1641   :  { %v6368_v48 = vsub.f32 %v6355_v21, %v2683_v45 }
0x1643   :  { %v2687_v59 = vmul.f32 %v6368_v48, %v6368_v48 }
0x1645   :  { %v2691_v60 = vsel %vm65_vm0, %v2687_v59, 0.0 }
0x1646   :  { %2692 = vadd.xlane.f32.xlu1 %v2691_v60 }
0x16b1   :  { %v2690_v17 = vpop.xlane.xlu0 %2689 }
0x16b2   :  { %v2694_v19 = vmul.f32 %v2690_v17, %v5449_v10 }
0x16b4   :  { %v2696_v28 = vadd.f32 1e-05, %v2694_v19 }
0x16b6   :  { %5264 = vrsqrt.f32 %v2696_v28  ;;  %vm2704_vm13 = vweird.f32 %v2696_v28 }
0x16b9   :  { %v2693_v33 = vpop.xlane.xlu1 %2692 }
0x16ba   :  { %v2695_v25 = vmul.f32 %v2693_v33, %v5449_v10 }
0x16bc   :  { %v5265_v37 = vpop.eup %5264  ;;  %v2697_v39 = vadd.f32 1e-05, %v2695_v25 }
0x16bd   :  { %v2699_v43 = vmul.f32 %v5265_v37, %v2696_v28  ;;  %vm2705_vm12 = vweird.f32 %v5265_v37 }
0x16be   :  { %5266 = vrsqrt.f32 %v2697_v39  ;;  %vm2706_vm14 = vmor %vm2704_vm13, %vm2705_vm12  ;;  %vm2714_vm1 = vweird.f32 %v2697_v39 }
0x16bf   :  { %v2700_v55 = vmul.f32 %v5265_v37, %v2699_v43 }
0x16c1   :  { %v2701_v42 = vmul.f32 0.5, %v2700_v55 }
0x16c3   :  { %v2702_v58 = vsub.f32 1.5, %v2701_v42 }
0x16c4   :  { %v5267_v16 = vpop.eup %5266 }
0x16c5   :  { %v2703_v35 = vmul.f32 %v5265_v37, %v2702_v58  ;;  %v2709_v22 = vmul.f32 %v5267_v16, %v2697_v39  ;;  %vm2715_vm15 = vweird.f32 %v5267_v16 }
0x16c6   :  { %vm2716_vm2 = vmor %vm2714_vm1, %vm2715_vm15 }
0x16c7   :  { %v2710_v38 = vmul.f32 %v5267_v16, %v2709_v22  ;;  %v2707_v2 = vsel %vm2706_vm14, %v5265_v37, %v2703_v35 }
0x16c8   :  { %v2718_v53 = vmul.f32 %v2707_v2, %v6361_v26  ;;  %v5054_v26 = vld [vmem:[%s6880_s10 + $0x118] sm:$0xff]  ;;  %v4775_v2 = vld [vmem:[%s6874_s4 + $0xf0] sm:$0xf] }
0x16c9   :  { %v2711_v3 = vmul.f32 0.5, %v2710_v38  ;;  %2962 = vmatpush.bf16.msrb.mxu2 %v5054_v26  ;;  %v4751_v26 = vld [vmem:[%s6874_s4 + $0xc0] sm:$0xf] }
0x16ca   :  { %v2723_v45 = vmul.f32 %v5134_v52, %v2718_v53  ;;  %v4767_v53 = vld [vmem:[%s6874_s4 + $0xe0] sm:$0xf] }
0x16cb   :  { %v2712_v50 = vsub.f32 1.5, %v2711_v3  ;;  %v5078_v3 = vld [vmem:[%s6874_s4 + $0xf4] sm:$0xf0] }
0x16cc   :  { %v2728_v40 = vadd.f32 %v5135_v54, %v2723_v45  ;;  %v4759_v45 = vld [vmem:[%s6874_s4 + $0xd0] sm:$0xf] }
0x16cd   :  { %v2713_v27 = vmul.f32 %v5267_v16, %v2712_v50  ;;  %v5070_v50 = vld [vmem:[%s6873_s3 + $0x78] sm:$0xff] }
0x16ce   :  { %3087 = vmatpush.bf16.msra.mxu0 %v5070_v50 }
0x16cf   :  { %v2717_v24 = vsel %vm2716_vm2, %v5267_v16, %v2713_v27  ;;  %v5076_v27 = vld [vmem:[%s6874_s4 + $0xe4] sm:$0xf0] }
0x16d0   :  { %v2719_v59 = vmul.f32 %v2717_v24, %v6368_v48  ;;  %v5053_v48 = vld [vmem:[%s6880_s10 + $0x110] sm:$0xff] }
0x16d1   :  { %2963 = vmatpush.bf16.msrb.mxu2 %v5053_v48  ;;  %v5069_v24 = vld [vmem:[%s6873_s3 + $0x70] sm:$0xff] }
0x16d2   :  { %v2724_v60 = vmul.f32 %v5134_v52, %v2719_v59  ;;  %v4776_v52 = vor.u32 %v5078_v3, %v4775_v2  ;;  %3088 = vmatpush.bf16.msra.mxu0 %v5069_v24  ;;  %v5074_v59 = vld [vmem:[%s6874_s4 + $0xd4] sm:$0xf0] }
0x16d4   :  { %v2729_v62 = vadd.f32 %v5135_v54, %v2724_v60  ;;  %3150 = vmatpush.bf16.msra.mxu1 %v4776_v52  ;;  %v4768_v54 = vor.u32 %v5076_v27, %v4767_v53  ;;  %v5068_v60 = vld [vmem:[%s6873_s3 + $0x68] sm:$0xff] }
0x16d5   :  { %2964 = vmatpush.bf16.msrb.mxu2 %v5052_v5  ;;  %v4752_v5 = vor.u32 %v5072_v4, %v4751_v26 }
0x16d6   :  { %v2730_v63 = vpack.c.bf16 %v2729_v62, %v2728_v40  ;;  %v4760_v40 = vor.u32 %v5074_v59, %v4759_v45  ;;  %3089 = vmatpush.bf16.msra.mxu0 %v5068_v60 }
0x16d8   :  { %4615 = vmatmul.msk.bf16.vlgmr.msrb.gmra.mxu0 %vm65_vm0, %v2730_v63  ;;  %4616 = vmatmul.msk.bf16.vlgmr.msrb.gmra.mxu1 %vm65_vm0, %v2730_v63 }
0x16d9   :  { %2965 = vmatpush.bf16.msrb.mxu2 %v5051_v56  ;;  %3151 = vmatpush.bf16.msra.mxu1 %v4768_v54  ;;  %v4777_v56 = vld [vmem:[%s6874_s4 + $0xf8] sm:$0xf0] }
0x16da   :  { %3090 = vmatpush.bf16.msra.mxu0 %v5067_v57  ;;  %v4780_v8 = vor.u32 %v5077_v7, %v4777_v56 }
0x16dd   :  { %3152 = vmatpush.bf16.msra.mxu1 %v4760_v40 }
0x16de   :  { %3164 = vmatpush.bf16.msrb.mxu0 %v4780_v8 }
0x16e1   :  { %3153 = vmatpush.bf16.msra.mxu1 %v4752_v5 }
0x1755   :  { %v2799_v11 = vpop.f32.mrf.mxu0  ;;  %v2813_v12 = vpop.f32.mrf.mxu1 }
0x1756   :  { %v2800_v61 = vadd.f32 %v2799_v11, %v2743_v6  ;;  %v2814_v15 = vadd.f32 %v2813_v12, %v2744_v14  ;;  %v4769_v11 = vld [vmem:[%s6874_s4 + $0xe8] sm:$0xf0] }
0x1758   :  { %v2818_v20 = vmax.f32 %v2800_v61, 0.0  ;;  %v2819_v18 = vmax.f32 %v2814_v15, 0.0  ;;  %v5073_v61 = vld [vmem:[%s6874_s4 + $0xd4] sm:$0xf]  ;;  %v4761_v15 = vld [vmem:[%s6874_s4 + $0xd8] sm:$0xf0] }
0x175d   :  { %v2801_v36 = vpop.f32.mrf.mxu0  ;;  %v2815_v17 = vpop.f32.mrf.mxu1 }
0x175e   :  { %v2802_v13 = vadd.f32 %v2801_v36, %v2743_v6  ;;  %v2816_v19 = vadd.f32 %v2815_v17, %v2744_v14  ;;  %v4772_v14 = vor.u32 %v5075_v9, %v4769_v11 }
0x1760   :  { %v2820_v23 = vmax.f32 %v2802_v13, 0.0  ;;  %v2821_v28 = vmax.f32 %v2816_v19, 0.0  ;;  %3165 = vmatpush.bf16.msrb.mxu0 %v4772_v14  ;;  %v4764_v19 = vor.u32 %v5073_v61, %v4761_v15 }
0x1762   :  { %v2822_v29 = vpack.c.bf16 %v2820_v23, %v2818_v20  ;;  %v2823_v30 = vpack.c.bf16 %v2821_v28, %v2819_v18  ;;  %v5071_v18 = vld [vmem:[%s6874_s4 + $0xc4] sm:$0xf]  ;;  %v4753_v23 = vld [vmem:[%s6874_s4 + $0xc8] sm:$0xf0] }
0x1764   :  { %2966 = vmatmul.bf16.vlgmr.msrb.gmra.mxu2 %v2822_v29  ;;  %2980 = vmatmul.bf16.vlgmr.msra.gmra.mxu3 %v2823_v30  ;;  %v4756_v29 = vor.u32 %v5071_v18, %v4753_v23 }
0x1765   :  { %3166 = vmatpush.bf16.msrb.mxu0 %v4764_v19 }
0x1769   :  { %3167 = vmatpush.bf16.msrb.mxu0 %v4756_v29 }
0x17e7   :  { %v2967_v31 = vpop.f32.mrf.mxu2  ;;  %v2981_v32 = vpop.f32.mrf.mxu3 }
0x17e8   :  { %v2968_v33 = vadd.f32 %v5136_v34, %v2967_v31 }
0x17ea   :  { %v2982_v25 = vadd.f32 %v2981_v32, %v2968_v33 }
0x17ec   :  { %v6488_v0 = vadd.f32 %v2982_v25, %v6350_v46 }
0x17ee   :  { %v2992_v47 = vsel %vm65_vm0, %v6488_v0, 0.0 }
0x17ef   :  { %v2969_v37 = vpop.f32.mrf.mxu2  ;;  %2993 = vadd.xlane.f32.xlu2 %v2992_v47  ;;  %v2983_v43 = vpop.f32.mrf.mxu3 }
0x17f0   :  { %v2970_v39 = vadd.f32 %v5136_v34, %v2969_v37 }
0x17f2   :  { %v2984_v41 = vadd.f32 %v2983_v43, %v2970_v39  ;;  %v5137_v39 = vld [vmem:[%s6871_s1 + $0x3] ss:$0 sm:$0xff]  ;;  %s6906_s1 = smov 48  }
0x17f4   :  { %v6493_v49 = vadd.f32 %v2984_v41, %v6355_v21 }
0x17f6   :  { %v2995_v55 = vsel %vm65_vm0, %v6493_v49, 0.0 }
0x17f7   :  { %2996 = vadd.xlane.f32.xlu0 %v2995_v55 }
0x1862   :  { %v2994_v42 = vpop.xlane.xlu2 %2993 }
0x1863   :  { %v2998_v44 = vmul.f32 %v2994_v42, %v5449_v10  ;;  %v5138_v42 = vld [vmem:[%s6872_s2 + $0x3] ss:$0 sm:$0xff]  ;;  %s6907_s2 = smov 64  }
0x1865   :  { %v6499_v46 = vsub.f32 %v6488_v0, %v2998_v44 }
0x1867   :  { %v3002_v1 = vmul.f32 %v6499_v46, %v6499_v46 }
0x1869   :  { %v3004_v58 = vsel %vm65_vm0, %v3002_v1, 0.0 }
0x186a   :  { %v2997_v16 = vpop.xlane.xlu0 %2996  ;;  %3005 = vadd.xlane.f32.xlu0 %v3004_v58 }
0x186b   :  { %v2999_v21 = vmul.f32 %v2997_v16, %v5449_v10 }
0x186d   :  { %v6506_v35 = vsub.f32 %v6493_v49, %v2999_v21 }
0x186f   :  { %v3003_v22 = vmul.f32 %v6506_v35, %v6506_v35 }
0x1871   :  { %v3007_v38 = vsel %vm65_vm0, %v3003_v22, 0.0 }
0x1872   :  { %3008 = vadd.xlane.f32.xlu0 %v3007_v38 }
0x18dd   :  { %v3006_v62 = vpop.xlane.xlu0 %3005 }
0x18de   :  { %v3010_v63 = vmul.f32 %v3006_v62, %v5449_v10 }
0x18e0   :  { %v3012_v48 = vadd.f32 1e-05, %v3010_v63 }
0x18e2   :  { %5268 = vrsqrt.f32 %v3012_v48  ;;  %vm3020_vm4 = vweird.f32 %v3012_v48 }
0x18e5   :  { %v3009_v12 = vpop.xlane.xlu0 %3008 }
0x18e6   :  { %v3011_v6 = vmul.f32 %v3009_v12, %v5449_v10 }
0x18e8   :  { %v5269_v36 = vpop.eup %5268  ;;  %v3013_v17 = vadd.f32 1e-05, %v3011_v6 }
0x18e9   :  { %v3015_v13 = vmul.f32 %v5269_v36, %v3012_v48  ;;  %vm3021_vm3 = vweird.f32 %v5269_v36 }
0x18ea   :  { %5270 = vrsqrt.f32 %v3013_v17  ;;  %vm3022_vm5 = vmor %vm3020_vm4, %vm3021_vm3  ;;  %vm3030_vm7 = vweird.f32 %v3013_v17 }
0x18eb   :  { %v3016_v20 = vmul.f32 %v5269_v36, %v3015_v13 }
0x18ed   :  { %v3017_v28 = vmul.f32 0.5, %v3016_v20 }
0x18ef   :  { %v3018_v30 = vsub.f32 1.5, %v3017_v28 }
0x18f0   :  { %v5271_v34 = vpop.eup %5270 }
0x18f1   :  { %v3019_v31 = vmul.f32 %v5269_v36, %v3018_v30  ;;  %v3025_v32 = vmul.f32 %v5271_v34, %v3013_v17  ;;  %vm3031_vm6 = vweird.f32 %v5271_v34 }
0x18f2   :  { %vm3032_vm10 = vmor %vm3030_vm7, %vm3031_vm6 }
0x18f3   :  { %v3026_v33 = vmul.f32 %v5271_v34, %v3025_v32  ;;  %v3023_v25 = vsel %vm3022_vm5, %v5269_v36, %v3019_v31 }
0x18f4   :  { %v3034_v43 = vmul.f32 %v3023_v25, %v6499_v46 }
0x18f5   :  { %v3027_v47 = vmul.f32 0.5, %v3026_v33 }
0x18f6   :  { %v3039_v44 = vmul.f32 %v5137_v39, %v3034_v43 }
0x18f7   :  { %v3028_v37 = vsub.f32 1.5, %v3027_v47 }
0x18f8   :  { %v3044_v16 = vadd.f32 %v5138_v42, %v3039_v44 }
0x18f9   :  { %v3029_v41 = vmul.f32 %v5271_v34, %v3028_v37 }
0x18fb   :  { %v3033_v55 = vsel %vm3032_vm10, %v5271_v34, %v3029_v41 }
0x18fc   :  { %v3035_v1 = vmul.f32 %v3033_v55, %v6506_v35 }
0x18fe   :  { %v3040_v58 = vmul.f32 %v5137_v39, %v3035_v1 }
0x1900   :  { %v3045_v21 = vadd.f32 %v5138_v42, %v3040_v58 }
0x1902   :  { %v3046_v22 = vpack.c.bf16 %v3045_v21, %v3044_v16 }
0x1904   :  { %4740 = vmatmul.msk.bf16.vlgmr.msra.gmra.mxu0 %vm65_vm0, %v3046_v22  ;;  %4781 = vmatmul.msk.bf16.vlgmr.msra.gmra.mxu1 %vm65_vm0, %v3046_v22 }
0x1914   :  { %4782 = vmatmul.msk.bf16.vlgmr.msrb.gmra.mxu0 %vm65_vm0, %v3046_v22 }
0x1981   :  { %v3092_v46 = vpop.f32.mrf.mxu0  ;;  %v3155_v60 = vpop.f32.mrf.mxu1 }
0x1982   :  { %v3174_v38 = vpack.c.bf16 %v3092_v46, %v3092_v46  ;;  %v3176_v40 = vpack.c.bf16 %v3155_v60, %v3155_v60 }
0x1984   :  { %v3179_v2 = vunpack.c.l.b16 %v3174_v38  ;;  %v3372_v4 = vsel %vm409_vm9, %v3176_v40, 0  ;;  %v3321_v34 = vunpack.c.l.b16 %v3176_v40 }
0x1986   :  { %v6584_v3 = vpack.c.b16 %v3179_v2, %v3179_v2  ;;  %v3322_v31 = vpack.c.b16 %v3321_v34, %v3321_v34 }
0x1988   :  { %3250 = vrot.lane.b32.xlu2 %v6584_v3, %s5339_s25  ;;  %3252 = vrot.lane.b32.xlu0 %v6584_v3, %s6906_s1 }
0x1989   :  { %v3094_v35 = vpop.f32.mrf.mxu0  ;;  %v3157_v48 = vpop.f32.mrf.mxu1 }
0x198a   :  { %v3175_v50 = vpack.c.bf16 %v3094_v35, %v3094_v35  ;;  %v3177_v5 = vpack.c.bf16 %v3157_v48, %v3157_v48 }
0x198c   :  { %v3203_v52 = vunpack.c.l.b16 %v3175_v50  ;;  %v3391_v9 = vsel %vm409_vm9, %v3177_v5, 0  ;;  %v3345_v32 = vunpack.c.l.b16 %v3177_v5 }
0x198e   :  { %v6590_v53 = vpack.c.b16 %v3203_v52, %v3203_v52  ;;  %v3346_v33 = vpack.c.b16 %v3345_v32, %v3345_v32 }
0x1990   :  { %3181 = vrot.lane.b32.xlu2 %v6584_v3, %s6907_s2  ;;  %3273 = vrot.lane.b32.xlu0 %v6590_v53, %s5339_s25  ;;  %s5348_s25 = smov 128  }
0x1991   :  { %3275 = vrot.lane.b32.xlu1 %v6590_v53, %s6906_s1  ;;  %v3169_v63 = vpop.f32.mrf.mxu0 }
0x1992   :  { %v6606_v57 = vpack.c.bf16 %v3169_v63, %v3169_v63 }
0x1994   :  { %v3482_v7 = vsel %vm409_vm9, %v6606_v57, 0 }
0x1998   :  { %3205 = vrot.lane.b32.xlu2 %v6590_v53, %s6907_s2 }
0x1999   :  { %v3171_v11 = vpop.f32.mrf.mxu0 }
0x199a   :  { %v6613_v12 = vpack.c.bf16 %v3171_v11, %v3171_v11 }
0x199c   :  { %v3501_v14 = vsel %vm409_vm9, %v6613_v12, 0 }
0x19e2   :  { %v3251_v27 = vpop.permute.xlu2 %3250 }
0x19ea   :  { %v3182_v24 = vpop.permute.xlu2 %3181 }
0x19eb   :  { %v3187_v54 = vsel %vm262_vm8, %v3182_v24, 0 }
0x19ec   :  { %3196 = vmatpush.bf16.xpose.msrb.mxu1 %v3187_v54 }
0x19f2   :  { %v3206_v45 = vpop.permute.xlu2 %3205 }
0x19f3   :  { %v3211_v59 = vsel %vm262_vm8, %v3206_v45, 0  ;;  %4783 = vmatmul.msk.bf16.vlgmr.msrb.gmra.mxu1 %vm262_vm8, %v3174_v38 }
0x19f4   :  { %3220 = vmatpush.bf16.xpose.msra.mxu2 %v3211_v59 }
0x19fa   :  { %v3253_v62 = vpop.permute.xlu0 %3252 }
0x19fb   :  { %v3258_v26 = vsel %vm262_vm8, %v3253_v62, 0  ;;  %4784 = vmatmul.msk.bf16.vlgmr.msra.gmra.mxu2 %vm262_vm8, %v3175_v50 }
0x19fc   :  { %3267 = vmatpush.bf16.xpose.msrb.mxu3 %v3258_v26 }
0x1a02   :  { %v3274_v6 = vpop.permute.xlu0 %3273 }
0x1a03   :  { %v3276_v56 = vpop.permute.xlu1 %3275  ;;  %4785 = vmatmul.msk.bf16.vlgmr.msrb.gmra.mxu3 %vm262_vm8, %v3251_v27 }
0x1a04   :  { %3381 = vmatpush.bf16.msra.mxu3 %v3372_v4  ;;  %v3281_v8 = vsel %vm262_vm8, %v3276_v56, 0 }
0x1a05   :  { %3290 = vmatpush.bf16.xpose.msra.mxu0 %v3281_v8 }
0x1a08   :  { %3491 = vmatpush.bf16.msrb.mxu3 %v3482_v7 }
0x1a0c   :  { %4786 = vmatmul.msk.bf16.vlgmr.msra.gmra.mxu0 %vm262_vm8, %v3274_v6 }
0x1a0d   :  { %3400 = vmatpush.bf16.msrb.mxu0 %v3391_v9 }
0x1a11   :  { %3510 = vmatpush.bf16.msra.mxu0 %v3501_v14 }
0x1a70   :  { %v3198_v61 = vpop.f32.mrf.mxu1 }
0x1a71   :  { %v6633_v25 = vadd.f32 %v3198_v61, %v5572_v51 }
0x1a73   :  { %v3226_v47 = vsel %vm306_vm11, %v6633_v25, -inf }
0x1a78   :  { %v3200_v15 = vpop.f32.mrf.mxu1 }
0x1a7e   :  { %v3222_v36 = vpop.f32.mrf.mxu2 }
0x1a7f   :  { %v3223_v50 = vadd.f32 %v3222_v36, %v5572_v51 }
0x1a81   :  { %v3229_v52 = vsel %vm306_vm11, %v3223_v50, -inf }
0x1a86   :  { %v3224_v17 = vpop.f32.mrf.mxu2  ;;  %v3269_v13 = vpop.f32.mrf.mxu3 }
0x1a87   :  { %v3270_v19 = vadd.f32 %v3269_v13, %v5572_v51 }
0x1a89   :  { %v3292_v20 = vpop.f32.mrf.mxu0  ;;  %v3296_v18 = vsel %vm306_vm11, %v3270_v19, -inf }
0x1a8a   :  { %v3293_v23 = vadd.f32 %v3292_v20, %v5572_v51  ;;  %3297 = vmax.xlane.f32.xlu0 %v3296_v18 }
0x1a8c   :  { %v3299_v28 = vsel %vm306_vm11, %v3293_v23, -inf }
0x1a8d   :  { %3300 = vmax.xlane.f32.xlu1 %v3299_v28 }
0x1a8e   :  { %v3271_v29 = vpop.f32.mrf.mxu3 }
0x1a91   :  { %v3294_v30 = vpop.f32.mrf.mxu0 }
0x1a9e   :  { %3323 = vrot.lane.b32.xlu0 %v3322_v31, %s6907_s2 }
0x1aa6   :  { %3347 = vrot.lane.b32.xlu1 %v3346_v33, %s6907_s2  ;;  %3433 = vrot.lane.b32.xlu0 %v6590_v53, %s6904_s17 }
0x1aae   :  { %3431 = vrot.lane.b32.xlu1 %v6590_v53, %s6905_s18  ;;  %3408 = vrot.lane.b32.xlu0 %v6584_v3, %s6905_s18 }
0x1ab6   :  { %3543 = vrot.lane.b32.xlu1 %v6590_v53, %s6902_s30 }
0x1ae0   :  { %3227 = vmax.xlane.f32.xlu1 %v3226_v47 }
0x1afd   :  { %v3298_v37 = vpop.xlane.xlu0 %3297 }
0x1afe   :  { %v3302_v39 = vsub.f32 %v3270_v19, %v3298_v37 }
0x1b00   :  { %v3304_v43 = vmul.f32 1.442695, %v3302_v39  ;;  %v3301_v41 = vpop.xlane.xlu1 %3300 }
0x1b01   :  { %v3303_v55 = vsub.f32 %v3293_v23, %v3301_v41 }
0x1b02   :  { %5272 = vpow2.f32 %v3304_v43 }
0x1b03   :  { %v3306_v42 = vmul.f32 1.442695, %v3303_v55 }
0x1b05   :  { %5274 = vpow2.f32 %v3306_v42 }
0x1b08   :  { %v5273_v44 = vpop.eup %5272 }
0x1b09   :  { %v3308_v1 = vsel %vm306_vm11, %v5273_v44, 0.0 }
0x1b0a   :  { %3309 = vadd.xlane.f32.xlu2 %v3308_v1 }
0x1b0b   :  { %v5275_v58 = vpop.eup %5274 }
0x1b0c   :  { %v3311_v16 = vsel %vm306_vm11, %v5275_v58, 0.0 }
0x1b0d   :  { %3312 = vadd.xlane.f32.xlu0 %v3311_v16 }
0x1b10   :  { %v3324_v21 = vpop.permute.xlu0 %3323 }
0x1b11   :  { %v3329_v22 = vsel %vm409_vm9, %v3324_v21, 0 }
0x1b12   :  { %3338 = vmatpush.bf16.msra.mxu1 %v3329_v22 }
0x1b18   :  { %v3348_v46 = vpop.permute.xlu1 %3347  ;;  %v3434_v38 = vpop.permute.xlu0 %3433 }
0x1b19   :  { %v3353_v2 = vsel %vm409_vm9, %v3348_v46, 0  ;;  %v3439_v35 = vsel %vm262_vm8, %v3434_v38, 0 }
0x1b1a   :  { %3362 = vmatpush.bf16.msrb.mxu2 %v3353_v2 }
0x1b1e   :  { %3448 = vmatpush.bf16.xpose.msra.mxu2 %v3439_v35 }
0x1b20   :  { %v3409_v27 = vpop.permute.xlu0 %3408  ;;  %v3432_v54 = vpop.permute.xlu1 %3431 }
0x1b21   :  { %3520 = vrot.lane.b32.xlu0 %v6584_v3, %s6902_s30  ;;  %s5349_s30 = smov 8  }
0x1b22   :  { %3410 = vrot.lane.b32.xlu2 %v6584_v3, %s6904_s17 }
0x1b28   :  { %v3544_v26 = vpop.permute.xlu1 %3543 }
0x1b29   :  { %3541 = vrot.lane.b32.xlu0 %v6590_v53, %s6903_s0  ;;  %v3549_v48 = vsel %vm262_vm8, %v3544_v26, 0 }
0x1b2a   :  { %3518 = vrot.lane.b32.xlu2 %v6584_v3, %s6903_s0 }
0x1b53   :  { %3230 = vmax.xlane.f32.xlu2 %v3229_v52  ;;  %v3228_v14 = vpop.xlane.xlu1 %3227 }
0x1b54   :  { %v3232_v17 = vsub.f32 %v6633_v25, %v3228_v14  ;;  %v3613_v14 = vunpack.c.l.b16 %v6613_v12 }
0x1b56   :  { %v3234_v19 = vmul.f32 1.442695, %v3232_v17 }
0x1b7d   :  { %v3310_v24 = vpop.xlane.xlu2 %3309 }
0x1b7e   :  { %5276 = vrcp.f32 %v3310_v24 }
0x1b80   :  { %v3313_v45 = vpop.xlane.xlu0 %3312 }
0x1b81   :  { %5278 = vrcp.f32 %v3313_v45 }
0x1b82   :  { %5280 = vpow2.f32 %v3234_v19 }
0x1b84   :  { %v5277_v59 = vpop.eup %5276 }
0x1b85   :  { %v3316_v60 = vmul.f32 %v5277_v59, %v5273_v44  ;;  %v3411_v40 = vpop.permute.xlu2 %3410 }
0x1b86   :  { %v3416_v62 = vsel %vm262_vm8, %v3411_v40, 0 }
0x1b87   :  { %v5279_v53 = vpop.eup %5278  ;;  %v3318_v63 = vpack.c.bf16 %v3316_v60, %v3316_v60  ;;  %3425 = vmatpush.bf16.xpose.msrb.mxu1 %v3416_v62 }
0x1b88   :  { %v3317_v3 = vmul.f32 %v5279_v53, %v5275_v58  ;;  %v5281_v32 = vpop.eup %5280 }
0x1b89   :  { %4787 = vmatmul.msk.bf16.vlgmr.msra.gmra.mxu1 %vm306_vm11, %v3318_v63  ;;  %v3238_v37 = vsel %vm306_vm11, %v5281_v32, 0.0 }
0x1b8a   :  { %v3319_v4 = vpack.c.bf16 %v3317_v3, %v3317_v3 }
0x1b8c   :  { %4788 = vmatmul.msk.bf16.vlgmr.msrb.gmra.mxu2 %vm306_vm11, %v3319_v4 }
0x1b8d   :  { %3558 = vmatpush.bf16.xpose.msrb.mxu2 %v3549_v48  ;;  %v3519_v56 = vpop.permute.xlu2 %3518 }
0x1b93   :  { %v3521_v5 = vpop.permute.xlu0 %3520 }
0x1b94   :  { %v3526_v7 = vsel %vm262_vm8, %v3521_v5, 0 }
0x1b95   :  { %3535 = vmatpush.bf16.xpose.msra.mxu1 %v3526_v7 }
0x1b99   :  { %4791 = vmatmul.msk.bf16.vlgmr.msrb.gmra.mxu1 %vm262_vm8, %v3409_v27 }
0x1b9b   :  { %v3542_v8 = vpop.permute.xlu0 %3541 }
0x1b9c   :  { %4792 = vmatmul.msk.bf16.vlgmr.msra.gmra.mxu2 %vm262_vm8, %v3432_v54 }
0x1ba9   :  { %4795 = vmatmul.msk.bf16.vlgmr.msra.gmra.mxu1 %vm262_vm8, %v3519_v56 }
0x1bac   :  { %4796 = vmatmul.msk.bf16.vlgmr.msrb.gmra.mxu2 %vm262_vm8, %v3542_v8  ;;  %v3589_v8 = vunpack.c.l.b16 %v6606_v57 }
0x1bc6   :  { %v3231_v20 = vpop.xlane.xlu2 %3230 }
0x1bc7   :  { %v3233_v28 = vsub.f32 %v3223_v50, %v3231_v20 }
0x1bc9   :  { %v3236_v34 = vmul.f32 1.442695, %v3233_v28 }
0x1bcb   :  { %5282 = vpow2.f32 %v3236_v34 }
0x1bd1   :  { %v5283_v39 = vpop.eup %5282 }
0x1bd2   :  { %v3241_v42 = vsel %vm306_vm11, %v5283_v39, 0.0 }
0x1c06   :  { %v6661_v9 = vpop.f32.mrf.mxu1 }
0x1c0e   :  { %v3342_v11 = vpop.f32.mrf.mxu1 }
0x1c0f   :  { %v6663_v6 = vpop.f32.mrf.mxu2  ;;  %v3590_v11 = vpack.c.b16 %v3589_v8, %v3589_v8  ;;  %v4839_v8 = vld [vmem:[%s6878_s8 + $0xf8] sm:$0xf0] }
0x1c16   :  { %v3427_v61 = vpop.f32.mrf.mxu1 }
0x1c17   :  { %v3366_v15 = vpop.f32.mrf.mxu2  ;;  %v3428_v36 = vadd.f32 %v3427_v61, %v5572_v51  ;;  %v3614_v61 = vpack.c.b16 %v3613_v14, %v3613_v14  ;;  %v4829_v14 = vld [vmem:[%s6878_s8 + $0xe0] sm:$0xf] }
0x1c19   :  { %v3454_v13 = vsel %vm306_vm11, %v3428_v36, -inf }
0x1c1a   :  { %3455 = vmax.xlane.f32.xlu0 %v3454_v13 }
0x1c1e   :  { %v3429_v18 = vpop.f32.mrf.mxu1 }
0x1c1f   :  { %v3450_v23 = vpop.f32.mrf.mxu2 }
0x1c20   :  { %v3451_v29 = vadd.f32 %v3450_v23, %v5572_v51 }
0x1c22   :  { %v3457_v30 = vsel %vm306_vm11, %v3451_v29, -inf }
0x1c23   :  { %3458 = vmax.xlane.f32.xlu1 %v3457_v30 }
0x1c26   :  { %v3537_v31 = vpop.f32.mrf.mxu1 }
0x1c27   :  { %v3452_v33 = vpop.f32.mrf.mxu2  ;;  %v3538_v25 = vadd.f32 %v3537_v31, %v5572_v51 }
0x1c29   :  { %v3564_v47 = vsel %vm306_vm11, %v3538_v25, -inf }
0x1c2a   :  { %3565 = vmax.xlane.f32.xlu2 %v3564_v47 }
0x1c2b   :  { %3239 = vadd.xlane.f32.xlu1 %v3238_v37 }
0x1c2e   :  { %v3539_v43 = vpop.f32.mrf.mxu1 }
0x1c2f   :  { %v3560_v41 = vpop.f32.mrf.mxu2 }
0x1c30   :  { %v3561_v55 = vadd.f32 %v3560_v41, %v5572_v51 }
0x1c32   :  { %3242 = vadd.xlane.f32.xlu2 %v3241_v42  ;;  %v3567_v44 = vsel %vm306_vm11, %v3561_v55, -inf }
0x1c33   :  { %3568 = vmax.xlane.f32.xlu0 %v3567_v44 }
0x1c37   :  { %v3562_v1 = vpop.f32.mrf.mxu2 }
0x1c8d   :  { %v3456_v58 = vpop.xlane.xlu0 %3455 }
0x1c8e   :  { %v3460_v16 = vsub.f32 %v3428_v36, %v3456_v58 }
0x1c90   :  { %v3462_v21 = vmul.f32 1.442695, %v3460_v16 }
0x1c92   :  { %5284 = vpow2.f32 %v3462_v21 }
0x1c96   :  { %v3459_v22 = vpop.xlane.xlu1 %3458 }
0x1c97   :  { %v3461_v46 = vsub.f32 %v3451_v29, %v3459_v22 }
0x1c98   :  { %v5285_v38 = vpop.eup %5284 }
0x1c99   :  { %v3464_v2 = vmul.f32 1.442695, %v3461_v46  ;;  %v3466_v35 = vsel %vm306_vm11, %v5285_v38, 0.0 }
0x1c9a   :  { %3467 = vadd.xlane.f32.xlu0 %v3466_v35 }
0x1c9b   :  { %5286 = vpow2.f32 %v3464_v2 }
0x1c9d   :  { %v3566_v51 = vpop.xlane.xlu2 %3565 }
0x1c9e   :  { %v3570_v50 = vsub.f32 %v3538_v25, %v3566_v51  ;;  %v3240_v52 = vpop.xlane.xlu1 %3239 }
0x1c9f   :  { %5288 = vrcp.f32 %v3240_v52  ;;  %v5139_v52 = vld [vmem:[%s6875_s5 + $0x3] ss:$0 sm:$0xff] }
0x1ca0   :  { %v3572_v27 = vmul.f32 1.442695, %v3570_v50 }
0x1ca1   :  { %v5287_v24 = vpop.eup %5286 }
0x1ca2   :  { %5290 = vpow2.f32 %v3572_v27  ;;  %v3469_v54 = vsel %vm306_vm11, %v5287_v24, 0.0 }
0x1ca3   :  { %3470 = vadd.xlane.f32.xlu1 %v3469_v54 }
0x1ca5   :  { %v5289_v45 = vpop.eup %5288  ;;  %v3243_v59 = vpop.xlane.xlu2 %3242 }
0x1ca6   :  { %v3246_v60 = vmul.f32 %v5289_v45, %v5281_v32  ;;  %5292 = vrcp.f32 %v3243_v59  ;;  %v3569_v40 = vpop.xlane.xlu0 %3568 }
0x1ca7   :  { %v3571_v62 = vsub.f32 %v3561_v55, %v3569_v40 }
0x1ca8   :  { %v5291_v53 = vpop.eup %5290  ;;  %v3248_v63 = vpack.c.bf16 %v3246_v60, %v3246_v60 }
0x1ca9   :  { %v3574_v3 = vmul.f32 1.442695, %v3571_v62  ;;  %v3576_v26 = vsel %vm306_vm11, %v5291_v53, 0.0 }
0x1caa   :  { %4789 = vmatmul.msk.bf16.vlgmr.msra.gmra.mxu3 %vm306_vm11, %v3248_v63  ;;  %3577 = vadd.xlane.f32.xlu2 %v3576_v26 }
0x1cab   :  { %5294 = vpow2.f32 %v3574_v3 }
0x1cac   :  { %v5293_v4 = vpop.eup %5292 }
0x1cad   :  { %v3247_v48 = vmul.f32 %v5293_v4, %v5283_v39 }
0x1caf   :  { %v3249_v5 = vpack.c.bf16 %v3247_v48, %v3247_v48  ;;  %v4837_v48 = vld [vmem:[%s6878_s8 + $0xf0] sm:$0xf] }
0x1cb1   :  { %v5295_v7 = vpop.eup %5294  ;;  %4790 = vmatmul.msk.bf16.vlgmr.msrb.gmra.mxu0 %vm306_vm11, %v3249_v5  ;;  %v5086_v5 = vld [vmem:[%s6878_s8 + $0xf4] sm:$0xf0] }
0x1cb2   :  { %v3579_v56 = vsel %vm306_vm11, %v5295_v7, 0.0 }
0x1cb3   :  { %3580 = vadd.xlane.f32.xlu0 %v3579_v56  ;;  %v4838_v56 = vor.u32 %v5086_v5, %v4837_v48  ;;  %v5099_v5 = vld [vmem:[%s6880_s10 + $0x1e0] sm:$0xff] }
0x1cb5   :  { %3769 = vmatpush.bf16.msrb.mxu1 %v4838_v56  ;;  %v5088_v56 = vld [vmem:[%s6880_s10 + $0x188] sm:$0xff] }
0x1cbc   :  { %3591 = vrot.lane.b32.xlu1 %v3590_v11, %s6907_s2 }
0x1cc2   :  { %3615 = vrot.lane.b32.xlu2 %v3614_v61, %s6907_s2  ;;  %v5084_v61 = vld [vmem:[%s6878_s8 + $0xe4] sm:$0xf0] }
0x1d0d   :  { %v3468_v15 = vpop.xlane.xlu0 %3467 }
0x1d0e   :  { %5296 = vrcp.f32 %v3468_v15  ;;  %v5083_v15 = vld [vmem:[%s6878_s8 + $0xe4] sm:$0xf] }
0x1d14   :  { %v5297_v36 = vpop.eup %5296 }
0x1d15   :  { %v3474_v17 = vmul.f32 %v5297_v36, %v5285_v38  ;;  %v4830_v36 = vor.u32 %v5084_v61, %v4829_v14  ;;  %v5096_v14 = vld [vmem:[%s6880_s10 + $0x1c8] sm:$0xff]  ;;  %v5095_v61 = vld [vmem:[%s6880_s10 + $0x1c0] sm:$0xff] }
0x1d16   :  { %v3471_v13 = vpop.xlane.xlu1 %3470 }
0x1d17   :  { %v3476_v19 = vpack.c.bf16 %v3474_v17, %v3474_v17  ;;  %5298 = vrcp.f32 %v3471_v13  ;;  %v4831_v17 = vld [vmem:[%s6878_s8 + $0xe8] sm:$0xf0]  ;;  %3770 = vmatpush.bf16.msrb.mxu1 %v4830_v36 }
0x1d18   :  { %v4834_v13 = vor.u32 %v5083_v15, %v4831_v17  ;;  %v4810_v15 = vld [vmem:[%s6879_s9 + $0x6] sm:$0x3] }
0x1d19   :  { %4793 = vmatmul.msk.bf16.vlgmr.msrb.gmra.mxu3 %vm306_vm11, %v3476_v19  ;;  %v4821_v19 = vld [vmem:[%s6878_s8 + $0xd0] sm:$0xf]  ;;  %v3718_v17 = vperm.slane %v4810_v15, 0 }
0x1d1d   :  { %v5299_v20 = vpop.eup %5298  ;;  %v3578_v18 = vpop.xlane.xlu2 %3577 }
0x1d1e   :  { %v3475_v57 = vmul.f32 %v5299_v20, %v5287_v24  ;;  %5300 = vrcp.f32 %v3578_v18  ;;  %v5082_v20 = vld [vmem:[%s6878_s8 + $0xd4] sm:$0xf0]  ;;  %v5081_v18 = vld [vmem:[%s6878_s8 + $0xd4] sm:$0xf] }
0x1d20   :  { %v3477_v23 = vpack.c.bf16 %v3475_v57, %v3475_v57  ;;  %v4822_v57 = vor.u32 %v5082_v20, %v4821_v19 }
0x1d22   :  { %4794 = vmatmul.msk.bf16.vlgmr.msra.gmra.mxu0 %vm306_vm11, %v3477_v23  ;;  %v4823_v23 = vld [vmem:[%s6878_s8 + $0xd8] sm:$0xf0]  ;;  %3771 = vmatpush.bf16.msrb.mxu1 %v4822_v57 }
0x1d24   :  { %v5301_v30 = vpop.eup %5300 }
0x1d25   :  { %v3616_v12 = vpop.permute.xlu2 %3615  ;;  %v3584_v31 = vmul.f32 %v5301_v30, %v5291_v53  ;;  %v4813_v30 = vld [vmem:[%s6878_s8 + $0xc0] sm:$0xf] }
0x1d26   :  { %v3621_v28 = vsel %vm409_vm9, %v3616_v12, 0  ;;  %v3581_v29 = vpop.xlane.xlu0 %3580 }
0x1d27   :  { %5302 = vrcp.f32 %v3581_v29  ;;  %3630 = vmatpush.bf16.msrb.mxu0 %v3621_v28  ;;  %v3586_v43 = vpack.c.bf16 %v3584_v31, %v3584_v31  ;;  %v4826_v28 = vor.u32 %v5081_v18, %v4823_v23  ;;  %v5079_v31 = vld [vmem:[%s6878_s8 + $0xc4] sm:$0xf]  ;;  %v3719_v18 = vperm.slane %v4810_v15, 1 }
0x1d2d   :  { %v5303_v34 = vpop.eup %5302  ;;  %v3383_v32 = vpop.f32.mrf.mxu3 }
0x1d2e   :  { %v3585_v33 = vmul.f32 %v5303_v34, %v5295_v7  ;;  %v3592_v25 = vpop.permute.xlu1 %3591  ;;  %v3402_v47 = vpop.f32.mrf.mxu0  ;;  %v3384_v21 = vadd.f32 %v3383_v32, %v6661_v9  ;;  %v5085_v7 = vld [vmem:[%s6878_s8 + $0xf4] sm:$0xf]  ;;  %v5080_v34 = vld [vmem:[%s6878_s8 + $0xc4] sm:$0xf0] }
0x1d2f   :  { %v3597_v37 = vsel %vm409_vm9, %v3592_v25, 0  ;;  %v3403_v22 = vadd.f32 %v3402_v47, %v6663_v6  ;;  %v4842_v11 = vor.u32 %v5085_v7, %v4839_v8  ;;  %v4815_v25 = vld [vmem:[%s6878_s8 + $0xc8] sm:$0xf0]  ;;  %v5098_v7 = vld [vmem:[%s6880_s10 + $0x1d8] sm:$0xff]  ;;  %v5097_v8 = vld [vmem:[%s6880_s10 + $0x1d0] sm:$0xff] }
0x1d30   :  { %v3587_v39 = vpack.c.bf16 %v3585_v33, %v3585_v33  ;;  %3606 = vmatpush.bf16.msra.mxu3 %v3597_v37  ;;  %v4814_v33 = vor.u32 %v5080_v34, %v4813_v30  ;;  %v4818_v47 = vor.u32 %v5079_v31, %v4815_v25  ;;  %v5094_v37 = vld [vmem:[%s6880_s10 + $0x1b8] sm:$0xff]  ;;  %v5142_v25 = vld [vmem:[%s6881_s11 + $0x3] ss:$0 sm:$0xff] }
0x1d31   :  { %3783 = vmatpush.bf16.msra.mxu2 %v4842_v11  ;;  %v5087_v11 = vld [vmem:[%s6880_s10 + $0x180] sm:$0xff] }
0x1d32   :  { %4798 = vmatmul.msk.bf16.vlgmr.msrb.gmra.mxu0 %vm306_vm11, %v3587_v39  ;;  %3772 = vmatpush.bf16.msrb.mxu1 %v4814_v33  ;;  %v5102_v39 = vld [vmem:[%s6880_s10 + $0x1f8] sm:$0xff] }
0x1d33   :  { %4797 = vmatmul.msk.bf16.vlgmr.msra.gmra.mxu3 %vm306_vm11, %v3586_v43  ;;  %3947 = vmatpush.bf16.msra.mxu0 %v5102_v39 }
0x1d34   :  { %3933 = vmatpush.bf16.msrb.mxu3 %v5094_v37 }
0x1d35   :  { %v3385_v41 = vpop.f32.mrf.mxu3  ;;  %3784 = vmatpush.bf16.msra.mxu2 %v4834_v13 }
0x1d36   :  { %v3404_v55 = vpop.f32.mrf.mxu0 }
0x1d37   :  { %v5093_v55 = vld [vmem:[%s6880_s10 + $0x1b0] sm:$0xff] }
0x1d38   :  { %3934 = vmatpush.bf16.msrb.mxu3 %v5093_v55 }
0x1d39   :  { %3785 = vmatpush.bf16.msra.mxu2 %v4826_v28 }
0x1d3d   :  { %3786 = vmatpush.bf16.msra.mxu2 %v4818_v47 }
0x1d9c   :  { %v3493_v42 = vpop.f32.mrf.mxu3 }
0x1d9d   :  { %v3516_v46 = vadd.f32 %v3493_v42, %v3384_v21  ;;  %v5101_v42 = vld [vmem:[%s6880_s10 + $0x1f0] sm:$0xff]  ;;  %v5100_v21 = vld [vmem:[%s6880_s10 + $0x1e8] sm:$0xff] }
0x1d9e   :  { %3948 = vmatpush.bf16.msra.mxu0 %v5101_v42 }
0x1d9f   :  { %v3512_v44 = vpop.f32.mrf.mxu0 }
0x1da0   :  { %v3517_v2 = vadd.f32 %v3512_v44, %v3403_v22 }
0x1da2   :  { %3949 = vmatpush.bf16.msra.mxu0 %v5100_v21 }
0x1da4   :  { %v3495_v1 = vpop.f32.mrf.mxu3 }
0x1da6   :  { %3950 = vmatpush.bf16.msra.mxu0 %v5099_v5 }
0x1da7   :  { %v3514_v58 = vpop.f32.mrf.mxu0 }
0x1daa   :  { %3951 = vmatpush.bf16.msra.mxu0 %v5098_v7 }
0x1dae   :  { %3952 = vmatpush.bf16.msra.mxu0 %v5097_v8 }
0x1daf   :  { %v3632_v16 = vpop.f32.mrf.mxu0 }
0x1db0   :  { %v3637_v50 = vadd.f32 %v3632_v16, %v3517_v2  ;;  %v5092_v16 = vld [vmem:[%s6880_s10 + $0x1a8] sm:$0xff] }
0x1db1   :  { %3935 = vmatpush.bf16.msrb.mxu3 %v5092_v16 }
0x1db2   :  { %v3639_v54 = vadd.f32 %v3637_v50, %v6493_v49  ;;  %3953 = vmatpush.bf16.msra.mxu0 %v5096_v14 }
0x1db4   :  { %v6703_v45 = vadd.f32 %v5139_v52, %v3639_v54 }
0x1db6   :  { %v3608_v38 = vpop.f32.mrf.mxu3  ;;  %v3654_v59 = vsel %vm65_vm0, %v6703_v45, 0.0  ;;  %3954 = vmatpush.bf16.msra.mxu0 %v5095_v61 }
0x1db7   :  { %v3636_v35 = vadd.f32 %v3608_v38, %v3516_v46  ;;  %v3634_v51 = vpop.f32.mrf.mxu0  ;;  %v5091_v38 = vld [vmem:[%s6880_s10 + $0x1a0] sm:$0xff] }
0x1db8   :  { %3936 = vmatpush.bf16.msrb.mxu3 %v5091_v38 }
0x1db9   :  { %v3638_v27 = vadd.f32 %v3636_v35, %v6488_v0 }
0x1dbb   :  { %v6698_v24 = vadd.f32 %v5139_v52, %v3638_v27 }
0x1dbd   :  { %v3651_v9 = vsel %vm65_vm0, %v6698_v24, 0.0 }
0x1dbe   :  { %3652 = vadd.xlane.f32.xlu0 %v3651_v9  ;;  %v3610_v6 = vpop.f32.mrf.mxu3 }
0x1dbf   :  { %v5140_v6 = vld [vmem:[%s6876_s6 + $0x3] ss:$0 sm:$0xff] }
0x1dc6   :  { %3655 = vadd.xlane.f32.xlu0 %v3654_v59 }
0x1e31   :  { %v3653_v60 = vpop.xlane.xlu0 %3652 }
0x1e32   :  { %v3657_v40 = vmul.f32 %v3653_v60, %v5449_v10 }
0x1e34   :  { %v6709_v0 = vsub.f32 %v6698_v24, %v3657_v40 }
0x1e36   :  { %v3661_v49 = vmul.f32 %v6709_v0, %v6709_v0 }
0x1e38   :  { %v3663_v62 = vsel %vm65_vm0, %v3661_v49, 0.0  ;;  %v5141_v49 = vld [vmem:[%s6877_s7 + $0x3] ss:$0 sm:$0xff] }
0x1e39   :  { %3664 = vadd.xlane.f32.xlu0 %v3663_v62  ;;  %v3656_v53 = vpop.xlane.xlu0 %3655 }
0x1e3a   :  { %v3658_v63 = vmul.f32 %v3656_v53, %v5449_v10 }
0x1e3c   :  { %v6716_v3 = vsub.f32 %v6703_v45, %v3658_v63 }
0x1e3e   :  { %v3662_v26 = vmul.f32 %v6716_v3, %v6716_v3 }
0x1e40   :  { %v3666_v4 = vsel %vm65_vm0, %v3662_v26, 0.0 }
0x1e41   :  { %3667 = vadd.xlane.f32.xlu1 %v3666_v4 }
0x1eac   :  { %v3665_v12 = vpop.xlane.xlu0 %3664 }
0x1ead   :  { %v3669_v29 = vmul.f32 %v3665_v12, %v5449_v10 }
0x1eaf   :  { %v3671_v32 = vadd.f32 1e-05, %v3669_v29 }
0x1eb1   :  { %5304 = vrsqrt.f32 %v3671_v32  ;;  %vm3679_vm9 = vweird.f32 %v3671_v32 }
0x1eb4   :  { %v3668_v43 = vpop.xlane.xlu1 %3667 }
0x1eb5   :  { %v3670_v41 = vmul.f32 %v3668_v43, %v5449_v10 }
0x1eb7   :  { %v5305_v44 = vpop.eup %5304  ;;  %v3672_v1 = vadd.f32 1e-05, %v3670_v41 }
0x1eb8   :  { %v3674_v58 = vmul.f32 %v5305_v44, %v3671_v32  ;;  %vm3680_vm8 = vweird.f32 %v5305_v44 }
0x1eb9   :  { %5306 = vrsqrt.f32 %v3672_v1  ;;  %vm3681_vm11 = vmor %vm3679_vm9, %vm3680_vm8  ;;  %vm3689_vm13 = vweird.f32 %v3672_v1 }
0x1eba   :  { %v3675_v22 = vmul.f32 %v5305_v44, %v3674_v58 }
0x1ebc   :  { %v3676_v46 = vmul.f32 0.5, %v3675_v22 }
0x1ebe   :  { %v3677_v2 = vsub.f32 1.5, %v3676_v46 }
0x1ebf   :  { %v5307_v35 = vpop.eup %5306 }
0x1ec0   :  { %v3678_v51 = vmul.f32 %v5305_v44, %v3677_v2  ;;  %v3684_v50 = vmul.f32 %v5307_v35, %v3672_v1  ;;  %vm3690_vm12 = vweird.f32 %v5307_v35 }
0x1ec1   :  { %vm3691_vm14 = vmor %vm3689_vm13, %vm3690_vm12 }
0x1ec2   :  { %v3685_v52 = vmul.f32 %v5307_v35, %v3684_v50  ;;  %v3682_v27 = vsel %vm3681_vm11, %v5305_v44, %v3678_v51 }
0x1ec3   :  { %v3693_v59 = vmul.f32 %v3682_v27, %v6709_v0  ;;  %v5090_v0 = vld [vmem:[%s6880_s10 + $0x198] sm:$0xff] }
0x1ec4   :  { %v3686_v54 = vmul.f32 0.5, %v3685_v52  ;;  %3937 = vmatpush.bf16.msrb.mxu3 %v5090_v0 }
0x1ec5   :  { %v3698_v62 = vmul.f32 %v5140_v6, %v3693_v59 }
0x1ec6   :  { %v3687_v9 = vsub.f32 1.5, %v3686_v54  ;;  %v5105_v54 = vld [vmem:[%s6884_s14 + $0x10] sm:$0xff] }
0x1ec7   :  { %v3703_v26 = vadd.f32 %v5141_v49, %v3698_v62 }
0x1ec8   :  { %v3688_v60 = vmul.f32 %v5307_v35, %v3687_v9  ;;  %v5104_v9 = vld [vmem:[%s6884_s14 + $0x8] sm:$0xff] }
0x1eca   :  { %v3692_v40 = vsel %vm3691_vm14, %v5307_v35, %v3688_v60 }
0x1ecb   :  { %v3694_v53 = vmul.f32 %v3692_v40, %v6716_v3  ;;  %v5089_v3 = vld [vmem:[%s6880_s10 + $0x190] sm:$0xff]  ;;  %v5103_v40 = vld [vmem:[%s6884_s14] sm:$0xff] }
0x1ecc   :  { %3938 = vmatpush.bf16.msrb.mxu3 %v5089_v3 }
0x1ecd   :  { %v3699_v63 = vmul.f32 %v5140_v6, %v3694_v53 }
0x1ecf   :  { %v3704_v4 = vadd.f32 %v5141_v49, %v3699_v63 }
0x1ed0   :  { %3939 = vmatpush.bf16.msrb.mxu3 %v5088_v56 }
0x1ed1   :  { %v3705_v48 = vpack.c.bf16 %v3704_v4, %v3703_v26 }
0x1ed3   :  { %4843 = vmatmul.msk.bf16.vlgmr.msrb.gmra.mxu1 %vm65_vm0, %v3705_v48  ;;  %4844 = vmatmul.msk.bf16.vlgmr.msra.gmra.mxu2 %vm65_vm0, %v3705_v48 }
0x1ed4   :  { %3940 = vmatpush.bf16.msrb.mxu3 %v5087_v11 }
0x1f50   :  { %v3774_v36 = vpop.f32.mrf.mxu1 }
0x1f51   :  { %v3775_v19 = vadd.f32 %v3774_v36, %v3718_v17 }
0x1f53   :  { %v3793_v23 = vmax.f32 %v3775_v19, 0.0 }
0x1f56   :  { %v3788_v13 = vpop.f32.mrf.mxu2 }
0x1f57   :  { %v3789_v28 = vadd.f32 %v3788_v13, %v3719_v18 }
0x1f58   :  { %v3776_v20 = vpop.f32.mrf.mxu1 }
0x1f59   :  { %v3777_v57 = vadd.f32 %v3776_v20, %v3718_v17  ;;  %v3794_v31 = vmax.f32 %v3789_v28, 0.0  ;;  %v5144_v17 = vld [vmem:[%s6883_s13] ss:$0 sm:$0xff]  ;;  %s4081_s13 = sshll.u32 %s6886_s16, 4  ;;  %s4082_s13 = int_to_ptr.hbm [resolvable:$true] %s4081_s13 }
0x1f5b   :  { %v3795_v12 = vmax.f32 %v3777_v57, 0.0 }
0x1f5d   :  { %v3797_v29 = vpack.c.bf16 %v3795_v12, %v3793_v23  ;;  %v5145_v12 = vld [vmem:[%s6885_s15] ss:$0 sm:$0xff] }
0x1f5e   :  { %v3790_v30 = vpop.f32.mrf.mxu2 }
0x1f5f   :  { %v3791_v34 = vadd.f32 %v3790_v30, %v3719_v18  ;;  %3941 = vmatmul.bf16.vlgmr.msrb.gmra.mxu3 %v3797_v29 }
0x1f61   :  { %v3796_v32 = vmax.f32 %v3791_v34, 0.0 }
0x1f63   :  { %v3798_v33 = vpack.c.bf16 %v3796_v32, %v3794_v31 }
0x1f65   :  { %3955 = vmatmul.bf16.vlgmr.msra.gmra.mxu0 %v3798_v33 }
0x1fe2   :  { %v3942_v47 = vpop.f32.mrf.mxu3  ;;  %v3956_v37 = vpop.f32.mrf.mxu0 }
0x1fe3   :  { %v3943_v39 = vadd.f32 %v5142_v25, %v3942_v47 }
0x1fe5   :  { %v3957_v43 = vadd.f32 %v3956_v37, %v3943_v39 }
0x1fe7   :  { %v3961_v41 = vadd.f32 %v3957_v43, %v6698_v24 }
0x1fe9   :  { %v3965_v55 = vsel %vm65_vm0, %v3961_v41, 0.0 }
0x1fea   :  { %v3944_v42 = vpop.f32.mrf.mxu3  ;;  %3966 = vadd.xlane.f32.xlu2 %v3965_v55  ;;  %v3958_v1 = vpop.f32.mrf.mxu0 }
0x1feb   :  { %v3945_v44 = vadd.f32 %v5142_v25, %v3944_v42 }
0x1fed   :  { %v3959_v58 = vadd.f32 %v3958_v1, %v3945_v44 }
0x1fef   :  { %v3962_v16 = vadd.f32 %v3959_v58, %v6703_v45  ;;  %v5106_v45 = vld [vmem:[%s6884_s14 + $0x18] sm:$0xff] }
0x1ff0   :  { %4063 = vmatpush.bf16.msra.mxu1 %v5106_v45 }
0x1ff1   :  { %v3968_v21 = vsel %vm65_vm0, %v3962_v16, 0.0 }
0x1ff2   :  { %3969 = vadd.xlane.f32.xlu0 %v3968_v21 }
0x1ff4   :  { %4064 = vmatpush.bf16.msra.mxu1 %v5105_v54 }
0x1ff8   :  { %4065 = vmatpush.bf16.msra.mxu1 %v5104_v9 }
0x1ffc   :  { %4066 = vmatpush.bf16.msra.mxu1 %v5103_v40 }
0x205d   :  { %v3967_v22 = vpop.xlane.xlu2 %3966 }
0x205e   :  { %v3971_v46 = vmul.f32 %v3967_v22, %v5449_v10 }
0x2060   :  { %v3973_v38 = vsub.f32 %v3961_v41, %v3971_v46 }
0x2062   :  { %v3975_v2 = vmul.f32 %v3973_v38, %v3973_v38 }
0x2064   :  { %v3977_v35 = vsel %vm65_vm0, %v3975_v2, 0.0 }
0x2065   :  { %v3970_v24 = vpop.xlane.xlu0 %3969  ;;  %3978 = vadd.xlane.f32.xlu0 %v3977_v35 }
0x2066   :  { %v3972_v51 = vmul.f32 %v3970_v24, %v5449_v10 }
0x2068   :  { %v3974_v50 = vsub.f32 %v3962_v16, %v3972_v51 }
0x206a   :  { %v3976_v52 = vmul.f32 %v3974_v50, %v3974_v50 }
0x206c   :  { %v3980_v27 = vsel %vm65_vm0, %v3976_v52, 0.0 }
0x206d   :  { %3981 = vadd.xlane.f32.xlu0 %v3980_v27 }
0x20d8   :  { %v3979_v6 = vpop.xlane.xlu0 %3978 }
0x20d9   :  { %v3983_v59 = vmul.f32 %v3979_v6, %v5449_v10 }
0x20db   :  { %v3985_v60 = vadd.f32 1e-05, %v3983_v59 }
0x20dd   :  { %5308 = vrsqrt.f32 %v3985_v60  ;;  %vm3993_vm1 = vweird.f32 %v3985_v60 }
0x20e0   :  { %v3982_v49 = vpop.xlane.xlu0 %3981 }
0x20e1   :  { %v3984_v62 = vmul.f32 %v3982_v49, %v5449_v10  ;;  %v5143_v10 = vld [vmem:[%s6882_s12] ss:$0 sm:$0xff]  ;;  %s5347_s12 = smov [#allocation2]  }
0x20e2   :  { %s4079_s1 = sshll.u32 %s5347_s12, 4  ;;  %s4080_s1 = int_to_ptr.vmem [resolvable:$true] %s4079_s1 }
0x20e3   :  { %v5309_v53 = vpop.eup %5308  ;;  %v3986_v63 = vadd.f32 1e-05, %v3984_v62 }
0x20e4   :  { %v3988_v26 = vmul.f32 %v5309_v53, %v3985_v60  ;;  %vm3994_vm15 = vweird.f32 %v5309_v53 }
0x20e5   :  { %5310 = vrsqrt.f32 %v3986_v63  ;;  %vm3995_vm2 = vmor %vm3993_vm1, %vm3994_vm15  ;;  %vm4003_vm4 = vweird.f32 %v3986_v63 }
0x20e6   :  { %v3989_v4 = vmul.f32 %v5309_v53, %v3988_v26 }
0x20e8   :  { %v3990_v48 = vmul.f32 0.5, %v3989_v4 }
0x20ea   :  { %v3991_v0 = vsub.f32 1.5, %v3990_v48 }
0x20eb   :  { %v5311_v5 = vpop.eup %5310 }
0x20ec   :  { %v3992_v3 = vmul.f32 %v5309_v53, %v3991_v0  ;;  %v3998_v7 = vmul.f32 %v5311_v5, %v3986_v63  ;;  %vm4004_vm3 = vweird.f32 %v5311_v5 }
0x20ed   :  { %vm4005_vm5 = vmor %vm4003_vm4, %vm4004_vm3 }
0x20ee   :  { %v3999_v56 = vmul.f32 %v5311_v5, %v3998_v7  ;;  %v3996_v8 = vsel %vm3995_vm2, %v5309_v53, %v3992_v3 }
0x20ef   :  { %v4007_v61 = vmul.f32 %v3996_v8, %v3973_v38 }
0x20f0   :  { %v4000_v11 = vmul.f32 0.5, %v3999_v56 }
0x20f1   :  { %v4012_v13 = vmul.f32 %v5143_v10, %v4007_v61 }
0x20f2   :  { %v4001_v14 = vsub.f32 1.5, %v4000_v11 }
0x20f3   :  { %v4017_v18 = vadd.f32 %v5144_v17, %v4012_v13 }
0x20f4   :  { %v4002_v15 = vmul.f32 %v5311_v5, %v4001_v14 }
0x20f6   :  { %v4006_v36 = vsel %vm4005_vm5, %v5311_v5, %v4002_v15 }
0x20f7   :  { %v4008_v19 = vmul.f32 %v4006_v36, %v3974_v50 }
0x20f9   :  { %v4013_v20 = vmul.f32 %v5143_v10, %v4008_v19 }
0x20fb   :  { %v4018_v57 = vadd.f32 %v5144_v17, %v4013_v20 }
0x20fd   :  { %v4019_v23 = vpack.c.bf16 %v4018_v57, %v4017_v18 }
0x20ff   :  { %4958 = vmatmul.msk.bf16.vlgmr.msra.gmra.mxu1 %vm65_vm0, %v4019_v23 }
0x217c   :  { %v4068_v28 = vpop.f32.mrf.mxu1 }
0x217d   :  { %v4069_v29 = vadd.f32 %v5145_v12, %v4068_v28 }
0x217f   :  { %4073 = vst [vmem:[#allocation2] sm:$0xff] %v4069_v29 }
0x2184   :  { %v4070_v30 = vpop.f32.mrf.mxu1 }
0x2185   :  { %v4071_v34 = vadd.f32 %v5145_v12, %v4070_v30 }
0x2187   :  { %4074 = vst [vmem:[#allocation2 + $0x8] sm:$0xff] %v4071_v34 }
0x2188   :  { %4087 = dma.vmem_to_hbm [thread:$0]  %s4080_s1, 256, %s4082_s13, [#allocation3], %s5348_s25, %s5348_s25, %s5349_s30  }
0x2189   :  { %5336 = dma.done.wait [#allocation3], 256  }
0x218a   :  { %5337 = vsyncadd [#allocation3], 4294967040 }
0x218b   :  { %4092 = vsyncpa [#allocation3], 1 }

</bundles_post_ra>
